<compile_context>
chip_gen: v7x
topology: tpu7x:2x2x1
jax: 0.10.0
libtpu: 0.0.40
codegen_flags: <defaults>
</compile_context>

<pallas_src>
import functools

import jax
import jax.numpy as jnp
import numpy as np
from jax.experimental import pallas as pl
from jax.experimental.pallas import tpu as pltpu

LANES = 128
CAND_SUBLANES = 8   # per-tile candidate block is (8, 128): lane/sublane dense


def _csr_retrieval_kernel(idx_ref, vals_ref, *refs, top_k, num_docs,
                          terms_per_step, chunk_rows, n_chunks, c_sub):
    T = terms_per_step
    col_refs = refs[:T]
    cand_val_ref, cand_id_ref, acc_ref = refs[T:]

    rows = chunk_rows * n_chunks
    chunk_docs = chunk_rows * c_sub
    tile_docs = rows * c_sub

    j = pl.program_id(0)          # doc tile   (parallel)
    g = pl.program_id(1)          # term batch (arbitrary / reduction)
    base = g * T

    # ---- accumulation: sum T scaled gathered columns in vregs, touch the f32
    # accumulator once per step.  f32 accumulation preserved ('accuracy'
    # objective); the bf16-product VALU trim suggested for v7x is deliberately
    # not applied (it would round per-term products to bf16).
    contrib = col_refs[0][0, 0].astype(jnp.float32) * vals_ref[base]
    for t in range(1, T):
        contrib = contrib + col_refs[t][0, 0].astype(jnp.float32) * vals_ref[base + t]

    @pl.when(g == 0)
    def _():
        acc_ref[...] = contrib        # first step: direct write, no zero-init pass

    @pl.when(g != 0)
    def _():
        acc_ref[...] += contrib

    # ---- epilogue (last term step): per-tile top-k candidates, two-stage.
    @pl.when(g == pl.num_programs(1) - 1)
    def _():
        tile_base = j * tile_docs
        valid = num_docs - tile_base        # docs in this tile (>= tile_docs unless last)

        @pl.when(valid < tile_docs)         # only the last tile carries padding
        def _():
            row_i = jax.lax.broadcasted_iota(jnp.int32, (rows, c_sub), 0)
            lane_i = jax.lax.broadcasted_iota(jnp.int32, (rows, c_sub), 1)
            keep = row_i * c_sub + lane_i < valid
            acc_ref[...] = jnp.where(keep, acc_ref[...], -jnp.inf)

        acc = acc_ref[...]

        # Stage 1: one pass -> per-chunk maxima (chunk = chunk_rows sublanes,
        # i.e. a contiguous doc range of chunk_docs docs).
        chunk_iota = jax.lax.broadcasted_iota(jnp.int32, (1, n_chunks), 1)
        cmax = jnp.full((1, n_chunks), -jnp.inf, dtype=jnp.float32)
        for ci in range(n_chunks):
            cm = jnp.max(acc[ci * chunk_rows:(ci + 1) * chunk_rows, :])
            cmax = jnp.where(chunk_iota == ci, cm, cmax)

        # Hoisted chunk-local flat-doc iota (small: chunk_rows x c_sub).
        loc_row = jax.lax.broadcasted_iota(jnp.int32, (chunk_rows, c_sub), 0)
        loc_lane = jax.lax.broadcasted_iota(jnp.int32, (chunk_rows, c_sub), 1)
        loc_flat = loc_row * c_sub + loc_lane

        pos = (jax.lax.broadcasted_iota(jnp.int32, (CAND_SUBLANES, LANES), 0) * LANES
               + jax.lax.broadcasted_iota(jnp.int32, (CAND_SUBLANES, LANES), 1))
        out_vals = jnp.full((CAND_SUBLANES, LANES), -jnp.inf, dtype=jnp.float32)
        out_ids = jnp.zeros((CAND_SUBLANES, LANES), dtype=jnp.int32)

        # Stage 2: statically-unrolled top_k loop; each iteration re-reads,
        # masks and re-maxes only the consumed chunk (dynamic sublane slice).
        for k in range(top_k):
            m = jnp.max(cmax)
            # lowest chunk among maxima -> lowest global doc id tie-break
            c = jnp.min(jnp.where(cmax == m, chunk_iota, jnp.int32(n_chunks)))
            row0 = pl.multiple_of(c * chunk_rows, chunk_rows)
            chunk = acc_ref[pl.ds(row0, chunk_rows), :]
            loc = jnp.min(jnp.where(chunk == m, loc_flat, jnp.int32(chunk_docs)))
            doc = tile_base + c * chunk_docs + loc
            out_vals = jnp.where(pos == k, m, out_vals)
            out_ids = jnp.where(pos == k, doc, out_ids)
            # consume the selected element in place; refresh only this chunk's max
            chunk = jnp.where(loc_flat == loc, -jnp.inf, chunk)
            acc_ref[pl.ds(row0, chunk_rows), :] = chunk
            cmax = jnp.where(chunk_iota == c, jnp.max(chunk), cmax)

        cand_val_ref[0] = out_vals          # (8, 128) lane-dense unmasked store
        cand_id_ref[0] = out_ids


def densify_csc(ccol, rindices, cvalues, shape, *, chunk_rows=16, n_chunks=4,
                c_sub=128, matrix_dtype=jnp.bfloat16):
    """Glue: densify the CSC matrix into a doc-tiled, lane/sublane-dense slab of
    shape (num_terms, num_doc_tiles, chunk_rows*n_chunks, c_sub).  Doc id d lives
    at (d // tile_docs, (d % tile_docs) // c_sub, d % c_sub).  Duplicate row
    indices inside a column are summed in f32 (index_add_ semantics) before the
    narrowing cast.
    # TODO(synk): for the 'performance' objective, store int8 + per-term scale and
    # dequantize in-kernel (halves HBM bytes again on HBM-starved v5e)."""
    num_docs, num_terms = shape
    rows = chunk_rows * n_chunks
    tile_docs = rows * c_sub
    num_tiles = -(-num_docs // tile_docs)
    pad_docs = num_tiles * tile_docs
    nnz = rindices.shape[0]
    col_ids = jnp.searchsorted(ccol, jnp.arange(nnz, dtype=ccol.dtype),
                               side="right") - 1
    dense = jnp.zeros((num_terms, pad_docs), jnp.float32).at[
        col_ids, rindices].add(cvalues.astype(jnp.float32))
    dense4 = dense.reshape(num_terms, num_tiles, rows, c_sub).astype(matrix_dtype)
    return dense4, num_tiles, tile_docs


def csr_sparse_retrieval(dense4, num_docs, indices, values, top_k, *,
                         terms_per_step=8, chunk_rows=16, n_chunks=4,
                         col_buffers=3):
    """dense4: (num_terms, num_tiles, rows, c_sub) densified/padded CSC matrix
    (see densify_csc).  indices, values: (1, nnz) as in the torch forward."""
    num_terms, num_tiles, rows, c_sub = dense4.shape
    assert rows == chunk_rows * n_chunks
    assert top_k <= CAND_SUBLANES * LANES
    tile_docs = rows * c_sub
    T = terms_per_step

    indices = jnp.squeeze(indices, 0).astype(jnp.int32)    # glue: .squeeze(0)
    values = jnp.squeeze(values, 0).astype(jnp.float32)
    nnz = indices.shape[0]
    nnz_pad = ((nnz + T - 1) // T) * T
    num_steps = nnz_pad // T

    # Sort + dedupe query terms (accumulation is linear -> result unchanged up to
    # f32 rounding): duplicate term weights are segment-summed so each distinct
    # column is gathered exactly once; padded tail slots alias the last real term
    # index with weight 0 so their repeated block index lets Pallas skip the DMA.
    order = jnp.argsort(indices)
    si, sv = indices[order], values[order]
    is_new = jnp.concatenate([jnp.ones((1,), jnp.bool_), si[1:] != si[:-1]])
    seg = jnp.cumsum(is_new.astype(jnp.int32)) - 1
    n_unique = seg[-1] + 1
    summed = jnp.zeros((nnz_pad,), jnp.float32).at[seg].add(sv)
    gathered = jnp.zeros((nnz_pad,), jnp.int32).at[seg].max(si)
    slot = jnp.arange(nnz_pad, dtype=jnp.int32)
    q_idx = jnp.where(slot < n_unique, gathered, si[-1])
    q_val = jnp.where(slot < n_unique, summed, 0.0)

    kernel = functools.partial(
        _csr_retrieval_kernel, top_k=top_k, num_docs=num_docs,
        terms_per_step=T, chunk_rows=chunk_rows, n_chunks=n_chunks, c_sub=c_sub)

    def build_and_run(buffers):
        def col_spec(t):
            imap = lambda j, g, idx_ref, t=t: (idx_ref[g * T + t], j, 0, 0)
            bshape = (1, 1, rows, c_sub)
            if buffers != 2 and hasattr(pl, "Buffered"):
                try:
                    return pl.BlockSpec(bshape, imap,
                                        pipeline_mode=pl.Buffered(buffers))
                except TypeError:     # Pallas version without pipeline_mode kwarg
                    pass
            return pl.BlockSpec(bshape, imap)

        cand_spec = pl.BlockSpec((1, CAND_SUBLANES, LANES),
                                 lambda j, g, idx_ref: (j, 0, 0))
        grid_spec = pltpu.PrefetchScalarGridSpec(
            num_scalar_prefetch=1,                 # `indices` drives the gathers
            grid=(num_tiles, num_steps),           # doc tiles outer, term steps inner
            in_specs=([pl.BlockSpec(memory_space=pltpu.MemorySpace.SMEM)]
                      + [col_spec(t) for t in range(T)]),
            out_specs=[cand_spec, cand_spec],
            scratch_shapes=[pltpu.VMEM((rows, c_sub), jnp.float32)])

        # vmem limit computed from actual buffer sizes (+ headroom), not hard-coded.
        col_bytes = rows * c_sub * dense4.dtype.itemsize
        vmem_bytes = (T * max(2, buffers) * col_bytes       # gathered column buffers
                      + rows * c_sub * 4                    # resident f32 accumulator
                      + 2 * 2 * CAND_SUBLANES * LANES * 4   # candidate out blocks
                      + (8 << 20))                          # epilogue temps / headroom
        vmem_bytes = int(min(100 << 20, max(16 << 20, vmem_bytes)))

        return pl.pallas_call(
            kernel,
            grid_spec=grid_spec,
            out_shape=(
                jax.ShapeDtypeStruct((num_tiles, CAND_SUBLANES, LANES), jnp.float32),
                jax.ShapeDtypeStruct((num_tiles, CAND_SUBLANES, LANES), jnp.int32),
            ),
            compiler_params=pltpu.CompilerParams(
                dimension_semantics=("parallel", "arbitrary"),
                vmem_limit_bytes=vmem_bytes),
        )(q_idx, q_val, *([dense4] * T))

    if col_buffers != 2:
        try:
            cand_v, cand_i = build_and_run(col_buffers)
        except Exception:   # keep runnable if Buffered(k>2) is unsupported here
            cand_v, cand_i = build_and_run(2)
    else:
        cand_v, cand_i = build_and_run(2)

    # Final merge of per-tile candidates (tiny: num_tiles * top_k elements).
    # Candidates are tile-major / rank-minor, so lax.top_k's lowest-position
    # tie-break reproduces the lowest-doc-index tie-break.
    cand_v = cand_v.reshape(num_tiles, CAND_SUBLANES * LANES)[:, :top_k].reshape(-1)
    cand_i = cand_i.reshape(num_tiles, CAND_SUBLANES * LANES)[:, :top_k].reshape(-1)
    top_vals, pos = jax.lax.top_k(cand_v, top_k)
    # TODO(synk): torch returns int64 indices; int32 is fine for num_docs < 2^31.
    top_idx = cand_i[pos]
    return top_vals, top_idx


if __name__ == "__main__":
    # Deterministic synthetic CSC "parameters" (ccol, rindices, cvalues, shape).
    NUM_DOCS = 10_000    # > one doc tile (8192) -> exercises tiling + merge + padding
    NUM_TERMS = 64
    NNZ_PER_COL = 32
    TOP_K = 10
    QUERY_NNZ = 13       # not a multiple of terms_per_step; duplicates likely

    key = jax.random.PRNGKey(0)
    k1, k2, k3, k4 = jax.random.split(key, 4)

    ccol = jnp.arange(NUM_TERMS + 1, dtype=jnp.int32) * NNZ_PER_COL
    rindices = jax.random.randint(k1, (NUM_TERMS * NNZ_PER_COL,), 0, NUM_DOCS,
                                  dtype=jnp.int32)
    cvalues = jax.random.uniform(k2, (NUM_TERMS * NNZ_PER_COL,), jnp.float32)
    shape = (NUM_DOCS, NUM_TERMS)

    # Glue: densify + pad + reshape to the doc-tiled lane/sublane-dense layout.
    dense4, num_tiles, tile_docs = densify_csc(ccol, rindices, cvalues, shape)

    # Query with the leading batch dim of 1 that forward() squeezes; term ids are
    # drawn from a small range so the dedupe path is exercised.
    q_indices = jax.random.randint(k3, (1, QUERY_NNZ), 0, 16, dtype=jnp.int32)
    q_values = jax.random.uniform(k4, (1, QUERY_NNZ), jnp.float32)

    top_vals, top_idx = csr_sparse_retrieval(dense4, NUM_DOCS, q_indices,
                                             q_values, TOP_K)
    top_vals, top_idx = jax.block_until_ready((top_vals, top_idx))

    # Pure-JAX reference of the same semantics (same bf16-stored matrix, f32
    # accumulation on the VPU), restricted to real (unpadded) doc ids.
    dense_flat = dense4.astype(jnp.float32).reshape(NUM_TERMS, -1)
    acc = jnp.sum(dense_flat[q_indices[0]] * q_values[0][:, None],
                  axis=0)[:NUM_DOCS]
    ref_vals, ref_idx = jax.lax.top_k(acc, TOP_K)

    top_vals_np = np.asarray(top_vals)
    top_idx_np = np.asarray(top_idx)
    acc_np = np.asarray(acc)

    np.testing.assert_allclose(top_vals_np, np.asarray(ref_vals),
                               rtol=1e-5, atol=1e-6)
    assert np.all((top_idx_np >= 0) & (top_idx_np < NUM_DOCS))
    # Tie-robust index check: the selected docs must realize the reference top-k
    # scores (exact index parity on float ties is not guaranteed across backends).
    np.testing.assert_allclose(acc_np[top_idx_np], np.asarray(ref_vals),
                               rtol=1e-5, atol=1e-6)

    print("KERNEL_OK")
</pallas_src>

<mosaic_0001>
module attributes {stable_mosaic.version = 11 : i64} {
  func.func @_csr_retrieval_kernel(%arg0: i32, %arg1: i32, %arg2: memref<16xi32, #tpu.memory_space<smem>>, %arg3: memref<16xf32, #tpu.memory_space<smem>>, %arg4: memref<1x1x64x128xbf16, #tpu.memory_space<vmem>>, %arg5: memref<1x1x64x128xbf16, #tpu.memory_space<vmem>>, %arg6: memref<1x1x64x128xbf16, #tpu.memory_space<vmem>>, %arg7: memref<1x1x64x128xbf16, #tpu.memory_space<vmem>>, %arg8: memref<1x1x64x128xbf16, #tpu.memory_space<vmem>>, %arg9: memref<1x1x64x128xbf16, #tpu.memory_space<vmem>>, %arg10: memref<1x1x64x128xbf16, #tpu.memory_space<vmem>>, %arg11: memref<1x1x64x128xbf16, #tpu.memory_space<vmem>>, %arg12: memref<1x8x128xf32, #tpu.memory_space<vmem>>, %arg13: memref<1x8x128xi32, #tpu.memory_space<vmem>>, %arg14: memref<64x128xf32, #tpu.memory_space<vmem>>) attributes {dimension_semantics = [#tpu.dimension_semantics<parallel>, #tpu.dimension_semantics<arbitrary>], iteration_bounds = array<i64: 2, 2>, scalar_prefetch = 1 : i64, scratch_operands = 1 : i64, tpu.core_type = #tpu.core_type<tc>, window_params = [{transform_indices = @transform_0, window_bounds = array<i64: 16>}, {transform_indices = @transform_1, window_bounds = array<i64: 1, 1, 64, 128>}, {transform_indices = @transform_2, window_bounds = array<i64: 1, 1, 64, 128>}, {transform_indices = @transform_3, window_bounds = array<i64: 1, 1, 64, 128>}, {transform_indices = @transform_4, window_bounds = array<i64: 1, 1, 64, 128>}, {transform_indices = @transform_5, window_bounds = array<i64: 1, 1, 64, 128>}, {transform_indices = @transform_6, window_bounds = array<i64: 1, 1, 64, 128>}, {transform_indices = @transform_7, window_bounds = array<i64: 1, 1, 64, 128>}, {transform_indices = @transform_8, window_bounds = array<i64: 1, 1, 64, 128>}, {transform_indices = @transform_9, window_bounds = array<i64: 1, 8, 128>}, {transform_indices = @transform_10, window_bounds = array<i64: 1, 8, 128>}]} {
    %c8_i32 = arith.constant 8 : i32
    %0 = arith.muli %arg1, %c8_i32 : i32
    %c0 = arith.constant 0 : index
    %c0_0 = arith.constant 0 : index
    %c0_1 = arith.constant 0 : index
    %c0_2 = arith.constant 0 : index
    %1 = vector.load %arg4[%c0, %c0_0, %c0_1, %c0_2] : memref<1x1x64x128xbf16, #tpu.memory_space<vmem>>, vector<1x1x64x128xbf16>
    %2 = vector.shape_cast %1 : vector<1x1x64x128xbf16> to vector<64x128xbf16>
    %3 = arith.extf %2 : vector<64x128xbf16> to vector<64x128xf32>
    %4 = arith.index_cast %0 : i32 to index
    %5 = memref.load %arg3[%4] : memref<16xf32, #tpu.memory_space<smem>>
    %6 = vector.broadcast %5 : f32 to vector<64x128xf32>
    %7 = arith.mulf %3, %6 : vector<64x128xf32>
    %c0_3 = arith.constant 0 : index
    %c0_4 = arith.constant 0 : index
    %c0_5 = arith.constant 0 : index
    %c0_6 = arith.constant 0 : index
    %8 = vector.load %arg5[%c0_3, %c0_4, %c0_5, %c0_6] : memref<1x1x64x128xbf16, #tpu.memory_space<vmem>>, vector<1x1x64x128xbf16>
    %9 = vector.shape_cast %8 : vector<1x1x64x128xbf16> to vector<64x128xbf16>
    %10 = arith.extf %9 : vector<64x128xbf16> to vector<64x128xf32>
    %c1_i32 = arith.constant 1 : i32
    %11 = arith.addi %0, %c1_i32 : i32
    %12 = arith.index_cast %11 : i32 to index
    %13 = memref.load %arg3[%12] : memref<16xf32, #tpu.memory_space<smem>>
    %14 = vector.broadcast %13 : f32 to vector<64x128xf32>
    %15 = arith.mulf %10, %14 : vector<64x128xf32>
    %16 = arith.addf %7, %15 : vector<64x128xf32>
    %c0_7 = arith.constant 0 : index
    %c0_8 = arith.constant 0 : index
    %c0_9 = arith.constant 0 : index
    %c0_10 = arith.constant 0 : index
    %17 = vector.load %arg6[%c0_7, %c0_8, %c0_9, %c0_10] : memref<1x1x64x128xbf16, #tpu.memory_space<vmem>>, vector<1x1x64x128xbf16>
    %18 = vector.shape_cast %17 : vector<1x1x64x128xbf16> to vector<64x128xbf16>
    %19 = arith.extf %18 : vector<64x128xbf16> to vector<64x128xf32>
    %c2_i32 = arith.constant 2 : i32
    %20 = arith.addi %0, %c2_i32 : i32
    %21 = arith.index_cast %20 : i32 to index
    %22 = memref.load %arg3[%21] : memref<16xf32, #tpu.memory_space<smem>>
    %23 = vector.broadcast %22 : f32 to vector<64x128xf32>
    %24 = arith.mulf %19, %23 : vector<64x128xf32>
    %25 = arith.addf %16, %24 : vector<64x128xf32>
    %c0_11 = arith.constant 0 : index
    %c0_12 = arith.constant 0 : index
    %c0_13 = arith.constant 0 : index
    %c0_14 = arith.constant 0 : index
    %26 = vector.load %arg7[%c0_11, %c0_12, %c0_13, %c0_14] : memref<1x1x64x128xbf16, #tpu.memory_space<vmem>>, vector<1x1x64x128xbf16>
    %27 = vector.shape_cast %26 : vector<1x1x64x128xbf16> to vector<64x128xbf16>
    %28 = arith.extf %27 : vector<64x128xbf16> to vector<64x128xf32>
    %c3_i32 = arith.constant 3 : i32
    %29 = arith.addi %0, %c3_i32 : i32
    %30 = arith.index_cast %29 : i32 to index
    %31 = memref.load %arg3[%30] : memref<16xf32, #tpu.memory_space<smem>>
    %32 = vector.broadcast %31 : f32 to vector<64x128xf32>
    %33 = arith.mulf %28, %32 : vector<64x128xf32>
    %34 = arith.addf %25, %33 : vector<64x128xf32>
    %c0_15 = arith.constant 0 : index
    %c0_16 = arith.constant 0 : index
    %c0_17 = arith.constant 0 : index
    %c0_18 = arith.constant 0 : index
    %35 = vector.load %arg8[%c0_15, %c0_16, %c0_17, %c0_18] : memref<1x1x64x128xbf16, #tpu.memory_space<vmem>>, vector<1x1x64x128xbf16>
    %36 = vector.shape_cast %35 : vector<1x1x64x128xbf16> to vector<64x128xbf16>
    %37 = arith.extf %36 : vector<64x128xbf16> to vector<64x128xf32>
    %c4_i32 = arith.constant 4 : i32
    %38 = arith.addi %0, %c4_i32 : i32
    %39 = arith.index_cast %38 : i32 to index
    %40 = memref.load %arg3[%39] : memref<16xf32, #tpu.memory_space<smem>>
    %41 = vector.broadcast %40 : f32 to vector<64x128xf32>
    %42 = arith.mulf %37, %41 : vector<64x128xf32>
    %43 = arith.addf %34, %42 : vector<64x128xf32>
    %c0_19 = arith.constant 0 : index
    %c0_20 = arith.constant 0 : index
    %c0_21 = arith.constant 0 : index
    %c0_22 = arith.constant 0 : index
    %44 = vector.load %arg9[%c0_19, %c0_20, %c0_21, %c0_22] : memref<1x1x64x128xbf16, #tpu.memory_space<vmem>>, vector<1x1x64x128xbf16>
    %45 = vector.shape_cast %44 : vector<1x1x64x128xbf16> to vector<64x128xbf16>
    %46 = arith.extf %45 : vector<64x128xbf16> to vector<64x128xf32>
    %c5_i32 = arith.constant 5 : i32
    %47 = arith.addi %0, %c5_i32 : i32
    %48 = arith.index_cast %47 : i32 to index
    %49 = memref.load %arg3[%48] : memref<16xf32, #tpu.memory_space<smem>>
    %50 = vector.broadcast %49 : f32 to vector<64x128xf32>
    %51 = arith.mulf %46, %50 : vector<64x128xf32>
    %52 = arith.addf %43, %51 : vector<64x128xf32>
    %c0_23 = arith.constant 0 : index
    %c0_24 = arith.constant 0 : index
    %c0_25 = arith.constant 0 : index
    %c0_26 = arith.constant 0 : index
    %53 = vector.load %arg10[%c0_23, %c0_24, %c0_25, %c0_26] : memref<1x1x64x128xbf16, #tpu.memory_space<vmem>>, vector<1x1x64x128xbf16>
    %54 = vector.shape_cast %53 : vector<1x1x64x128xbf16> to vector<64x128xbf16>
    %55 = arith.extf %54 : vector<64x128xbf16> to vector<64x128xf32>
    %c6_i32 = arith.constant 6 : i32
    %56 = arith.addi %0, %c6_i32 : i32
    %57 = arith.index_cast %56 : i32 to index
    %58 = memref.load %arg3[%57] : memref<16xf32, #tpu.memory_space<smem>>
    %59 = vector.broadcast %58 : f32 to vector<64x128xf32>
    %60 = arith.mulf %55, %59 : vector<64x128xf32>
    %61 = arith.addf %52, %60 : vector<64x128xf32>
    %c0_27 = arith.constant 0 : index
    %c0_28 = arith.constant 0 : index
    %c0_29 = arith.constant 0 : index
    %c0_30 = arith.constant 0 : index
    %62 = vector.load %arg11[%c0_27, %c0_28, %c0_29, %c0_30] : memref<1x1x64x128xbf16, #tpu.memory_space<vmem>>, vector<1x1x64x128xbf16>
    %63 = vector.shape_cast %62 : vector<1x1x64x128xbf16> to vector<64x128xbf16>
    %64 = arith.extf %63 : vector<64x128xbf16> to vector<64x128xf32>
    %c7_i32 = arith.constant 7 : i32
    %65 = arith.addi %0, %c7_i32 : i32
    %66 = arith.index_cast %65 : i32 to index
    %67 = memref.load %arg3[%66] : memref<16xf32, #tpu.memory_space<smem>>
    %68 = vector.broadcast %67 : f32 to vector<64x128xf32>
    %69 = arith.mulf %64, %68 : vector<64x128xf32>
    %70 = arith.addf %61, %69 : vector<64x128xf32>
    %c0_i32 = arith.constant 0 : i32
    %71 = arith.cmpi eq, %arg1, %c0_i32 : i32
    %72 = arith.extui %71 : i1 to i32
    %c0_i32_31 = arith.constant 0 : i32
    %73 = arith.cmpi ne, %72, %c0_i32_31 : i32
    scf.if %73 {
      %c0_36 = arith.constant 0 : index
      %c0_37 = arith.constant 0 : index
      %80 = vector.load %arg14[%c0_36, %c0_37] : memref<64x128xf32, #tpu.memory_space<vmem>>, vector<64x128xf32>
      tpu.vector_store %arg14[%c0_36, %c0_37], %70 {strides = array<i32>} : memref<64x128xf32, #tpu.memory_space<vmem>>, vector<64x128xf32>,
    } else {
    }
    %c0_i32_32 = arith.constant 0 : i32
    %74 = arith.cmpi ne, %arg1, %c0_i32_32 : i32
    %75 = arith.extui %74 : i1 to i32
    %c0_i32_33 = arith.constant 0 : i32
    %76 = arith.cmpi ne, %75, %c0_i32_33 : i32
    scf.if %76 {
      %c0_36 = arith.constant 0 : index
      %c0_37 = arith.constant 0 : index
      %80 = vector.load %arg14[%c0_36, %c0_37] : memref<64x128xf32, #tpu.memory_space<vmem>>, vector<64x128xf32>
      %81 = arith.addf %80, %70 : vector<64x128xf32>
      %c0_38 = arith.constant 0 : index
      %c0_39 = arith.constant 0 : index
      %82 = vector.load %arg14[%c0_38, %c0_39] : memref<64x128xf32, #tpu.memory_space<vmem>>, vector<64x128xf32>
      tpu.vector_store %arg14[%c0_38, %c0_39], %81 {strides = array<i32>} : memref<64x128xf32, #tpu.memory_space<vmem>>, vector<64x128xf32>,
    } else {
    }
    %c1_i32_34 = arith.constant 1 : i32
    %77 = arith.cmpi eq, %arg1, %c1_i32_34 : i32
    %78 = arith.extui %77 : i1 to i32
    %c0_i32_35 = arith.constant 0 : i32
    %79 = arith.cmpi ne, %78, %c0_i32_35 : i32
    scf.if %79 {
      %c8192_i32 = arith.constant 8192 : i32
      %80 = arith.muli %arg0, %c8192_i32 : i32
      %c10000_i32 = arith.constant 10000 : i32
      %81 = arith.subi %c10000_i32, %80 : i32
      %c8192_i32_36 = arith.constant 8192 : i32
      %82 = arith.cmpi slt, %81, %c8192_i32_36 : i32
      %83 = arith.extui %82 : i1 to i32
      %c0_i32_37 = arith.constant 0 : i32
      %84 = arith.cmpi ne, %83, %c0_i32_37 : i32
      scf.if %84 {
        %624 = tpu.iota {dimensions = array<i32: 0>} : vector<64x128xi32>
        %625 = tpu.iota {dimensions = array<i32: 1>} : vector<64x128xi32>
        %c128_i32_183 = arith.constant 128 : i32
        %626 = vector.broadcast %c128_i32_183 : i32 to vector<64x128xi32>
        %627 = arith.muli %624, %626 : vector<64x128xi32>
        %628 = arith.addi %627, %625 : vector<64x128xi32>
        %629 = vector.broadcast %81 : i32 to vector<64x128xi32>
        %630 = arith.cmpi slt, %628, %629 : vector<64x128xi32>
        %c0_184 = arith.constant 0 : index
        %c0_185 = arith.constant 0 : index
        %631 = vector.load %arg14[%c0_184, %c0_185] : memref<64x128xf32, #tpu.memory_space<vmem>>, vector<64x128xf32>
        %cst_186 = arith.constant 0xFF800000 : f32
        %632 = vector.broadcast %cst_186 : f32 to vector<64x128xf32>
        %633 = arith.select %630, %631, %632 : vector<64x128xi1>, vector<64x128xf32>
        %c0_187 = arith.constant 0 : index
        %c0_188 = arith.constant 0 : index
        %634 = vector.load %arg14[%c0_187, %c0_188] : memref<64x128xf32, #tpu.memory_space<vmem>>, vector<64x128xf32>
        tpu.vector_store %arg14[%c0_187, %c0_188], %633 {strides = array<i32>} : memref<64x128xf32, #tpu.memory_space<vmem>>, vector<64x128xf32>,
      } else {
      }
      %c0_38 = arith.constant 0 : index
      %c0_39 = arith.constant 0 : index
      %85 = vector.load %arg14[%c0_38, %c0_39] : memref<64x128xf32, #tpu.memory_space<vmem>>, vector<64x128xf32>
      %86 = tpu.iota {dimensions = array<i32: 1>} : vector<1x4xi32>
      %cst = arith.constant 0xFF800000 : f32
      %87 = vector.broadcast %cst : f32 to vector<1x4xf32>
      %88 = vector.extract_strided_slice %85 {offsets = [0, 0], sizes = [16, 128], strides = [1, 1]} : vector<64x128xf32> to vector<16x128xf32>
      %89 = vector.shape_cast %88 : vector<16x128xf32> to vector<1x16x128xf32>
      %cst_40 = arith.constant dense<0xFF800000> : vector<1xf32>
      %90 = vector.multi_reduction <maximumf>, %89, %cst_40 [1, 2] : vector<1x16x128xf32> to vector<1xf32>
      %91 = vector.shape_cast %90 : vector<1xf32> to vector<1x1x1xf32>
      %92 = vector.extract %91[0, 0, 0] : f32 from vector<1x1x1xf32>
      %c0_i32_41 = arith.constant 0 : i32
      %93 = vector.broadcast %c0_i32_41 : i32 to vector<1x4xi32>
      %94 = arith.cmpi eq, %86, %93 : vector<1x4xi32>
      %95 = vector.broadcast %92 : f32 to vector<1x4xf32>
      %96 = arith.select %94, %95, %87 : vector<1x4xi1>, vector<1x4xf32>
      %97 = vector.extract_strided_slice %85 {offsets = [16, 0], sizes = [16, 128], strides = [1, 1]} : vector<64x128xf32> to vector<16x128xf32>
      %98 = vector.shape_cast %97 : vector<16x128xf32> to vector<1x16x128xf32>
      %cst_42 = arith.constant dense<0xFF800000> : vector<1xf32>
      %99 = vector.multi_reduction <maximumf>, %98, %cst_42 [1, 2] : vector<1x16x128xf32> to vector<1xf32>
      %100 = vector.shape_cast %99 : vector<1xf32> to vector<1x1x1xf32>
      %101 = vector.extract %100[0, 0, 0] : f32 from vector<1x1x1xf32>
      %c1_i32_43 = arith.constant 1 : i32
      %102 = vector.broadcast %c1_i32_43 : i32 to vector<1x4xi32>
      %103 = arith.cmpi eq, %86, %102 : vector<1x4xi32>
      %104 = vector.broadcast %101 : f32 to vector<1x4xf32>
      %105 = arith.select %103, %104, %96 : vector<1x4xi1>, vector<1x4xf32>
      %106 = vector.extract_strided_slice %85 {offsets = [32, 0], sizes = [16, 128], strides = [1, 1]} : vector<64x128xf32> to vector<16x128xf32>
      %107 = vector.shape_cast %106 : vector<16x128xf32> to vector<1x16x128xf32>
      %cst_44 = arith.constant dense<0xFF800000> : vector<1xf32>
      %108 = vector.multi_reduction <maximumf>, %107, %cst_44 [1, 2] : vector<1x16x128xf32> to vector<1xf32>
      %109 = vector.shape_cast %108 : vector<1xf32> to vector<1x1x1xf32>
      %110 = vector.extract %109[0, 0, 0] : f32 from vector<1x1x1xf32>
      %c2_i32_45 = arith.constant 2 : i32
      %111 = vector.broadcast %c2_i32_45 : i32 to vector<1x4xi32>
      %112 = arith.cmpi eq, %86, %111 : vector<1x4xi32>
      %113 = vector.broadcast %110 : f32 to vector<1x4xf32>
      %114 = arith.select %112, %113, %105 : vector<1x4xi1>, vector<1x4xf32>
      %115 = vector.extract_strided_slice %85 {offsets = [48, 0], sizes = [16, 128], strides = [1, 1]} : vector<64x128xf32> to vector<16x128xf32>
      %116 = vector.shape_cast %115 : vector<16x128xf32> to vector<1x16x128xf32>
      %cst_46 = arith.constant dense<0xFF800000> : vector<1xf32>
      %117 = vector.multi_reduction <maximumf>, %116, %cst_46 [1, 2] : vector<1x16x128xf32> to vector<1xf32>
      %118 = vector.shape_cast %117 : vector<1xf32> to vector<1x1x1xf32>
      %119 = vector.extract %118[0, 0, 0] : f32 from vector<1x1x1xf32>
      %c3_i32_47 = arith.constant 3 : i32
      %120 = vector.broadcast %c3_i32_47 : i32 to vector<1x4xi32>
      %121 = arith.cmpi eq, %86, %120 : vector<1x4xi32>
      %122 = vector.broadcast %119 : f32 to vector<1x4xf32>
      %123 = arith.select %121, %122, %114 : vector<1x4xi1>, vector<1x4xf32>
      %124 = tpu.iota {dimensions = array<i32: 0>} : vector<16x128xi32>
      %125 = tpu.iota {dimensions = array<i32: 1>} : vector<16x128xi32>
      %c128_i32 = arith.constant 128 : i32
      %126 = vector.broadcast %c128_i32 : i32 to vector<16x128xi32>
      %127 = arith.muli %124, %126 : vector<16x128xi32>
      %128 = arith.addi %127, %125 : vector<16x128xi32>
      %129 = tpu.iota {dimensions = array<i32: 0>} : vector<8x128xi32>
      %c128_i32_48 = arith.constant 128 : i32
      %130 = vector.broadcast %c128_i32_48 : i32 to vector<8x128xi32>
      %131 = arith.muli %129, %130 : vector<8x128xi32>
      %132 = tpu.iota {dimensions = array<i32: 1>} : vector<8x128xi32>
      %133 = arith.addi %131, %132 : vector<8x128xi32>
      %cst_49 = arith.constant 0xFF800000 : f32
      %134 = vector.broadcast %cst_49 : f32 to vector<8x128xf32>
      %c0_i32_50 = arith.constant 0 : i32
      %135 = vector.broadcast %c0_i32_50 : i32 to vector<8x128xi32>
      %136 = vector.shape_cast %123 : vector<1x4xf32> to vector<1x1x4xf32>
      %cst_51 = arith.constant dense<0xFF800000> : vector<1xf32>
      %137 = vector.multi_reduction <maximumf>, %136, %cst_51 [1, 2] : vector<1x1x4xf32> to vector<1xf32>
      %138 = vector.shape_cast %137 : vector<1xf32> to vector<1x1x1xf32>
      %139 = vector.extract %138[0, 0, 0] : f32 from vector<1x1x1xf32>
      %140 = vector.broadcast %139 : f32 to vector<1x4xf32>
      %141 = arith.cmpf oeq, %123, %140 : vector<1x4xf32>
      %c4_i32_52 = arith.constant 4 : i32
      %142 = vector.broadcast %c4_i32_52 : i32 to vector<1x4xi32>
      %143 = arith.select %141, %86, %142 : vector<1x4xi1>, vector<1x4xi32>
      %144 = vector.shape_cast %143 : vector<1x4xi32> to vector<1x1x4xi32>
      %cst_53 = arith.constant dense<2147483647> : vector<1xi32>
      %145 = vector.multi_reduction <minsi>, %144, %cst_53 [1, 2] : vector<1x1x4xi32> to vector<1xi32>
      %146 = vector.shape_cast %145 : vector<1xi32> to vector<1x1x1xi32>
      %147 = vector.extract %146[0, 0, 0] : i32 from vector<1x1x1xi32>
      %c16_i32 = arith.constant 16 : i32
      %148 = arith.muli %147, %c16_i32 : i32
      %149 = tpu.assume_multiple %148, 16 : i32
      %150 = arith.index_cast %149 : i32 to index
      %c0_54 = arith.constant 0 : index
      %151 = vector.load %arg14[%150, %c0_54] : memref<64x128xf32, #tpu.memory_space<vmem>>, vector<16x128xf32>
      %152 = vector.broadcast %139 : f32 to vector<16x128xf32>
      %153 = arith.cmpf oeq, %151, %152 : vector<16x128xf32>
      %c2048_i32 = arith.constant 2048 : i32
      %154 = vector.broadcast %c2048_i32 : i32 to vector<16x128xi32>
      %155 = arith.select %153, %128, %154 : vector<16x128xi1>, vector<16x128xi32>
      %156 = vector.shape_cast %155 : vector<16x128xi32> to vector<1x16x128xi32>
      %cst_55 = arith.constant dense<2147483647> : vector<1xi32>
      %157 = vector.multi_reduction <minsi>, %156, %cst_55 [1, 2] : vector<1x16x128xi32> to vector<1xi32>
      %158 = vector.shape_cast %157 : vector<1xi32> to vector<1x1x1xi32>
      %159 = vector.extract %158[0, 0, 0] : i32 from vector<1x1x1xi32>
      %c2048_i32_56 = arith.constant 2048 : i32
      %160 = arith.muli %147, %c2048_i32_56 : i32
      %161 = arith.addi %80, %160 : i32
      %162 = arith.addi %161, %159 : i32
      %c0_i32_57 = arith.constant 0 : i32
      %163 = vector.broadcast %c0_i32_57 : i32 to vector<8x128xi32>
      %164 = arith.cmpi eq, %133, %163 : vector<8x128xi32>
      %165 = vector.broadcast %139 : f32 to vector<8x128xf32>
      %166 = arith.select %164, %165, %134 : vector<8x128xi1>, vector<8x128xf32>
      %c0_i32_58 = arith.constant 0 : i32
      %167 = vector.broadcast %c0_i32_58 : i32 to vector<8x128xi32>
      %168 = arith.cmpi eq, %133, %167 : vector<8x128xi32>
      %169 = vector.broadcast %162 : i32 to vector<8x128xi32>
      %170 = arith.select %168, %169, %135 : vector<8x128xi1>, vector<8x128xi32>
      %171 = vector.broadcast %159 : i32 to vector<16x128xi32>
      %172 = arith.cmpi eq, %128, %171 : vector<16x128xi32>
      %cst_59 = arith.constant 0xFF800000 : f32
      %173 = vector.broadcast %cst_59 : f32 to vector<16x128xf32>
      %174 = arith.select %172, %173, %151 : vector<16x128xi1>, vector<16x128xf32>
      %175 = arith.index_cast %149 : i32 to index
      %c0_60 = arith.constant 0 : index
      %176 = vector.load %arg14[%175, %c0_60] : memref<64x128xf32, #tpu.memory_space<vmem>>, vector<16x128xf32>
      tpu.vector_store %arg14[%175, %c0_60], %174 {strides = array<i32>} : memref<64x128xf32, #tpu.memory_space<vmem>>, vector<16x128xf32>,
      %177 = vector.broadcast %147 : i32 to vector<1x4xi32>
      %178 = arith.cmpi eq, %86, %177 : vector<1x4xi32>
      %179 = vector.shape_cast %174 : vector<16x128xf32> to vector<1x16x128xf32>
      %cst_61 = arith.constant dense<0xFF800000> : vector<1xf32>
      %180 = vector.multi_reduction <maximumf>, %179, %cst_61 [1, 2] : vector<1x16x128xf32> to vector<1xf32>
      %181 = vector.shape_cast %180 : vector<1xf32> to vector<1x1x1xf32>
      %182 = vector.extract %181[0, 0, 0] : f32 from vector<1x1x1xf32>
      %183 = vector.broadcast %182 : f32 to vector<1x4xf32>
      %184 = arith.select %178, %183, %123 : vector<1x4xi1>, vector<1x4xf32>
      %185 = vector.shape_cast %184 : vector<1x4xf32> to vector<1x1x4xf32>
      %cst_62 = arith.constant dense<0xFF800000> : vector<1xf32>
      %186 = vector.multi_reduction <maximumf>, %185, %cst_62 [1, 2] : vector<1x1x4xf32> to vector<1xf32>
      %187 = vector.shape_cast %186 : vector<1xf32> to vector<1x1x1xf32>
      %188 = vector.extract %187[0, 0, 0] : f32 from vector<1x1x1xf32>
      %189 = vector.broadcast %188 : f32 to vector<1x4xf32>
      %190 = arith.cmpf oeq, %184, %189 : vector<1x4xf32>
      %c4_i32_63 = arith.constant 4 : i32
      %191 = vector.broadcast %c4_i32_63 : i32 to vector<1x4xi32>
      %192 = arith.select %190, %86, %191 : vector<1x4xi1>, vector<1x4xi32>
      %193 = vector.shape_cast %192 : vector<1x4xi32> to vector<1x1x4xi32>
      %cst_64 = arith.constant dense<2147483647> : vector<1xi32>
      %194 = vector.multi_reduction <minsi>, %193, %cst_64 [1, 2] : vector<1x1x4xi32> to vector<1xi32>
      %195 = vector.shape_cast %194 : vector<1xi32> to vector<1x1x1xi32>
      %196 = vector.extract %195[0, 0, 0] : i32 from vector<1x1x1xi32>
      %c16_i32_65 = arith.constant 16 : i32
      %197 = arith.muli %196, %c16_i32_65 : i32
      %198 = tpu.assume_multiple %197, 16 : i32
      %199 = arith.index_cast %198 : i32 to index
      %c0_66 = arith.constant 0 : index
      %200 = vector.load %arg14[%199, %c0_66] : memref<64x128xf32, #tpu.memory_space<vmem>>, vector<16x128xf32>
      %201 = vector.broadcast %188 : f32 to vector<16x128xf32>
      %202 = arith.cmpf oeq, %200, %201 : vector<16x128xf32>
      %c2048_i32_67 = arith.constant 2048 : i32
      %203 = vector.broadcast %c2048_i32_67 : i32 to vector<16x128xi32>
      %204 = arith.select %202, %128, %203 : vector<16x128xi1>, vector<16x128xi32>
      %205 = vector.shape_cast %204 : vector<16x128xi32> to vector<1x16x128xi32>
      %cst_68 = arith.constant dense<2147483647> : vector<1xi32>
      %206 = vector.multi_reduction <minsi>, %205, %cst_68 [1, 2] : vector<1x16x128xi32> to vector<1xi32>
      %207 = vector.shape_cast %206 : vector<1xi32> to vector<1x1x1xi32>
      %208 = vector.extract %207[0, 0, 0] : i32 from vector<1x1x1xi32>
      %c2048_i32_69 = arith.constant 2048 : i32
      %209 = arith.muli %196, %c2048_i32_69 : i32
      %210 = arith.addi %80, %209 : i32
      %211 = arith.addi %210, %208 : i32
      %c1_i32_70 = arith.constant 1 : i32
      %212 = vector.broadcast %c1_i32_70 : i32 to vector<8x128xi32>
      %213 = arith.cmpi eq, %133, %212 : vector<8x128xi32>
      %214 = vector.broadcast %188 : f32 to vector<8x128xf32>
      %215 = arith.select %213, %214, %166 : vector<8x128xi1>, vector<8x128xf32>
      %c1_i32_71 = arith.constant 1 : i32
      %216 = vector.broadcast %c1_i32_71 : i32 to vector<8x128xi32>
      %217 = arith.cmpi eq, %133, %216 : vector<8x128xi32>
      %218 = vector.broadcast %211 : i32 to vector<8x128xi32>
      %219 = arith.select %217, %218, %170 : vector<8x128xi1>, vector<8x128xi32>
      %220 = vector.broadcast %208 : i32 to vector<16x128xi32>
      %221 = arith.cmpi eq, %128, %220 : vector<16x128xi32>
      %cst_72 = arith.constant 0xFF800000 : f32
      %222 = vector.broadcast %cst_72 : f32 to vector<16x128xf32>
      %223 = arith.select %221, %222, %200 : vector<16x128xi1>, vector<16x128xf32>
      %224 = arith.index_cast %198 : i32 to index
      %c0_73 = arith.constant 0 : index
      %225 = vector.load %arg14[%224, %c0_73] : memref<64x128xf32, #tpu.memory_space<vmem>>, vector<16x128xf32>
      tpu.vector_store %arg14[%224, %c0_73], %223 {strides = array<i32>} : memref<64x128xf32, #tpu.memory_space<vmem>>, vector<16x128xf32>,
      %226 = vector.broadcast %196 : i32 to vector<1x4xi32>
      %227 = arith.cmpi eq, %86, %226 : vector<1x4xi32>
      %228 = vector.shape_cast %223 : vector<16x128xf32> to vector<1x16x128xf32>
      %cst_74 = arith.constant dense<0xFF800000> : vector<1xf32>
      %229 = vector.multi_reduction <maximumf>, %228, %cst_74 [1, 2] : vector<1x16x128xf32> to vector<1xf32>
      %230 = vector.shape_cast %229 : vector<1xf32> to vector<1x1x1xf32>
      %231 = vector.extract %230[0, 0, 0] : f32 from vector<1x1x1xf32>
      %232 = vector.broadcast %231 : f32 to vector<1x4xf32>
      %233 = arith.select %227, %232, %184 : vector<1x4xi1>, vector<1x4xf32>
      %234 = vector.shape_cast %233 : vector<1x4xf32> to vector<1x1x4xf32>
      %cst_75 = arith.constant dense<0xFF800000> : vector<1xf32>
      %235 = vector.multi_reduction <maximumf>, %234, %cst_75 [1, 2] : vector<1x1x4xf32> to vector<1xf32>
      %236 = vector.shape_cast %235 : vector<1xf32> to vector<1x1x1xf32>
      %237 = vector.extract %236[0, 0, 0] : f32 from vector<1x1x1xf32>
      %238 = vector.broadcast %237 : f32 to vector<1x4xf32>
      %239 = arith.cmpf oeq, %233, %238 : vector<1x4xf32>
      %c4_i32_76 = arith.constant 4 : i32
      %240 = vector.broadcast %c4_i32_76 : i32 to vector<1x4xi32>
      %241 = arith.select %239, %86, %240 : vector<1x4xi1>, vector<1x4xi32>
      %242 = vector.shape_cast %241 : vector<1x4xi32> to vector<1x1x4xi32>
      %cst_77 = arith.constant dense<2147483647> : vector<1xi32>
      %243 = vector.multi_reduction <minsi>, %242, %cst_77 [1, 2] : vector<1x1x4xi32> to vector<1xi32>
      %244 = vector.shape_cast %243 : vector<1xi32> to vector<1x1x1xi32>
      %245 = vector.extract %244[0, 0, 0] : i32 from vector<1x1x1xi32>
      %c16_i32_78 = arith.constant 16 : i32
      %246 = arith.muli %245, %c16_i32_78 : i32
      %247 = tpu.assume_multiple %246, 16 : i32
      %248 = arith.index_cast %247 : i32 to index
      %c0_79 = arith.constant 0 : index
      %249 = vector.load %arg14[%248, %c0_79] : memref<64x128xf32, #tpu.memory_space<vmem>>, vector<16x128xf32>
      %250 = vector.broadcast %237 : f32 to vector<16x128xf32>
      %251 = arith.cmpf oeq, %249, %250 : vector<16x128xf32>
      %c2048_i32_80 = arith.constant 2048 : i32
      %252 = vector.broadcast %c2048_i32_80 : i32 to vector<16x128xi32>
      %253 = arith.select %251, %128, %252 : vector<16x128xi1>, vector<16x128xi32>
      %254 = vector.shape_cast %253 : vector<16x128xi32> to vector<1x16x128xi32>
      %cst_81 = arith.constant dense<2147483647> : vector<1xi32>
      %255 = vector.multi_reduction <minsi>, %254, %cst_81 [1, 2] : vector<1x16x128xi32> to vector<1xi32>
      %256 = vector.shape_cast %255 : vector<1xi32> to vector<1x1x1xi32>
      %257 = vector.extract %256[0, 0, 0] : i32 from vector<1x1x1xi32>
      %c2048_i32_82 = arith.constant 2048 : i32
      %258 = arith.muli %245, %c2048_i32_82 : i32
      %259 = arith.addi %80, %258 : i32
      %260 = arith.addi %259, %257 : i32
      %c2_i32_83 = arith.constant 2 : i32
      %261 = vector.broadcast %c2_i32_83 : i32 to vector<8x128xi32>
      %262 = arith.cmpi eq, %133, %261 : vector<8x128xi32>
      %263 = vector.broadcast %237 : f32 to vector<8x128xf32>
      %264 = arith.select %262, %263, %215 : vector<8x128xi1>, vector<8x128xf32>
      %c2_i32_84 = arith.constant 2 : i32
      %265 = vector.broadcast %c2_i32_84 : i32 to vector<8x128xi32>
      %266 = arith.cmpi eq, %133, %265 : vector<8x128xi32>
      %267 = vector.broadcast %260 : i32 to vector<8x128xi32>
      %268 = arith.select %266, %267, %219 : vector<8x128xi1>, vector<8x128xi32>
      %269 = vector.broadcast %257 : i32 to vector<16x128xi32>
      %270 = arith.cmpi eq, %128, %269 : vector<16x128xi32>
      %cst_85 = arith.constant 0xFF800000 : f32
      %271 = vector.broadcast %cst_85 : f32 to vector<16x128xf32>
      %272 = arith.select %270, %271, %249 : vector<16x128xi1>, vector<16x128xf32>
      %273 = arith.index_cast %247 : i32 to index
      %c0_86 = arith.constant 0 : index
      %274 = vector.load %arg14[%273, %c0_86] : memref<64x128xf32, #tpu.memory_space<vmem>>, vector<16x128xf32>
      tpu.vector_store %arg14[%273, %c0_86], %272 {strides = array<i32>} : memref<64x128xf32, #tpu.memory_space<vmem>>, vector<16x128xf32>,
      %275 = vector.broadcast %245 : i32 to vector<1x4xi32>
      %276 = arith.cmpi eq, %86, %275 : vector<1x4xi32>
      %277 = vector.shape_cast %272 : vector<16x128xf32> to vector<1x16x128xf32>
      %cst_87 = arith.constant dense<0xFF800000> : vector<1xf32>
      %278 = vector.multi_reduction <maximumf>, %277, %cst_87 [1, 2] : vector<1x16x128xf32> to vector<1xf32>
      %279 = vector.shape_cast %278 : vector<1xf32> to vector<1x1x1xf32>
      %280 = vector.extract %279[0, 0, 0] : f32 from vector<1x1x1xf32>
      %281 = vector.broadcast %280 : f32 to vector<1x4xf32>
      %282 = arith.select %276, %281, %233 : vector<1x4xi1>, vector<1x4xf32>
      %283 = vector.shape_cast %282 : vector<1x4xf32> to vector<1x1x4xf32>
      %cst_88 = arith.constant dense<0xFF800000> : vector<1xf32>
      %284 = vector.multi_reduction <maximumf>, %283, %cst_88 [1, 2] : vector<1x1x4xf32> to vector<1xf32>
      %285 = vector.shape_cast %284 : vector<1xf32> to vector<1x1x1xf32>
      %286 = vector.extract %285[0, 0, 0] : f32 from vector<1x1x1xf32>
      %287 = vector.broadcast %286 : f32 to vector<1x4xf32>
      %288 = arith.cmpf oeq, %282, %287 : vector<1x4xf32>
      %c4_i32_89 = arith.constant 4 : i32
      %289 = vector.broadcast %c4_i32_89 : i32 to vector<1x4xi32>
      %290 = arith.select %288, %86, %289 : vector<1x4xi1>, vector<1x4xi32>
      %291 = vector.shape_cast %290 : vector<1x4xi32> to vector<1x1x4xi32>
      %cst_90 = arith.constant dense<2147483647> : vector<1xi32>
      %292 = vector.multi_reduction <minsi>, %291, %cst_90 [1, 2] : vector<1x1x4xi32> to vector<1xi32>
      %293 = vector.shape_cast %292 : vector<1xi32> to vector<1x1x1xi32>
      %294 = vector.extract %293[0, 0, 0] : i32 from vector<1x1x1xi32>
      %c16_i32_91 = arith.constant 16 : i32
      %295 = arith.muli %294, %c16_i32_91 : i32
      %296 = tpu.assume_multiple %295, 16 : i32
      %297 = arith.index_cast %296 : i32 to index
      %c0_92 = arith.constant 0 : index
      %298 = vector.load %arg14[%297, %c0_92] : memref<64x128xf32, #tpu.memory_space<vmem>>, vector<16x128xf32>
      %299 = vector.broadcast %286 : f32 to vector<16x128xf32>
      %300 = arith.cmpf oeq, %298, %299 : vector<16x128xf32>
      %c2048_i32_93 = arith.constant 2048 : i32
      %301 = vector.broadcast %c2048_i32_93 : i32 to vector<16x128xi32>
      %302 = arith.select %300, %128, %301 : vector<16x128xi1>, vector<16x128xi32>
      %303 = vector.shape_cast %302 : vector<16x128xi32> to vector<1x16x128xi32>
      %cst_94 = arith.constant dense<2147483647> : vector<1xi32>
      %304 = vector.multi_reduction <minsi>, %303, %cst_94 [1, 2] : vector<1x16x128xi32> to vector<1xi32>
      %305 = vector.shape_cast %304 : vector<1xi32> to vector<1x1x1xi32>
      %306 = vector.extract %305[0, 0, 0] : i32 from vector<1x1x1xi32>
      %c2048_i32_95 = arith.constant 2048 : i32
      %307 = arith.muli %294, %c2048_i32_95 : i32
      %308 = arith.addi %80, %307 : i32
      %309 = arith.addi %308, %306 : i32
      %c3_i32_96 = arith.constant 3 : i32
      %310 = vector.broadcast %c3_i32_96 : i32 to vector<8x128xi32>
      %311 = arith.cmpi eq, %133, %310 : vector<8x128xi32>
      %312 = vector.broadcast %286 : f32 to vector<8x128xf32>
      %313 = arith.select %311, %312, %264 : vector<8x128xi1>, vector<8x128xf32>
      %c3_i32_97 = arith.constant 3 : i32
      %314 = vector.broadcast %c3_i32_97 : i32 to vector<8x128xi32>
      %315 = arith.cmpi eq, %133, %314 : vector<8x128xi32>
      %316 = vector.broadcast %309 : i32 to vector<8x128xi32>
      %317 = arith.select %315, %316, %268 : vector<8x128xi1>, vector<8x128xi32>
      %318 = vector.broadcast %306 : i32 to vector<16x128xi32>
      %319 = arith.cmpi eq, %128, %318 : vector<16x128xi32>
      %cst_98 = arith.constant 0xFF800000 : f32
      %320 = vector.broadcast %cst_98 : f32 to vector<16x128xf32>
      %321 = arith.select %319, %320, %298 : vector<16x128xi1>, vector<16x128xf32>
      %322 = arith.index_cast %296 : i32 to index
      %c0_99 = arith.constant 0 : index
      %323 = vector.load %arg14[%322, %c0_99] : memref<64x128xf32, #tpu.memory_space<vmem>>, vector<16x128xf32>
      tpu.vector_store %arg14[%322, %c0_99], %321 {strides = array<i32>} : memref<64x128xf32, #tpu.memory_space<vmem>>, vector<16x128xf32>,
      %324 = vector.broadcast %294 : i32 to vector<1x4xi32>
      %325 = arith.cmpi eq, %86, %324 : vector<1x4xi32>
      %326 = vector.shape_cast %321 : vector<16x128xf32> to vector<1x16x128xf32>
      %cst_100 = arith.constant dense<0xFF800000> : vector<1xf32>
      %327 = vector.multi_reduction <maximumf>, %326, %cst_100 [1, 2] : vector<1x16x128xf32> to vector<1xf32>
      %328 = vector.shape_cast %327 : vector<1xf32> to vector<1x1x1xf32>
      %329 = vector.extract %328[0, 0, 0] : f32 from vector<1x1x1xf32>
      %330 = vector.broadcast %329 : f32 to vector<1x4xf32>
      %331 = arith.select %325, %330, %282 : vector<1x4xi1>, vector<1x4xf32>
      %332 = vector.shape_cast %331 : vector<1x4xf32> to vector<1x1x4xf32>
      %cst_101 = arith.constant dense<0xFF800000> : vector<1xf32>
      %333 = vector.multi_reduction <maximumf>, %332, %cst_101 [1, 2] : vector<1x1x4xf32> to vector<1xf32>
      %334 = vector.shape_cast %333 : vector<1xf32> to vector<1x1x1xf32>
      %335 = vector.extract %334[0, 0, 0] : f32 from vector<1x1x1xf32>
      %336 = vector.broadcast %335 : f32 to vector<1x4xf32>
      %337 = arith.cmpf oeq, %331, %336 : vector<1x4xf32>
      %c4_i32_102 = arith.constant 4 : i32
      %338 = vector.broadcast %c4_i32_102 : i32 to vector<1x4xi32>
      %339 = arith.select %337, %86, %338 : vector<1x4xi1>, vector<1x4xi32>
      %340 = vector.shape_cast %339 : vector<1x4xi32> to vector<1x1x4xi32>
      %cst_103 = arith.constant dense<2147483647> : vector<1xi32>
      %341 = vector.multi_reduction <minsi>, %340, %cst_103 [1, 2] : vector<1x1x4xi32> to vector<1xi32>
      %342 = vector.shape_cast %341 : vector<1xi32> to vector<1x1x1xi32>
      %343 = vector.extract %342[0, 0, 0] : i32 from vector<1x1x1xi32>
      %c16_i32_104 = arith.constant 16 : i32
      %344 = arith.muli %343, %c16_i32_104 : i32
      %345 = tpu.assume_multiple %344, 16 : i32
      %346 = arith.index_cast %345 : i32 to index
      %c0_105 = arith.constant 0 : index
      %347 = vector.load %arg14[%346, %c0_105] : memref<64x128xf32, #tpu.memory_space<vmem>>, vector<16x128xf32>
      %348 = vector.broadcast %335 : f32 to vector<16x128xf32>
      %349 = arith.cmpf oeq, %347, %348 : vector<16x128xf32>
      %c2048_i32_106 = arith.constant 2048 : i32
      %350 = vector.broadcast %c2048_i32_106 : i32 to vector<16x128xi32>
      %351 = arith.select %349, %128, %350 : vector<16x128xi1>, vector<16x128xi32>
      %352 = vector.shape_cast %351 : vector<16x128xi32> to vector<1x16x128xi32>
      %cst_107 = arith.constant dense<2147483647> : vector<1xi32>
      %353 = vector.multi_reduction <minsi>, %352, %cst_107 [1, 2] : vector<1x16x128xi32> to vector<1xi32>
      %354 = vector.shape_cast %353 : vector<1xi32> to vector<1x1x1xi32>
      %355 = vector.extract %354[0, 0, 0] : i32 from vector<1x1x1xi32>
      %c2048_i32_108 = arith.constant 2048 : i32
      %356 = arith.muli %343, %c2048_i32_108 : i32
      %357 = arith.addi %80, %356 : i32
      %358 = arith.addi %357, %355 : i32
      %c4_i32_109 = arith.constant 4 : i32
      %359 = vector.broadcast %c4_i32_109 : i32 to vector<8x128xi32>
      %360 = arith.cmpi eq, %133, %359 : vector<8x128xi32>
      %361 = vector.broadcast %335 : f32 to vector<8x128xf32>
      %362 = arith.select %360, %361, %313 : vector<8x128xi1>, vector<8x128xf32>
      %c4_i32_110 = arith.constant 4 : i32
      %363 = vector.broadcast %c4_i32_110 : i32 to vector<8x128xi32>
      %364 = arith.cmpi eq, %133, %363 : vector<8x128xi32>
      %365 = vector.broadcast %358 : i32 to vector<8x128xi32>
      %366 = arith.select %364, %365, %317 : vector<8x128xi1>, vector<8x128xi32>
      %367 = vector.broadcast %355 : i32 to vector<16x128xi32>
      %368 = arith.cmpi eq, %128, %367 : vector<16x128xi32>
      %cst_111 = arith.constant 0xFF800000 : f32
      %369 = vector.broadcast %cst_111 : f32 to vector<16x128xf32>
      %370 = arith.select %368, %369, %347 : vector<16x128xi1>, vector<16x128xf32>
      %371 = arith.index_cast %345 : i32 to index
      %c0_112 = arith.constant 0 : index
      %372 = vector.load %arg14[%371, %c0_112] : memref<64x128xf32, #tpu.memory_space<vmem>>, vector<16x128xf32>
      tpu.vector_store %arg14[%371, %c0_112], %370 {strides = array<i32>} : memref<64x128xf32, #tpu.memory_space<vmem>>, vector<16x128xf32>,
      %373 = vector.broadcast %343 : i32 to vector<1x4xi32>
      %374 = arith.cmpi eq, %86, %373 : vector<1x4xi32>
      %375 = vector.shape_cast %370 : vector<16x128xf32> to vector<1x16x128xf32>
      %cst_113 = arith.constant dense<0xFF800000> : vector<1xf32>
      %376 = vector.multi_reduction <maximumf>, %375, %cst_113 [1, 2] : vector<1x16x128xf32> to vector<1xf32>
      %377 = vector.shape_cast %376 : vector<1xf32> to vector<1x1x1xf32>
      %378 = vector.extract %377[0, 0, 0] : f32 from vector<1x1x1xf32>
      %379 = vector.broadcast %378 : f32 to vector<1x4xf32>
      %380 = arith.select %374, %379, %331 : vector<1x4xi1>, vector<1x4xf32>
      %381 = vector.shape_cast %380 : vector<1x4xf32> to vector<1x1x4xf32>
      %cst_114 = arith.constant dense<0xFF800000> : vector<1xf32>
      %382 = vector.multi_reduction <maximumf>, %381, %cst_114 [1, 2] : vector<1x1x4xf32> to vector<1xf32>
      %383 = vector.shape_cast %382 : vector<1xf32> to vector<1x1x1xf32>
      %384 = vector.extract %383[0, 0, 0] : f32 from vector<1x1x1xf32>
      %385 = vector.broadcast %384 : f32 to vector<1x4xf32>
      %386 = arith.cmpf oeq, %380, %385 : vector<1x4xf32>
      %c4_i32_115 = arith.constant 4 : i32
      %387 = vector.broadcast %c4_i32_115 : i32 to vector<1x4xi32>
      %388 = arith.select %386, %86, %387 : vector<1x4xi1>, vector<1x4xi32>
      %389 = vector.shape_cast %388 : vector<1x4xi32> to vector<1x1x4xi32>
      %cst_116 = arith.constant dense<2147483647> : vector<1xi32>
      %390 = vector.multi_reduction <minsi>, %389, %cst_116 [1, 2] : vector<1x1x4xi32> to vector<1xi32>
      %391 = vector.shape_cast %390 : vector<1xi32> to vector<1x1x1xi32>
      %392 = vector.extract %391[0, 0, 0] : i32 from vector<1x1x1xi32>
      %c16_i32_117 = arith.constant 16 : i32
      %393 = arith.muli %392, %c16_i32_117 : i32
      %394 = tpu.assume_multiple %393, 16 : i32
      %395 = arith.index_cast %394 : i32 to index
      %c0_118 = arith.constant 0 : index
      %396 = vector.load %arg14[%395, %c0_118] : memref<64x128xf32, #tpu.memory_space<vmem>>, vector<16x128xf32>
      %397 = vector.broadcast %384 : f32 to vector<16x128xf32>
      %398 = arith.cmpf oeq, %396, %397 : vector<16x128xf32>
      %c2048_i32_119 = arith.constant 2048 : i32
      %399 = vector.broadcast %c2048_i32_119 : i32 to vector<16x128xi32>
      %400 = arith.select %398, %128, %399 : vector<16x128xi1>, vector<16x128xi32>
      %401 = vector.shape_cast %400 : vector<16x128xi32> to vector<1x16x128xi32>
      %cst_120 = arith.constant dense<2147483647> : vector<1xi32>
      %402 = vector.multi_reduction <minsi>, %401, %cst_120 [1, 2] : vector<1x16x128xi32> to vector<1xi32>
      %403 = vector.shape_cast %402 : vector<1xi32> to vector<1x1x1xi32>
      %404 = vector.extract %403[0, 0, 0] : i32 from vector<1x1x1xi32>
      %c2048_i32_121 = arith.constant 2048 : i32
      %405 = arith.muli %392, %c2048_i32_121 : i32
      %406 = arith.addi %80, %405 : i32
      %407 = arith.addi %406, %404 : i32
      %c5_i32_122 = arith.constant 5 : i32
      %408 = vector.broadcast %c5_i32_122 : i32 to vector<8x128xi32>
      %409 = arith.cmpi eq, %133, %408 : vector<8x128xi32>
      %410 = vector.broadcast %384 : f32 to vector<8x128xf32>
      %411 = arith.select %409, %410, %362 : vector<8x128xi1>, vector<8x128xf32>
      %c5_i32_123 = arith.constant 5 : i32
      %412 = vector.broadcast %c5_i32_123 : i32 to vector<8x128xi32>
      %413 = arith.cmpi eq, %133, %412 : vector<8x128xi32>
      %414 = vector.broadcast %407 : i32 to vector<8x128xi32>
      %415 = arith.select %413, %414, %366 : vector<8x128xi1>, vector<8x128xi32>
      %416 = vector.broadcast %404 : i32 to vector<16x128xi32>
      %417 = arith.cmpi eq, %128, %416 : vector<16x128xi32>
      %cst_124 = arith.constant 0xFF800000 : f32
      %418 = vector.broadcast %cst_124 : f32 to vector<16x128xf32>
      %419 = arith.select %417, %418, %396 : vector<16x128xi1>, vector<16x128xf32>
      %420 = arith.index_cast %394 : i32 to index
      %c0_125 = arith.constant 0 : index
      %421 = vector.load %arg14[%420, %c0_125] : memref<64x128xf32, #tpu.memory_space<vmem>>, vector<16x128xf32>
      tpu.vector_store %arg14[%420, %c0_125], %419 {strides = array<i32>} : memref<64x128xf32, #tpu.memory_space<vmem>>, vector<16x128xf32>,
      %422 = vector.broadcast %392 : i32 to vector<1x4xi32>
      %423 = arith.cmpi eq, %86, %422 : vector<1x4xi32>
      %424 = vector.shape_cast %419 : vector<16x128xf32> to vector<1x16x128xf32>
      %cst_126 = arith.constant dense<0xFF800000> : vector<1xf32>
      %425 = vector.multi_reduction <maximumf>, %424, %cst_126 [1, 2] : vector<1x16x128xf32> to vector<1xf32>
      %426 = vector.shape_cast %425 : vector<1xf32> to vector<1x1x1xf32>
      %427 = vector.extract %426[0, 0, 0] : f32 from vector<1x1x1xf32>
      %428 = vector.broadcast %427 : f32 to vector<1x4xf32>
      %429 = arith.select %423, %428, %380 : vector<1x4xi1>, vector<1x4xf32>
      %430 = vector.shape_cast %429 : vector<1x4xf32> to vector<1x1x4xf32>
      %cst_127 = arith.constant dense<0xFF800000> : vector<1xf32>
      %431 = vector.multi_reduction <maximumf>, %430, %cst_127 [1, 2] : vector<1x1x4xf32> to vector<1xf32>
      %432 = vector.shape_cast %431 : vector<1xf32> to vector<1x1x1xf32>
      %433 = vector.extract %432[0, 0, 0] : f32 from vector<1x1x1xf32>
      %434 = vector.broadcast %433 : f32 to vector<1x4xf32>
      %435 = arith.cmpf oeq, %429, %434 : vector<1x4xf32>
      %c4_i32_128 = arith.constant 4 : i32
      %436 = vector.broadcast %c4_i32_128 : i32 to vector<1x4xi32>
      %437 = arith.select %435, %86, %436 : vector<1x4xi1>, vector<1x4xi32>
      %438 = vector.shape_cast %437 : vector<1x4xi32> to vector<1x1x4xi32>
      %cst_129 = arith.constant dense<2147483647> : vector<1xi32>
      %439 = vector.multi_reduction <minsi>, %438, %cst_129 [1, 2] : vector<1x1x4xi32> to vector<1xi32>
      %440 = vector.shape_cast %439 : vector<1xi32> to vector<1x1x1xi32>
      %441 = vector.extract %440[0, 0, 0] : i32 from vector<1x1x1xi32>
      %c16_i32_130 = arith.constant 16 : i32
      %442 = arith.muli %441, %c16_i32_130 : i32
      %443 = tpu.assume_multiple %442, 16 : i32
      %444 = arith.index_cast %443 : i32 to index
      %c0_131 = arith.constant 0 : index
      %445 = vector.load %arg14[%444, %c0_131] : memref<64x128xf32, #tpu.memory_space<vmem>>, vector<16x128xf32>
      %446 = vector.broadcast %433 : f32 to vector<16x128xf32>
      %447 = arith.cmpf oeq, %445, %446 : vector<16x128xf32>
      %c2048_i32_132 = arith.constant 2048 : i32
      %448 = vector.broadcast %c2048_i32_132 : i32 to vector<16x128xi32>
      %449 = arith.select %447, %128, %448 : vector<16x128xi1>, vector<16x128xi32>
      %450 = vector.shape_cast %449 : vector<16x128xi32> to vector<1x16x128xi32>
      %cst_133 = arith.constant dense<2147483647> : vector<1xi32>
      %451 = vector.multi_reduction <minsi>, %450, %cst_133 [1, 2] : vector<1x16x128xi32> to vector<1xi32>
      %452 = vector.shape_cast %451 : vector<1xi32> to vector<1x1x1xi32>
      %453 = vector.extract %452[0, 0, 0] : i32 from vector<1x1x1xi32>
      %c2048_i32_134 = arith.constant 2048 : i32
      %454 = arith.muli %441, %c2048_i32_134 : i32
      %455 = arith.addi %80, %454 : i32
      %456 = arith.addi %455, %453 : i32
      %c6_i32_135 = arith.constant 6 : i32
      %457 = vector.broadcast %c6_i32_135 : i32 to vector<8x128xi32>
      %458 = arith.cmpi eq, %133, %457 : vector<8x128xi32>
      %459 = vector.broadcast %433 : f32 to vector<8x128xf32>
      %460 = arith.select %458, %459, %411 : vector<8x128xi1>, vector<8x128xf32>
      %c6_i32_136 = arith.constant 6 : i32
      %461 = vector.broadcast %c6_i32_136 : i32 to vector<8x128xi32>
      %462 = arith.cmpi eq, %133, %461 : vector<8x128xi32>
      %463 = vector.broadcast %456 : i32 to vector<8x128xi32>
      %464 = arith.select %462, %463, %415 : vector<8x128xi1>, vector<8x128xi32>
      %465 = vector.broadcast %453 : i32 to vector<16x128xi32>
      %466 = arith.cmpi eq, %128, %465 : vector<16x128xi32>
      %cst_137 = arith.constant 0xFF800000 : f32
      %467 = vector.broadcast %cst_137 : f32 to vector<16x128xf32>
      %468 = arith.select %466, %467, %445 : vector<16x128xi1>, vector<16x128xf32>
      %469 = arith.index_cast %443 : i32 to index
      %c0_138 = arith.constant 0 : index
      %470 = vector.load %arg14[%469, %c0_138] : memref<64x128xf32, #tpu.memory_space<vmem>>, vector<16x128xf32>
      tpu.vector_store %arg14[%469, %c0_138], %468 {strides = array<i32>} : memref<64x128xf32, #tpu.memory_space<vmem>>, vector<16x128xf32>,
      %471 = vector.broadcast %441 : i32 to vector<1x4xi32>
      %472 = arith.cmpi eq, %86, %471 : vector<1x4xi32>
      %473 = vector.shape_cast %468 : vector<16x128xf32> to vector<1x16x128xf32>
      %cst_139 = arith.constant dense<0xFF800000> : vector<1xf32>
      %474 = vector.multi_reduction <maximumf>, %473, %cst_139 [1, 2] : vector<1x16x128xf32> to vector<1xf32>
      %475 = vector.shape_cast %474 : vector<1xf32> to vector<1x1x1xf32>
      %476 = vector.extract %475[0, 0, 0] : f32 from vector<1x1x1xf32>
      %477 = vector.broadcast %476 : f32 to vector<1x4xf32>
      %478 = arith.select %472, %477, %429 : vector<1x4xi1>, vector<1x4xf32>
      %479 = vector.shape_cast %478 : vector<1x4xf32> to vector<1x1x4xf32>
      %cst_140 = arith.constant dense<0xFF800000> : vector<1xf32>
      %480 = vector.multi_reduction <maximumf>, %479, %cst_140 [1, 2] : vector<1x1x4xf32> to vector<1xf32>
      %481 = vector.shape_cast %480 : vector<1xf32> to vector<1x1x1xf32>
      %482 = vector.extract %481[0, 0, 0] : f32 from vector<1x1x1xf32>
      %483 = vector.broadcast %482 : f32 to vector<1x4xf32>
      %484 = arith.cmpf oeq, %478, %483 : vector<1x4xf32>
      %c4_i32_141 = arith.constant 4 : i32
      %485 = vector.broadcast %c4_i32_141 : i32 to vector<1x4xi32>
      %486 = arith.select %484, %86, %485 : vector<1x4xi1>, vector<1x4xi32>
      %487 = vector.shape_cast %486 : vector<1x4xi32> to vector<1x1x4xi32>
      %cst_142 = arith.constant dense<2147483647> : vector<1xi32>
      %488 = vector.multi_reduction <minsi>, %487, %cst_142 [1, 2] : vector<1x1x4xi32> to vector<1xi32>
      %489 = vector.shape_cast %488 : vector<1xi32> to vector<1x1x1xi32>
      %490 = vector.extract %489[0, 0, 0] : i32 from vector<1x1x1xi32>
      %c16_i32_143 = arith.constant 16 : i32
      %491 = arith.muli %490, %c16_i32_143 : i32
      %492 = tpu.assume_multiple %491, 16 : i32
      %493 = arith.index_cast %492 : i32 to index
      %c0_144 = arith.constant 0 : index
      %494 = vector.load %arg14[%493, %c0_144] : memref<64x128xf32, #tpu.memory_space<vmem>>, vector<16x128xf32>
      %495 = vector.broadcast %482 : f32 to vector<16x128xf32>
      %496 = arith.cmpf oeq, %494, %495 : vector<16x128xf32>
      %c2048_i32_145 = arith.constant 2048 : i32
      %497 = vector.broadcast %c2048_i32_145 : i32 to vector<16x128xi32>
      %498 = arith.select %496, %128, %497 : vector<16x128xi1>, vector<16x128xi32>
      %499 = vector.shape_cast %498 : vector<16x128xi32> to vector<1x16x128xi32>
      %cst_146 = arith.constant dense<2147483647> : vector<1xi32>
      %500 = vector.multi_reduction <minsi>, %499, %cst_146 [1, 2] : vector<1x16x128xi32> to vector<1xi32>
      %501 = vector.shape_cast %500 : vector<1xi32> to vector<1x1x1xi32>
      %502 = vector.extract %501[0, 0, 0] : i32 from vector<1x1x1xi32>
      %c2048_i32_147 = arith.constant 2048 : i32
      %503 = arith.muli %490, %c2048_i32_147 : i32
      %504 = arith.addi %80, %503 : i32
      %505 = arith.addi %504, %502 : i32
      %c7_i32_148 = arith.constant 7 : i32
      %506 = vector.broadcast %c7_i32_148 : i32 to vector<8x128xi32>
      %507 = arith.cmpi eq, %133, %506 : vector<8x128xi32>
      %508 = vector.broadcast %482 : f32 to vector<8x128xf32>
      %509 = arith.select %507, %508, %460 : vector<8x128xi1>, vector<8x128xf32>
      %c7_i32_149 = arith.constant 7 : i32
      %510 = vector.broadcast %c7_i32_149 : i32 to vector<8x128xi32>
      %511 = arith.cmpi eq, %133, %510 : vector<8x128xi32>
      %512 = vector.broadcast %505 : i32 to vector<8x128xi32>
      %513 = arith.select %511, %512, %464 : vector<8x128xi1>, vector<8x128xi32>
      %514 = vector.broadcast %502 : i32 to vector<16x128xi32>
      %515 = arith.cmpi eq, %128, %514 : vector<16x128xi32>
      %cst_150 = arith.constant 0xFF800000 : f32
      %516 = vector.broadcast %cst_150 : f32 to vector<16x128xf32>
      %517 = arith.select %515, %516, %494 : vector<16x128xi1>, vector<16x128xf32>
      %518 = arith.index_cast %492 : i32 to index
      %c0_151 = arith.constant 0 : index
      %519 = vector.load %arg14[%518, %c0_151] : memref<64x128xf32, #tpu.memory_space<vmem>>, vector<16x128xf32>
      tpu.vector_store %arg14[%518, %c0_151], %517 {strides = array<i32>} : memref<64x128xf32, #tpu.memory_space<vmem>>, vector<16x128xf32>,
      %520 = vector.broadcast %490 : i32 to vector<1x4xi32>
      %521 = arith.cmpi eq, %86, %520 : vector<1x4xi32>
      %522 = vector.shape_cast %517 : vector<16x128xf32> to vector<1x16x128xf32>
      %cst_152 = arith.constant dense<0xFF800000> : vector<1xf32>
      %523 = vector.multi_reduction <maximumf>, %522, %cst_152 [1, 2] : vector<1x16x128xf32> to vector<1xf32>
      %524 = vector.shape_cast %523 : vector<1xf32> to vector<1x1x1xf32>
      %525 = vector.extract %524[0, 0, 0] : f32 from vector<1x1x1xf32>
      %526 = vector.broadcast %525 : f32 to vector<1x4xf32>
      %527 = arith.select %521, %526, %478 : vector<1x4xi1>, vector<1x4xf32>
      %528 = vector.shape_cast %527 : vector<1x4xf32> to vector<1x1x4xf32>
      %cst_153 = arith.constant dense<0xFF800000> : vector<1xf32>
      %529 = vector.multi_reduction <maximumf>, %528, %cst_153 [1, 2] : vector<1x1x4xf32> to vector<1xf32>
      %530 = vector.shape_cast %529 : vector<1xf32> to vector<1x1x1xf32>
      %531 = vector.extract %530[0, 0, 0] : f32 from vector<1x1x1xf32>
      %532 = vector.broadcast %531 : f32 to vector<1x4xf32>
      %533 = arith.cmpf oeq, %527, %532 : vector<1x4xf32>
      %c4_i32_154 = arith.constant 4 : i32
      %534 = vector.broadcast %c4_i32_154 : i32 to vector<1x4xi32>
      %535 = arith.select %533, %86, %534 : vector<1x4xi1>, vector<1x4xi32>
      %536 = vector.shape_cast %535 : vector<1x4xi32> to vector<1x1x4xi32>
      %cst_155 = arith.constant dense<2147483647> : vector<1xi32>
      %537 = vector.multi_reduction <minsi>, %536, %cst_155 [1, 2] : vector<1x1x4xi32> to vector<1xi32>
      %538 = vector.shape_cast %537 : vector<1xi32> to vector<1x1x1xi32>
      %539 = vector.extract %538[0, 0, 0] : i32 from vector<1x1x1xi32>
      %c16_i32_156 = arith.constant 16 : i32
      %540 = arith.muli %539, %c16_i32_156 : i32
      %541 = tpu.assume_multiple %540, 16 : i32
      %542 = arith.index_cast %541 : i32 to index
      %c0_157 = arith.constant 0 : index
      %543 = vector.load %arg14[%542, %c0_157] : memref<64x128xf32, #tpu.memory_space<vmem>>, vector<16x128xf32>
      %544 = vector.broadcast %531 : f32 to vector<16x128xf32>
      %545 = arith.cmpf oeq, %543, %544 : vector<16x128xf32>
      %c2048_i32_158 = arith.constant 2048 : i32
      %546 = vector.broadcast %c2048_i32_158 : i32 to vector<16x128xi32>
      %547 = arith.select %545, %128, %546 : vector<16x128xi1>, vector<16x128xi32>
      %548 = vector.shape_cast %547 : vector<16x128xi32> to vector<1x16x128xi32>
      %cst_159 = arith.constant dense<2147483647> : vector<1xi32>
      %549 = vector.multi_reduction <minsi>, %548, %cst_159 [1, 2] : vector<1x16x128xi32> to vector<1xi32>
      %550 = vector.shape_cast %549 : vector<1xi32> to vector<1x1x1xi32>
      %551 = vector.extract %550[0, 0, 0] : i32 from vector<1x1x1xi32>
      %c2048_i32_160 = arith.constant 2048 : i32
      %552 = arith.muli %539, %c2048_i32_160 : i32
      %553 = arith.addi %80, %552 : i32
      %554 = arith.addi %553, %551 : i32
      %c8_i32_161 = arith.constant 8 : i32
      %555 = vector.broadcast %c8_i32_161 : i32 to vector<8x128xi32>
      %556 = arith.cmpi eq, %133, %555 : vector<8x128xi32>
      %557 = vector.broadcast %531 : f32 to vector<8x128xf32>
      %558 = arith.select %556, %557, %509 : vector<8x128xi1>, vector<8x128xf32>
      %c8_i32_162 = arith.constant 8 : i32
      %559 = vector.broadcast %c8_i32_162 : i32 to vector<8x128xi32>
      %560 = arith.cmpi eq, %133, %559 : vector<8x128xi32>
      %561 = vector.broadcast %554 : i32 to vector<8x128xi32>
      %562 = arith.select %560, %561, %513 : vector<8x128xi1>, vector<8x128xi32>
      %563 = vector.broadcast %551 : i32 to vector<16x128xi32>
      %564 = arith.cmpi eq, %128, %563 : vector<16x128xi32>
      %cst_163 = arith.constant 0xFF800000 : f32
      %565 = vector.broadcast %cst_163 : f32 to vector<16x128xf32>
      %566 = arith.select %564, %565, %543 : vector<16x128xi1>, vector<16x128xf32>
      %567 = arith.index_cast %541 : i32 to index
      %c0_164 = arith.constant 0 : index
      %568 = vector.load %arg14[%567, %c0_164] : memref<64x128xf32, #tpu.memory_space<vmem>>, vector<16x128xf32>
      tpu.vector_store %arg14[%567, %c0_164], %566 {strides = array<i32>} : memref<64x128xf32, #tpu.memory_space<vmem>>, vector<16x128xf32>,
      %569 = vector.broadcast %539 : i32 to vector<1x4xi32>
      %570 = arith.cmpi eq, %86, %569 : vector<1x4xi32>
      %571 = vector.shape_cast %566 : vector<16x128xf32> to vector<1x16x128xf32>
      %cst_165 = arith.constant dense<0xFF800000> : vector<1xf32>
      %572 = vector.multi_reduction <maximumf>, %571, %cst_165 [1, 2] : vector<1x16x128xf32> to vector<1xf32>
      %573 = vector.shape_cast %572 : vector<1xf32> to vector<1x1x1xf32>
      %574 = vector.extract %573[0, 0, 0] : f32 from vector<1x1x1xf32>
      %575 = vector.broadcast %574 : f32 to vector<1x4xf32>
      %576 = arith.select %570, %575, %527 : vector<1x4xi1>, vector<1x4xf32>
      %577 = vector.shape_cast %576 : vector<1x4xf32> to vector<1x1x4xf32>
      %cst_166 = arith.constant dense<0xFF800000> : vector<1xf32>
      %578 = vector.multi_reduction <maximumf>, %577, %cst_166 [1, 2] : vector<1x1x4xf32> to vector<1xf32>
      %579 = vector.shape_cast %578 : vector<1xf32> to vector<1x1x1xf32>
      %580 = vector.extract %579[0, 0, 0] : f32 from vector<1x1x1xf32>
      %581 = vector.broadcast %580 : f32 to vector<1x4xf32>
      %582 = arith.cmpf oeq, %576, %581 : vector<1x4xf32>
      %c4_i32_167 = arith.constant 4 : i32
      %583 = vector.broadcast %c4_i32_167 : i32 to vector<1x4xi32>
      %584 = arith.select %582, %86, %583 : vector<1x4xi1>, vector<1x4xi32>
      %585 = vector.shape_cast %584 : vector<1x4xi32> to vector<1x1x4xi32>
      %cst_168 = arith.constant dense<2147483647> : vector<1xi32>
      %586 = vector.multi_reduction <minsi>, %585, %cst_168 [1, 2] : vector<1x1x4xi32> to vector<1xi32>
      %587 = vector.shape_cast %586 : vector<1xi32> to vector<1x1x1xi32>
      %588 = vector.extract %587[0, 0, 0] : i32 from vector<1x1x1xi32>
      %c16_i32_169 = arith.constant 16 : i32
      %589 = arith.muli %588, %c16_i32_169 : i32
      %590 = tpu.assume_multiple %589, 16 : i32
      %591 = arith.index_cast %590 : i32 to index
      %c0_170 = arith.constant 0 : index
      %592 = vector.load %arg14[%591, %c0_170] : memref<64x128xf32, #tpu.memory_space<vmem>>, vector<16x128xf32>
      %593 = vector.broadcast %580 : f32 to vector<16x128xf32>
      %594 = arith.cmpf oeq, %592, %593 : vector<16x128xf32>
      %c2048_i32_171 = arith.constant 2048 : i32
      %595 = vector.broadcast %c2048_i32_171 : i32 to vector<16x128xi32>
      %596 = arith.select %594, %128, %595 : vector<16x128xi1>, vector<16x128xi32>
      %597 = vector.shape_cast %596 : vector<16x128xi32> to vector<1x16x128xi32>
      %cst_172 = arith.constant dense<2147483647> : vector<1xi32>
      %598 = vector.multi_reduction <minsi>, %597, %cst_172 [1, 2] : vector<1x16x128xi32> to vector<1xi32>
      %599 = vector.shape_cast %598 : vector<1xi32> to vector<1x1x1xi32>
      %600 = vector.extract %599[0, 0, 0] : i32 from vector<1x1x1xi32>
      %c2048_i32_173 = arith.constant 2048 : i32
      %601 = arith.muli %588, %c2048_i32_173 : i32
      %602 = arith.addi %80, %601 : i32
      %603 = arith.addi %602, %600 : i32
      %c9_i32 = arith.constant 9 : i32
      %604 = vector.broadcast %c9_i32 : i32 to vector<8x128xi32>
      %605 = arith.cmpi eq, %133, %604 : vector<8x128xi32>
      %606 = vector.broadcast %580 : f32 to vector<8x128xf32>
      %607 = arith.select %605, %606, %558 : vector<8x128xi1>, vector<8x128xf32>
      %c9_i32_174 = arith.constant 9 : i32
      %608 = vector.broadcast %c9_i32_174 : i32 to vector<8x128xi32>
      %609 = arith.cmpi eq, %133, %608 : vector<8x128xi32>
      %610 = vector.broadcast %603 : i32 to vector<8x128xi32>
      %611 = arith.select %609, %610, %562 : vector<8x128xi1>, vector<8x128xi32>
      %612 = vector.broadcast %600 : i32 to vector<16x128xi32>
      %613 = arith.cmpi eq, %128, %612 : vector<16x128xi32>
      %cst_175 = arith.constant 0xFF800000 : f32
      %614 = vector.broadcast %cst_175 : f32 to vector<16x128xf32>
      %615 = arith.select %613, %614, %592 : vector<16x128xi1>, vector<16x128xf32>
      %616 = arith.index_cast %590 : i32 to index
      %c0_176 = arith.constant 0 : index
      %617 = vector.load %arg14[%616, %c0_176] : memref<64x128xf32, #tpu.memory_space<vmem>>, vector<16x128xf32>
      tpu.vector_store %arg14[%616, %c0_176], %615 {strides = array<i32>} : memref<64x128xf32, #tpu.memory_space<vmem>>, vector<16x128xf32>,
      %c0_177 = arith.constant 0 : index
      %c0_178 = arith.constant 0 : index
      %c0_179 = arith.constant 0 : index
      %618 = vector.load %arg12[%c0_177, %c0_178, %c0_179] : memref<1x8x128xf32, #tpu.memory_space<vmem>>, vector<1x8x128xf32>
      %619 = vector.shape_cast %618 : vector<1x8x128xf32> to vector<8x128xf32>
      %620 = vector.shape_cast %607 : vector<8x128xf32> to vector<1x8x128xf32>
      tpu.vector_store %arg12[%c0_177, %c0_178, %c0_179], %620 {strides = array<i32>} : memref<1x8x128xf32, #tpu.memory_space<vmem>>, vector<1x8x128xf32>,
      %c0_180 = arith.constant 0 : index
      %c0_181 = arith.constant 0 : index
      %c0_182 = arith.constant 0 : index
      %621 = vector.load %arg13[%c0_180, %c0_181, %c0_182] : memref<1x8x128xi32, #tpu.memory_space<vmem>>, vector<1x8x128xi32>
      %622 = vector.shape_cast %621 : vector<1x8x128xi32> to vector<8x128xi32>
      %623 = vector.shape_cast %611 : vector<8x128xi32> to vector<1x8x128xi32>
      tpu.vector_store %arg13[%c0_180, %c0_181, %c0_182], %623 {strides = array<i32>} : memref<1x8x128xi32, #tpu.memory_space<vmem>>, vector<1x8x128xi32>,
    } else {
    }
    return
  }
  func.func @transform_0(%arg0: i32, %arg1: i32, %arg2: memref<16xi32, #tpu.memory_space<smem>>) -> i32 {
    %c0_i32 = arith.constant 0 : i32
    %c0_i32_0 = arith.constant 0 : i32
    return %c0_i32 : i32
  }
  func.func @transform_1(%arg0: i32, %arg1: i32, %arg2: memref<16xi32, #tpu.memory_space<smem>>) -> (i32, i32, i32, i32) {
    %c8_i32 = arith.constant 8 : i32
    %0 = arith.muli %arg1, %c8_i32 : i32
    %c0_i32 = arith.constant 0 : i32
    %1 = arith.addi %0, %c0_i32 : i32
    %2 = arith.index_cast %1 : i32 to index
    %3 = memref.load %arg2[%2] : memref<16xi32, #tpu.memory_space<smem>>
    %c0_i32_0 = arith.constant 0 : i32
    %c0_i32_1 = arith.constant 0 : i32
    %c0_i32_2 = arith.constant 0 : i32
    return %3, %arg0, %c0_i32_0, %c0_i32_1 : i32, i32, i32, i32
  }
  func.func @transform_2(%arg0: i32, %arg1: i32, %arg2: memref<16xi32, #tpu.memory_space<smem>>) -> (i32, i32, i32, i32) {
    %c8_i32 = arith.constant 8 : i32
    %0 = arith.muli %arg1, %c8_i32 : i32
    %c1_i32 = arith.constant 1 : i32
    %1 = arith.addi %0, %c1_i32 : i32
    %2 = arith.index_cast %1 : i32 to index
    %3 = memref.load %arg2[%2] : memref<16xi32, #tpu.memory_space<smem>>
    %c0_i32 = arith.constant 0 : i32
    %c0_i32_0 = arith.constant 0 : i32
    %c0_i32_1 = arith.constant 0 : i32
    return %3, %arg0, %c0_i32, %c0_i32_0 : i32, i32, i32, i32
  }
  func.func @transform_3(%arg0: i32, %arg1: i32, %arg2: memref<16xi32, #tpu.memory_space<smem>>) -> (i32, i32, i32, i32) {
    %c8_i32 = arith.constant 8 : i32
    %0 = arith.muli %arg1, %c8_i32 : i32
    %c2_i32 = arith.constant 2 : i32
    %1 = arith.addi %0, %c2_i32 : i32
    %2 = arith.index_cast %1 : i32 to index
    %3 = memref.load %arg2[%2] : memref<16xi32, #tpu.memory_space<smem>>
    %c0_i32 = arith.constant 0 : i32
    %c0_i32_0 = arith.constant 0 : i32
    %c0_i32_1 = arith.constant 0 : i32
    return %3, %arg0, %c0_i32, %c0_i32_0 : i32, i32, i32, i32
  }
  func.func @transform_4(%arg0: i32, %arg1: i32, %arg2: memref<16xi32, #tpu.memory_space<smem>>) -> (i32, i32, i32, i32) {
    %c8_i32 = arith.constant 8 : i32
    %0 = arith.muli %arg1, %c8_i32 : i32
    %c3_i32 = arith.constant 3 : i32
    %1 = arith.addi %0, %c3_i32 : i32
    %2 = arith.index_cast %1 : i32 to index
    %3 = memref.load %arg2[%2] : memref<16xi32, #tpu.memory_space<smem>>
    %c0_i32 = arith.constant 0 : i32
    %c0_i32_0 = arith.constant 0 : i32
    %c0_i32_1 = arith.constant 0 : i32
    return %3, %arg0, %c0_i32, %c0_i32_0 : i32, i32, i32, i32
  }
  func.func @transform_5(%arg0: i32, %arg1: i32, %arg2: memref<16xi32, #tpu.memory_space<smem>>) -> (i32, i32, i32, i32) {
    %c8_i32 = arith.constant 8 : i32
    %0 = arith.muli %arg1, %c8_i32 : i32
    %c4_i32 = arith.constant 4 : i32
    %1 = arith.addi %0, %c4_i32 : i32
    %2 = arith.index_cast %1 : i32 to index
    %3 = memref.load %arg2[%2] : memref<16xi32, #tpu.memory_space<smem>>
    %c0_i32 = arith.constant 0 : i32
    %c0_i32_0 = arith.constant 0 : i32
    %c0_i32_1 = arith.constant 0 : i32
    return %3, %arg0, %c0_i32, %c0_i32_0 : i32, i32, i32, i32
  }
  func.func @transform_6(%arg0: i32, %arg1: i32, %arg2: memref<16xi32, #tpu.memory_space<smem>>) -> (i32, i32, i32, i32) {
    %c8_i32 = arith.constant 8 : i32
    %0 = arith.muli %arg1, %c8_i32 : i32
    %c5_i32 = arith.constant 5 : i32
    %1 = arith.addi %0, %c5_i32 : i32
    %2 = arith.index_cast %1 : i32 to index
    %3 = memref.load %arg2[%2] : memref<16xi32, #tpu.memory_space<smem>>
    %c0_i32 = arith.constant 0 : i32
    %c0_i32_0 = arith.constant 0 : i32
    %c0_i32_1 = arith.constant 0 : i32
    return %3, %arg0, %c0_i32, %c0_i32_0 : i32, i32, i32, i32
  }
  func.func @transform_7(%arg0: i32, %arg1: i32, %arg2: memref<16xi32, #tpu.memory_space<smem>>) -> (i32, i32, i32, i32) {
    %c8_i32 = arith.constant 8 : i32
    %0 = arith.muli %arg1, %c8_i32 : i32
    %c6_i32 = arith.constant 6 : i32
    %1 = arith.addi %0, %c6_i32 : i32
    %2 = arith.index_cast %1 : i32 to index
    %3 = memref.load %arg2[%2] : memref<16xi32, #tpu.memory_space<smem>>
    %c0_i32 = arith.constant 0 : i32
    %c0_i32_0 = arith.constant 0 : i32
    %c0_i32_1 = arith.constant 0 : i32
    return %3, %arg0, %c0_i32, %c0_i32_0 : i32, i32, i32, i32
  }
  func.func @transform_8(%arg0: i32, %arg1: i32, %arg2: memref<16xi32, #tpu.memory_space<smem>>) -> (i32, i32, i32, i32) {
    %c8_i32 = arith.constant 8 : i32
    %0 = arith.muli %arg1, %c8_i32 : i32
    %c7_i32 = arith.constant 7 : i32
    %1 = arith.addi %0, %c7_i32 : i32
    %2 = arith.index_cast %1 : i32 to index
    %3 = memref.load %arg2[%2] : memref<16xi32, #tpu.memory_space<smem>>
    %c0_i32 = arith.constant 0 : i32
    %c0_i32_0 = arith.constant 0 : i32
    %c0_i32_1 = arith.constant 0 : i32
    return %3, %arg0, %c0_i32, %c0_i32_0 : i32, i32, i32, i32
  }
  func.func @transform_9(%arg0: i32, %arg1: i32, %arg2: memref<16xi32, #tpu.memory_space<smem>>) -> (i32, i32, i32) {
    %c0_i32 = arith.constant 0 : i32
    %c0_i32_0 = arith.constant 0 : i32
    %c0_i32_1 = arith.constant 0 : i32
    return %arg0, %c0_i32, %c0_i32_0 : i32, i32, i32
  }
  func.func @transform_10(%arg0: i32, %arg1: i32, %arg2: memref<16xi32, #tpu.memory_space<smem>>) -> (i32, i32, i32) {
    %c0_i32 = arith.constant 0 : i32
    %c0_i32_0 = arith.constant 0 : i32
    %c0_i32_1 = arith.constant 0 : i32
    return %arg0, %c0_i32, %c0_i32_0 : i32, i32, i32
  }
}

</mosaic_0001>

<bundles_post_ra>
// kernel: tpu_custom_call.1
= control target key start
LH: loop header
LB: loop body
LE: loop exit
PB: predicated region body
PF: predicated region fallthrough
CT: control target
= control target key end

     0   :  { %s5531_s0 = inlined_call_operand.hbm [shape: s32[16], index: 0, kind: input, shape index: {}]   ;;  %s5532_s1 = inlined_call_operand.hbm [shape: f32[16], index: 1, kind: input, shape index: {}]   ;;  %s5533_s2 = inlined_call_operand.hbm [shape: bf16[64,2,64,128], index: 2, kind: input, shape index: {}]   ;;  %s5534_s3 = inlined_call_operand.hbm [shape: bf16[64,2,64,128], index: 3, kind: input, shape index: {}]   ;;  %s5535_s4 = inlined_call_operand.hbm [shape: bf16[64,2,64,128], index: 4, kind: input, shape index: {}]   ;;  %s5536_s5 = inlined_call_operand.hbm [shape: bf16[64,2,64,128], index: 5, kind: input, shape index: {}]   ;;  %s5537_s6 = inlined_call_operand.hbm [shape: bf16[64,2,64,128], index: 6, kind: input, shape index: {}]   ;;  %s5538_s7 = inlined_call_operand.hbm [shape: bf16[64,2,64,128], index: 7, kind: input, shape index: {}]   ;;  %s5539_s8 = inlined_call_operand.hbm [shape: bf16[64,2,64,128], index: 8, kind: input, shape index: {}]   ;;  %s5540_s9 = inlined_call_operand.hbm [shape: bf16[64,2,64,128], index: 9, kind: input, shape index: {}]   ;;  %s5541_s10 = inlined_call_operand.hbm [shape: f32[2,8,128], index: 10, kind: output, shape index: {0}]   ;;  %s5542_s11 = inlined_call_operand.hbm [shape: s32[2,8,128], index: 11, kind: output, shape index: {1}]  }
   0x1   :  { %5641 = sst [smem:[#allocation102_spill]] %s5532_s1  ;;  %s3155_s19 = scalar_lea.hbm %s5531_s0, 16 }
   0x2   :  { %5642 = sst [smem:[#allocation103_spill]] %s5533_s2  ;;  %p3156_p0 = scmp.ne.s32.totalorder %s5531_s0, %s3155_s19 }
   0x3   :  { %5643 = sst [smem:[#allocation104_spill]] %s5534_s3  ;;  %p3159_p1 = scmp.lt.u32.totalorder %s3155_s19, %s5531_s0 }
   0x4   :  { %5644 = sst [smem:[#allocation105_spill]] %s5535_s4 }
   0x5   :  { %5645 = sst [smem:[#allocation106_spill]] %s5536_s5  ;;  %p3161_p2 = pnand %p3159_p1, %p3156_p0 }
   0x6   :  { %5646 = sst [smem:[#allocation107_spill]] %s5537_s6 }
   0x7   :  { %5647 = sst [smem:[#allocation108_spill]] %s5538_s7 }
   0x8   :  { %5648 = sst [smem:[#allocation109_spill]] %s5539_s8 }
   0x9   :  { %5649 = sst [smem:[#allocation110_spill]] %s5540_s9 }
   0xa   :  { %5650 = sst [smem:[#allocation111_spill]] %s5541_s10 }
   0xb   :  { %5651 = sst [smem:[#allocation112_spill]] %s5542_s11 }
   0xc   :  { %3164 = shalt.err (!%p3161_p2)  }
   0xd   :  { %s3776_s24 = smov [#allocation4]  }
   0xe   :  { %18 = dma.hbm_to_smem %s5531_s0, 16, %s3776_s24, [#allocation3] }
   0xf   :  { %3602 = dma.done.wait [#allocation3], 16 }
  0x10   :  { %3603 = vsyncadd [#allocation3], 4294967280 }
  0x11   :  { %20 = sfence }
  0x12   :  { %21 = vsyncpa [#allocation8], 0 }
  0x13   :  { %22 = vsyncpa [#allocation6], 0 }
  0x14   :  { %24 = vsyncpa [#allocation6 + $0x1], 0 }
  0x15   :  { %25 = vsyncpa [#allocation11], 0 }
  0x16   :  { %27 = vsyncpa [#allocation11 + $0x1], 0 }
  0x17   :  { %28 = vsyncpa [#allocation14], 0 }
  0x18   :  { %30 = vsyncpa [#allocation14 + $0x1], 0 }
  0x19   :  { %31 = vsyncpa [#allocation17], 0 }
  0x1a   :  { %33 = vsyncpa [#allocation17 + $0x1], 0 }
  0x1b   :  { %34 = vsyncpa [#allocation20], 0 }
  0x1c   :  { %36 = vsyncpa [#allocation20 + $0x1], 0 }
  0x1d   :  { %37 = vsyncpa [#allocation7], 0 }
  0x1e   :  { %39 = vsyncpa [#allocation7 + $0x1], 0 }
  0x1f   :  { %40 = vsyncpa [#allocation23], 0 }
  0x20   :  { %42 = vsyncpa [#allocation23 + $0x1], 0  ;;  %s3862_s27 = smov 0   ;;  %s3864_s0 = smov 0  }
  0x21   :  { %s3866_s28 = smov 0   ;;  %s3868_s29 = smov 0  }
  0x22   :  { %s3870_s30 = smov 0   ;;  %s3872_s12 = smov 0  }
  0x23   :  { %s3874_s13 = smov 0   ;;  %s3876_s14 = smov 0  }
  0x24   :  { %s3878_s15 = smov 0   ;;  %s3880_s16 = smov 0  }
  0x25   :  { %5652 = sst [smem:[#allocation52_spill]] %s3878_s15  ;;  %s3882_s17 = smov 0  }
  0x26   :  { %5653 = sst [smem:[#allocation53_spill]] %s3880_s16  ;;  %s3884_s18 = smov 0  }
  0x27   :  { %s3886_s19 = smov 0   ;;  %s3888_s20 = smov 0  }
  0x28   :  { %s3890_s21 = smov 0   ;;  %s3892_s22 = smov 0  }
  0x29   :  { %s3894_s23 = smov 0   ;;  %s3896_s24 = smov 0  }
  0x2a   :  { %s3898_s25 = smov 0   ;;  %s3900_s26 = smov 0  }
  0x2b   :  { %5654 = sst [smem:[#allocation54_spill]] %s3900_s26  ;;  %s3902_s11 = smov 0  }
  0x2c   :  { %5655 = sst [smem:[#allocation55_spill]] %s3902_s11  ;;  %s3904_s10 = smov 0  }
  0x2d   :  { %s3906_s9 = smov 0   ;;  %s3908_s8 = smov 0  }
  0x2e   :  { %5656 = sst [smem:[#allocation56_spill]] %s3906_s9  ;;  %s3910_s6 = smov 0  }
  0x2f   :  { %5657 = sst [smem:[#allocation57_spill]] %s3910_s6  ;;  %s3912_s4 = smov 0  }
  0x30   :  { %5658 = sst [smem:[#allocation58_spill]] %s3912_s4  ;;  %s3914_s2 = smov 0  }
  0x31   :  { %s3916_s1 = smov 0   ;;  %s3918_s7 = smov 0  }
  0x32   :  { %5659 = sst [smem:[#allocation59_spill]] %s3916_s1  ;;  %s3920_s5 = smov 0  }
  0x33   :  { %5660 = sst [smem:[#allocation60_spill]] %s3918_s7  ;;  %s3922_s3 = smov 0  }
  0x34   :  { %s3924_s11 = smov 0  }
  0x35   :  { %5661 = sst [smem:[#allocation61_spill]] %s3924_s11 }
  0x36 LB: > { %s5672_s15 = sld [smem:[#allocation52_spill]]  ;;  %s5673_s16 = sld [smem:[#allocation53_spill]]  ;;  %s3770_s3 = sphi %s3922_s3, %s5941_s3   ;;  %s3766_s5 = sphi %s3920_s5, %s5940_s5   ;;  %s3754_s2 = sphi %s3914_s2, %s5937_s2   ;;  %s3742_s8 = sphi %s3908_s8, %s5934_s8   ;;  %s3734_s10 = sphi %s3904_s10, %s5932_s10   ;;  %s3722_s25 = sphi %s3898_s25, %s5913_s25   ;;  %s3718_s24 = sphi %s3896_s24, %s5912_s24   ;;  %s3714_s23 = sphi %s3894_s23, %s5911_s23   ;;  %s3710_s22 = sphi %s3892_s22, %s5910_s22   ;;  %s3706_s21 = sphi %s3890_s21, %s5907_s21   ;;  %s3702_s20 = sphi %s3888_s20, %s5906_s20   ;;  %s3698_s19 = sphi %s3886_s19, %s5905_s19   ;;  %s3694_s18 = sphi %s3884_s18, %s5904_s18   ;;  %s3690_s17 = sphi %s3882_s17, %s5903_s17   ;;  %s3678_s14 = sphi %s3876_s14, %s5900_s14   ;;  %s3674_s13 = sphi %s3874_s13, %s5899_s13   ;;  %s3670_s12 = sphi %s3872_s12, %s5898_s12   ;;  %s3666_s30 = sphi %s3870_s30, %s5897_s30   ;;  %s3662_s29 = sphi %s3868_s29, %s5896_s29   ;;  %s3658_s28 = sphi %s3866_s28, %s5895_s28   ;;  %s3654_s0 = sphi %s3864_s0, %s5894_s0   ;;  %s3650_s27 = sphi %s3862_s27, %s5893_s27  }
  0x37   : > { %5674 = sst [smem:[#allocation52_spill]] %s3650_s27  ;;  %s5678_s26 = sld [smem:[#allocation54_spill]] }
  0x38   : > { %5675 = sst [smem:[#allocation53_spill]] %s3654_s0  ;;  %s5680_s11 = sld [smem:[#allocation55_spill]] }
  0x39   : > { %5676 = sst [smem:[#allocation62_spill]] %s3658_s28  ;;  %s5683_s9 = sld [smem:[#allocation56_spill]] }
  0x3a   : > { %5677 = sst [smem:[#allocation63_spill]] %s3662_s29  ;;  %s5686_s6 = sld [smem:[#allocation57_spill]] }
  0x3b   : > { %5679 = sst [smem:[#allocation54_spill]] %s3666_s30  ;;  %s5687_s4 = sld [smem:[#allocation58_spill]] }
  0x3c   : > { %5681 = sst [smem:[#allocation55_spill]] %s3670_s12  ;;  %s5690_s1 = sld [smem:[#allocation59_spill]] }
  0x3d   : > { %5682 = sst [smem:[#allocation64_spill]] %s3674_s13  ;;  %s5692_s7 = sld [smem:[#allocation60_spill]] }
  0x3e   : > { %5684 = sst [smem:[#allocation56_spill]] %s3678_s14  ;;  %s5695_s29 = sld [smem:[#allocation61_spill]] }
  0x3f   : > { %5685 = sst [smem:[#allocation65_spill]] %s5672_s15  ;;  %s57_s30 = sadd.s32 1, %s3766_s5 }
  0x40   : > { %5688 = sst [smem:[#allocation58_spill]] %s3690_s17  ;;  %p58_p3 = scmp.ge.s32.totalorder %s57_s30, 2 }
  0x41   : > { %5689 = sst [smem:[#allocation57_spill]] %s3694_s18  ;;  %s4029_s13 = sshll.u32 %s3766_s5, 3 }
  0x42   : > { %5691 = sst [smem:[#allocation59_spill]] %s3698_s19  ;;  %s5945_s30 = smov (%p58_p3, %s57_s30), 0 }
  0x43   : > { %5693 = sst [smem:[#allocation60_spill]] %s3702_s20  ;;  %s128_s15 = sadd.s32 1, %s3742_s8 }
  0x44   : > { %5694 = sst [smem:[#allocation66_spill]] %s3706_s21  ;;  %s5712_s21 = smov %s5945_s30 }
  0x45   : > { %5696 = sst [smem:[#allocation61_spill]] %s3714_s23  ;;  %p135_p7 = scmp.ne.s32.totalorder %s3742_s8, %s5683_s9 }
  0x46   : > { %5697 = sst [smem:[#allocation67_spill]] %s3718_s24  ;;  %p141_p8 = scmp.ne.s32.totalorder %s5683_s9, %s3734_s10 }
  0x47   : > { %5698 = sst [smem:[#allocation68_spill]] %s3722_s25  ;;  %s5710_s25 = smov %s5695_s29 }
  0x48   : > { %5699 = sst [smem:[#allocation69_spill]] %s5678_s26  ;;  %s4023_s12 = sadd.s32 4294967295, %s5710_s25  }
  0x49   : > { %5700 = sst [smem:[#allocation70_spill]] %s5680_s11  ;;  %p5583_p4 = scmp.eq.s32.totalorder %s5710_s25, 0 }
  0x4a   : > { %5701 = sst [smem:[#allocation71_spill]] %s5683_s9  ;;  %p5582_p5 = scmp.eq.s32.totalorder %s4023_s12, 0 }
  0x4b   : > { %5702 = sst [smem:[#allocation72_spill]] %s3742_s8  ;;  %p4056_p9 = por %p135_p7, %p5583_p4 }
  0x4c   : > { %5703 = sst [smem:[#allocation73_spill]] %s5687_s4  ;;  %p4063_p11 = por %p141_p8, %p5582_p5 }
  0x4d   : > { %5704 = sst [smem:[#allocation74_spill]] %s3754_s2  ;;  %p368_p12 = scmp.ne.s32.totalorder %s3658_s28, %s3654_s0 }
  0x4e   : > { %5705 = sst [smem:[#allocation75_spill]] %s5690_s1  ;;  %s5565_s1 = sadd.s32 1, %s4029_s13 }
  0x4f   : > { %5706 = sst [smem:[#allocation76_spill]] %s5692_s7  ;;  %s60_s7 = sadd.s32 1, %s3770_s3 }
  0x50   : > { %5707 = sst [smem:[#allocation77_spill]] %s3766_s5  ;;  %s5947_s7 = smov (!%p58_p3, %s60_s7), %s3770_s3 }
  0x51   : > { %5708 = sst [smem:[#allocation78_spill]] %s3770_s3  ;;  %p62_p6 = scmp.ge.s32.totalorder %s5947_s7, 2 }
  0x52   : > { %5709 = sst [smem:[#allocation79_spill]] %s5695_s29  ;;  %s4037_s29 = sshll.u32 %s5712_s21, 3 }
  0x53   : > { %5711 = sst [smem:[#allocation80_spill]] %s5945_s30  ;;  %s121_s14 = sadd.s32 1, %s4037_s29 }
  0x54   : > { %s119_s5 = sld [smem:[#allocation4 + %s5565_s1]]  ;;  %s5949_s7 = smov (%p62_p6, %s5947_s7), 0 }
  0x55   : > { %5713 = sst [smem:[#allocation81_spill]] %s5949_s7  ;;  %s4050_s21 = ssub.s32 %s3770_s3, %s5949_s7 }
  0x56   : > { %s122_s30 = sld [smem:[#allocation4 + %s121_s14]]  ;;  %p356_p10 = scmp.eq.s32.totalorder %s4050_s21, 0 }
  0x57   : > { %s5715_s14 = scalar_select %p4063_p11, 1, 0 }
  0x58   : > { %s358_s7 = sadd.s32 1, %s3658_s28  ;;  %p369_p13 = scmp.eq.s32.totalorder %s4023_s12, 3 }
  0x59   : > { %5716 = sst [smem:[#allocation82_spill]] %s5715_s14  ;;  %p374_p0 = scmp.ne.s32.totalorder %s3654_s0, %s3650_s27 }
  0x5a   : > { %s4069_s19 = scalar_select %p356_p10, %s3658_s28, %s358_s7  }
  0x5b   : > { %p4077_p1 = por %p369_p13, %p368_p12  ;;  %s5720_s14 = sadd.s32 4294967294, %s5710_s25  }
  0x5c   : > { %5717 = sst [smem:[#allocation83_spill]] %s4069_s19  ;;  %s123_s10 = ssub.s32 %s119_s5, %s122_s30 }
  0x5d   : > { %s125_s9 = sor.u32 %s123_s10, %s4050_s21  ;;  %p375_p3 = scmp.eq.s32.totalorder %s5720_s14, 3 }
  0x5e   : > { %s5718_s20 = scalar_select %p4077_p1, 1, 0 }
  0x5f   : > { %p126_p2 = scmp.eq.s32.totalorder %s125_s9, 0  ;;  %p4086_p6 = por %p375_p3, %p374_p0 }
  0x60   : > { %5719 = sst [smem:[#allocation84_spill]] %s5718_s20  ;;  %p5584_p7 = scmp.lt.s32.totalorder %s5710_s25, 4 }
  0x61   : > { %s4084_s7 = scalar_select %p126_p2, %s3742_s8, %s128_s15  }
  0x62   : > { %s5722_s19 = scalar_select %p4086_p6, 1, 0 }
  0x63   : > { %5721 = sst [smem:[#allocation85_spill]] %s4084_s7  ;;  %s4092_s5 = sshll.u32 %s3770_s3, 3 }
  0x64   : > { %5723 = sst [smem:[#allocation86_spill]] %s5722_s19  ;;  %s4095_s30 = sand.u32 1, %s5710_s25  }
  0x65   : > { %s457_s10 = sand.u32 1, %s3742_s8   ;;  %p4102_p8 = pnand %p5584_p7, %p4056_p9 }
  0x66   : > { %s2482_s28 = sshll.u32 %s457_s10, 5  ;;  %s5725_s14 = sadd.s32 1, %s4029_s13 }
  0x67   : > { %s2804_s15 = scalar_select %p4056_p9, [#allocation4], [#allocation25] }
  0x68   : > { %s5951_s14 = smov (!%p4056_p9, %s5725_s14), 0  ;;  %s459_s10 = scalar_lea.vmem [#allocation10], %s2482_s28 }
  0x69   : > { %s5953_s15 = smov (!%p5584_p7, %s2804_s15), [#allocation33]  ;;  %s5955_s14 = smov (!%p5584_p7, %s5951_s14), 0 }
  0x6a   : > { %s471_s3 = sshll.u32 %s459_s10, 4  ;;  %s462_s7 = sld [smem:[%s5953_s15 + %s5955_s14]]  ;;  %s4116_s3 = int_to_ptr.vmem [resolvable:$true] %s471_s3 }
  0x6b   : > { %s5581_s8 = sadd.s32 3, %s4029_s13  ;;  %s189_s1 = sadd.s32 3, %s4037_s29 }
  0x6c   : > { %s4121_s19 = sld [smem:[#allocation4 + %s5581_s8]]  ;;  %p203_p9 = scmp.ne.s32.totalorder %s3718_s24, %s3714_s23 }
  0x6d   : > { %s4124_s27 = sld [smem:[#allocation4 + %s189_s1]]  ;;  %p209_p10 = scmp.ne.s32.totalorder %s3714_s23, %s3710_s22 }
  0x6e   : > { %p4134_p12 = por %p203_p9, %p5583_p4  ;;  %s5727_s11 = sld [smem:[#allocation104_spill]] }
  0x6f   : > { %p4145_p13 = por %p209_p10, %p5582_p5  ;;  %p3167_p2 = pneg %p4102_p8 }
  0x70   : > { %s2485_s0 = sshll.u32 %s462_s7, 4 }
  0x71   : > { %s468_s26 = sadd.s32 %s2485_s0, %s4092_s5  ;;  %s5589_s0 = scalar_lea.sflag [#allocation11], %s4095_s30 }
  0x72   : > { %s2486_s28 = sshll.u32 %s468_s26, 6 }
  0x73   : > { %s5728_s7 = scalar_select %p4145_p13, 1, 0 }
  0x74   : > { %s4141_s8 = scalar_lea.hbm %s5727_s11, %s2486_s28  ;;  %s3170_s28 = scalar_lea.hbm %s5727_s11, 65536 }
  0x75   : > { %5729 = sst [smem:[#allocation87_spill]] %s5728_s7  ;;  %s3165_s22 = scalar_lea.hbm %s4141_s8, 512 }
  0x76   : > { %p3166_p0 = scmp.ne.s32.totalorder %s4141_s8, %s3165_s22  ;;  %p3171_p10 = scmp.lt.u32.totalorder %s4141_s8, %s5727_s11 }
  0x77   : > { %p3172_p5 = scmp.lt.u32.totalorder %s3170_s28, %s3165_s22  ;;  %p3174_p7 = scmp.lt.u32.totalorder %s3165_s22, %s4141_s8 }
  0x78   : > { %p3168_p3 = pnand %p3167_p2, %p3166_p0 }
  0x79   : > { %p3173_p4 = por %p3172_p5, %p3171_p10 }
  0x7a   : > { %p3169_p9 = pneg %p3168_p3 }
  0x7b   : > { %p3175_p6 = por %p3174_p7, %p3173_p4 }
  0x7d   : > { %p3176_p1 = pnand %p3175_p6, %p3169_p9 }
  0x7f   : > { %3179 = shalt.err (!%p3176_p1)
}
  0x80   : > { %s3180_s20 = scalar_lea.vmem %s4116_s3, 512  ;;  %s3777_s26 = smov [#allocation10]  }
  0x81   : > { %p3181_p0 = scmp.ne.s32.totalorder %s4116_s3, %s3180_s20  ;;  %s3185_s1 = sshll.u32 %s3777_s26, 4  ;;  %s3186_s1 = int_to_ptr.vmem [resolvable:$false] %s3185_s1 }
  0x82   : > { %s3187_s14 = scalar_lea.vmem %s3186_s1, 1024  ;;  %p3188_p11 = scmp.lt.s32.totalorder %s4116_s3, %s3186_s1 }
  0x83   : > { %p3183_p3 = pnand %p3181_p0, %p3167_p2  ;;  %p3189_p5 = scmp.lt.s32.totalorder %s3187_s14, %s3180_s20 }
  0x85   : > { %p3184_p13 = pneg %p3183_p3  ;;  %p3190_p10 = por %p3189_p5, %p3188_p11 }
  0x87   : > { %p3191_p4 = pnand %p3190_p10, %p3184_p13 }
  0x89   : > { %3194 = shalt.err (!%p3191_p4)
}
  0x8a   : > { %s5590_s22 = smov 64   ;;  %s5592_s20 = smov 4  }
  0x8b   : > { %2853 = dma.hbm_to_vmem [thread:$0]  (!%p4102_p8), %s4141_s8, 512, %s4116_s3, %s5589_s0, %s5590_s22, %s5590_s22, %s5592_s20  }
  0x8c   : > { %s191_s28 = ssub.s32 %s4121_s19, %s4124_s27  ;;  %s509_s26 = sand.u32 1, %s3718_s24  }
  0x8d   : > { %s193_s10 = sor.u32 %s191_s28, %s4050_s21  ;;  %s2492_s1 = sshll.u32 %s509_s26, 5 }
  0x8e   : > { %p194_p11 = scmp.eq.s32.totalorder %s193_s10, 0  ;;  %p5730_p1 = scmp.lt.s32.totalorder %s5710_s25, 4 }
  0x8f   : > { %s5732_s9 = sadd.s32 1, %s3718_s24  ;;  %s5734_s8 = sadd.s32 3, %s4029_s13 }
  0x90   : > { %p4188_p6 = pnand %p5730_p1, %p4134_p12  ;;  %s5957_s8 = smov (!%p4134_p12, %s5734_s8), 0 }
  0x91   : > { %s4195_s11 = scalar_select %p194_p11, %s3718_s24, %s5732_s9  }
  0x92   : > { %s2810_s3 = scalar_select %p4134_p12, [#allocation4], [#allocation27] }
  0x93   : > { %5733 = sst [smem:[#allocation88_spill]] %s4195_s11  ;;  %p5735_p7 = pmov %p5730_p1 }
  0x94   : > { %p5736_p8 = pmov %p5730_p1  ;;  %s511_s27 = scalar_lea.vmem [#allocation13], %s2492_s1 }
  0x95   : > { %s5959_s3 = smov (!%p5735_p7, %s2810_s3), [#allocation35]  ;;  %s523_s19 = sshll.u32 %s511_s27, 4  ;;  %s4207_s19 = int_to_ptr.vmem [resolvable:$true] %s523_s19 }
  0x96   : > { %s5961_s8 = smov (!%p5736_p8, %s5957_s8), 0  ;;  %s5596_s10 = sadd.s32 5, %s4029_s13 }
  0x97   : > { %s514_s28 = sld [smem:[%s5959_s3 + %s5961_s8]]  ;;  %s257_s26 = sadd.s32 5, %s4037_s29 }
  0x98   : > { %s4213_s15 = sld [smem:[#allocation4 + %s5596_s10]]  ;;  %s264_s22 = sadd.s32 1, %s3694_s18 }
  0x99   : > { %s4215_s9 = sld [smem:[#allocation4 + %s257_s26]]  ;;  %p271_p12 = scmp.ne.s32.totalorder %s3694_s18, %s3690_s17 }
  0x9a   : > { %s5737_s3 = sld [smem:[#allocation106_spill]]  ;;  %p5739_p2 = scmp.eq.s32.totalorder %s5710_s25, 0 }
  0x9b   : > { %p3197_p3 = pneg %p4188_p6 }
  0x9c   : > { %p4230_p9 = por %p271_p12, %p5739_p2 }
  0x9d   : > { %s2495_s0 = sshll.u32 %s514_s28, 4  ;;  %s5597_s28 = scalar_lea.sflag [#allocation14], %s4095_s30 }
  0x9e   : > { %s520_s20 = sadd.s32 %s2495_s0, %s4092_s5 }
  0x9f   : > { %s2496_s11 = sshll.u32 %s520_s20, 6 }
  0xa0   : > { %s5738_s7 = smov %s5737_s3  ;;  %s4226_s8 = scalar_lea.hbm %s5737_s3, %s2496_s11 }
  0xa1   : > { %s3195_s26 = scalar_lea.hbm %s4226_s8, 512  ;;  %s3200_s20 = scalar_lea.hbm %s5738_s7, 65536 }
  0xa2   : > { %p3196_p0 = scmp.ne.s32.totalorder %s4226_s8, %s3195_s26  ;;  %p3201_p4 = scmp.lt.u32.totalorder %s4226_s8, %s5738_s7 }
  0xa3   : > { %p3202_p11 = scmp.lt.u32.totalorder %s3200_s20, %s3195_s26  ;;  %p3204_p7 = scmp.lt.u32.totalorder %s3195_s26, %s4226_s8 }
  0xa4   : > { %p3198_p5 = pnand %p3197_p3, %p3196_p0 }
  0xa5   : > { %p3203_p1 = por %p3202_p11, %p3201_p4 }
  0xa6   : > { %p3199_p10 = pneg %p3198_p5 }
  0xa7   : > { %p3205_p8 = por %p3204_p7, %p3203_p1 }
  0xa9   : > { %p3206_p12 = pnand %p3205_p8, %p3199_p10 }
  0xab   : > { %3209 = shalt.err (!%p3206_p12)
}
  0xac   : > { %s3210_s3 = scalar_lea.vmem %s4207_s19, 512  ;;  %s3780_s11 = smov [#allocation13]  }
  0xad   : > { %p3211_p2 = scmp.ne.s32.totalorder %s4207_s19, %s3210_s3  ;;  %s3215_s0 = sshll.u32 %s3780_s11, 4  ;;  %s3216_s0 = int_to_ptr.vmem [resolvable:$false] %s3215_s0 }
  0xae   : > { %s3217_s1 = scalar_lea.vmem %s3216_s0, 1024  ;;  %p3218_p13 = scmp.lt.s32.totalorder %s4207_s19, %s3216_s0 }
  0xaf   : > { %p3213_p0 = pnand %p3211_p2, %p3197_p3  ;;  %p3219_p4 = scmp.lt.s32.totalorder %s3217_s1, %s3210_s3 }
  0xb1   : > { %p3214_p5 = pneg %p3213_p0  ;;  %p3220_p11 = por %p3219_p4, %p3218_p13 }
  0xb3   : > { %p3221_p1 = pnand %p3220_p11, %p3214_p5 }
  0xb5   : > { %3224 = shalt.err (!%p3221_p1)
}
  0xb6   : > { %s5741_s26 = smov 4   ;;  %s5742_s20 = smov 64  }
  0xb7   : > { %2863 = dma.hbm_to_vmem [thread:$0]  (!%p4188_p6), %s4226_s8, 512, %s4207_s19, %s5597_s28, %s5742_s20, %s5742_s20, %s5741_s26  }
  0xb8   : > { %s259_s14 = ssub.s32 %s4213_s15, %s4215_s9  ;;  %p5743_p13 = scmp.eq.s32.totalorder %s4023_s12, 0 }
  0xb9   : > { %p5744_p3 = scmp.ne.s32.totalorder %s3690_s17, %s5673_s16  ;;  %s261_s3 = sor.u32 %s259_s14, %s4050_s21 }
  0xba   : > { %p262_p7 = scmp.eq.s32.totalorder %s261_s3, 0  ;;  %s561_s11 = sand.u32 1, %s3694_s18  }
  0xbb   : > { %p4272_p10 = por %p5744_p3, %p5743_p13  ;;  %s2502_s0 = sshll.u32 %s561_s11, 5 }
  0xbc   : > { %p5747_p8 = scmp.lt.s32.totalorder %s5710_s25, 4  ;;  %s5750_s15 = sadd.s32 5, %s4029_s13 }
  0xbd   : > { %s5745_s27 = scalar_select %p4272_p10, 1, 0 }
  0xbe   : > { %p4282_p12 = pnand %p5747_p8, %p4230_p9  ;;  %s5963_s15 = smov (!%p4230_p9, %s5750_s15), 0 }
  0xbf   : > { %5746 = sst [smem:[#allocation89_spill]] %s5745_s27  ;;  %p5751_p6 = pmov %p5747_p8 }
  0xc0   : > { %s4289_s19 = scalar_select %p262_p7, %s3694_s18, %s264_s22  }
  0xc1   : > { %s2816_s16 = scalar_select %p4230_p9, [#allocation4], [#allocation29] }
  0xc2   : > { %5749 = sst [smem:[#allocation90_spill]] %s4289_s19  ;;  %p5752_p2 = pmov %p5751_p6 }
  0xc3   : > { %s5965_s16 = smov (!%p5751_p6, %s2816_s16), [#allocation37]  ;;  %s563_s9 = scalar_lea.vmem [#allocation16], %s2502_s0 }
  0xc4   : > { %s5967_s15 = smov (!%p5752_p2, %s5963_s15), 0  ;;  %s575_s8 = sshll.u32 %s563_s9, 4  ;;  %s4301_s8 = int_to_ptr.vmem [resolvable:$true] %s575_s8 }
  0xc5   : > { %s566_s14 = sld [smem:[%s5965_s16 + %s5967_s15]]  ;;  %p2474_p0 = scmp.ge.s32.totalorder %s5710_s25, 1 }
  0xc6   : > { %p408_p5 = scmp.lt.s32.totalorder %s5710_s25, 5  ;;  %s5754_s7 = sld [smem:[#allocation108_spill]] }
  0xc7   : > { %p5755_p11 = pmov %p5743_p13  ;;  %p3227_p3 = pneg %p4282_p12 }
  0xc8   : > { %p4305_p4 = pnand %p2474_p0, %p408_p5 }
  0xca   : > { %s5753_s22 = scalar_select %p4305_p4, 1, 0 }
  0xcb   : > { %s2505_s10 = sshll.u32 %s566_s14, 4  ;;  %p2839_p9 = pneg %p4305_p4 }
  0xcc   : > { %s572_s3 = sadd.s32 %s2505_s10, %s4092_s5 }
  0xcd   : > { %s2506_s11 = sshll.u32 %s572_s3, 6  ;;  %p4319_p1 = pnand %p2839_p9, %p5755_p11 }
  0xce   : > { %s4315_s9 = scalar_lea.hbm %s5754_s7, %s2506_s11  ;;  %s3230_s3 = scalar_lea.hbm %s5754_s7, 65536 }
  0xcf   : > { %s3225_s14 = scalar_lea.hbm %s4315_s9, 512  ;;  %p3231_p6 = scmp.lt.u32.totalorder %s4315_s9, %s5754_s7 }
  0xd0   : > { %p3226_p13 = scmp.ne.s32.totalorder %s4315_s9, %s3225_s14  ;;  %p3232_p2 = scmp.lt.u32.totalorder %s3230_s3, %s3225_s14 }
  0xd1   : > { %p3234_p5 = scmp.lt.u32.totalorder %s3225_s14, %s4315_s9 }
  0xd2   : > { %p3228_p7 = pnand %p3227_p3, %p3226_p13  ;;  %p3233_p0 = por %p3232_p2, %p3231_p6 }
  0xd4   : > { %p3229_p8 = pneg %p3228_p7  ;;  %p3235_p9 = por %p3234_p5, %p3233_p0 }
  0xd6   : > { %p3236_p11 = pnand %p3235_p9, %p3229_p8 }
  0xd8   : > { %3239 = shalt.err (!%p3236_p11)
}
  0xd9   : > { %s3240_s15 = scalar_lea.vmem %s4301_s8, 512  ;;  %s3781_s28 = smov [#allocation16]  }
  0xda   : > { %p3241_p13 = scmp.ne.s32.totalorder %s4301_s8, %s3240_s15  ;;  %s3245_s10 = sshll.u32 %s3781_s28, 4  ;;  %s3246_s10 = int_to_ptr.vmem [resolvable:$false] %s3245_s10 }
  0xdb   : > { %s3247_s11 = scalar_lea.vmem %s3246_s10, 1024  ;;  %p3248_p4 = scmp.lt.s32.totalorder %s4301_s8, %s3246_s10 }
  0xdc   : > { %p3243_p7 = pnand %p3241_p13, %p3227_p3  ;;  %p3249_p6 = scmp.lt.s32.totalorder %s3247_s11, %s3240_s15 }
  0xde   : > { %p3244_p10 = pneg %p3243_p7  ;;  %p3250_p2 = por %p3249_p6, %p3248_p4 }
  0xe0   : > { %p3251_p0 = pnand %p3250_p2, %p3244_p10 }
  0xe2   : > { %3254 = shalt.err (!%p3251_p0)
}
  0xe3   : > { %s5757_s14 = scalar_lea.sflag [#allocation17], %s4095_s30  ;;  %s5758_s28 = sld [smem:[#allocation102_spill]] }
  0xe4   : > { %2873 = dma.hbm_to_vmem [thread:$0]  (!%p4282_p12), %s4315_s9, 512, %s4301_s8, %s5757_s14, %s5742_s20, %s5742_s20, %s5741_s26  }
  0xe5   : > { %p3257_p4 = pneg %p4319_p1 }
  0xe9   : > { %s5759_s7 = smov %s5758_s28  ;;  %s3255_s24 = scalar_lea.hbm %s5758_s28, 16 }
  0xea   : > { %p3256_p10 = scmp.ne.s32.totalorder %s5759_s7, %s3255_s24  ;;  %p3262_p5 = scmp.lt.u32.totalorder %s3255_s24, %s5759_s7 }
  0xec   : > { %p3258_p3 = pnand %p3257_p4, %p3256_p10 }
  0xee   : > { %p3259_p8 = pneg %p3258_p3 }
  0xf0   : > { %p3264_p9 = pnand %p3262_p5, %p3259_p8 }
  0xf2   : > { %3267 = shalt.err (!%p3264_p9)
}
  0xf3   : > { %s3782_s19 = smov [#allocation5]   ;;  %s86_s24 = sld [smem:[#allocation4 + %s4029_s13]] }
  0xf4   : > { %2842 = dma.hbm_to_smem (!%p4319_p1), %s5759_s7, 16, %s3782_s19, [#allocation8]  }
  0xf5   : > { %s88_s14 = sld [smem:[#allocation4 + %s4037_s29]]  ;;  %s94_s16 = sadd.s32 1, %s3754_s2 }
  0xf6   : > { %p101_p12 = scmp.ne.s32.totalorder %s3754_s2, %s5687_s4  ;;  %p107_p11 = scmp.ne.s32.totalorder %s5687_s4, %s5686_s6 }
  0xf7   : > { %s5604_s3 = sand.u32 1, %s3754_s2   ;;  %p5760_p13 = scmp.eq.s32.totalorder %s5710_s25, 0 }
  0xf8   : > { %p5762_p6 = scmp.eq.s32.totalorder %s4023_s12, 0  ;;  %s2477_s28 = sshll.u32 %s5604_s3, 5 }
  0xf9   : > { %p4380_p7 = por %p5760_p13, %p101_p12  ;;  %p5764_p2 = scmp.lt.s32.totalorder %s5710_s25, 4 }
  0xfa   : > { %p4386_p1 = por %p5762_p6, %p107_p11  ;;  %s5766_s15 = sld [smem:[#allocation70_spill]] }
  0xfb   : > { %p4396_p0 = pnand %p5764_p2, %p4380_p7  ;;  %s89_s10 = ssub.s32 %s86_s24, %s88_s14 }
  0xfc   : > { %s5763_s19 = scalar_select %p4386_p1, 1, 0 }
  0xfd   : > { %s434_s1 = scalar_lea.vmem [#allocation9], %s2477_s28  ;;  %s5767_s11 = sld [smem:[#allocation69_spill]] }
  0xfe   : > { %s445_s8 = sshll.u32 %s434_s1, 4  ;;  %s5768_s9 = sld [smem:[#allocation68_spill]]  ;;  %s4401_s8 = int_to_ptr.vmem [resolvable:$true] %s445_s8 }
  0xff   : > { %s91_s7 = sor.u32 %s4050_s21, %s89_s10  ;;  %p5770_p4 = pmov %p5764_p2 }
 0x100   : > { %p92_p10 = scmp.eq.s32.totalorder %s91_s7, 0  ;;  %p5771_p3 = pmov %p5764_p2 }
 0x101   : > { %s2801_s3 = scalar_select %p4380_p7, [#allocation4], [#allocation24] }
 0x102   : > { %s4406_s18 = scalar_select %p92_p10, %s3754_s2, %s94_s16  }
 0x103   : > { %s2802_s24 = scalar_select %p4380_p7, %s4029_s13, 0 }
 0x104   : > { %5769 = sst [smem:[#allocation91_spill]] %s4406_s18  ;;  %s5969_s3 = smov (!%p5770_p4, %s2801_s3), [#allocation32] }
 0x105   : > { %s5971_s24 = smov (!%p5771_p3, %s2802_s24), 0  ;;  %s5609_s28 = sadd.s32 2, %s4029_s13 }
 0x106   : > { %s436_s14 = sld [smem:[%s5969_s3 + %s5971_s24]]  ;;  %s155_s7 = sadd.s32 2, %s4037_s29 }
 0x107   : > { %s4418_s10 = sld [smem:[#allocation4 + %s5609_s28]]  ;;  %p169_p8 = scmp.ne.s32.totalorder %s5766_s15, %s5767_s11 }
 0x108   : > { %s4421_s1 = sld [smem:[#allocation4 + %s155_s7]]  ;;  %p175_p5 = scmp.ne.s32.totalorder %s5767_s11, %s5768_s9 }
 0x109   : > { %s483_s18 = sand.u32 1, %s5766_s15   ;;  %p5773_p9 = pmov %p5760_p13 }
 0x10a   : > { %p5775_p11 = pmov %p5762_p6  ;;  %s5778_s23 = sld [smem:[#allocation103_spill]] }
 0x10b   : > { %p4432_p12 = por %p169_p8, %p5773_p9  ;;  %s4447_s11 = sshll.u32 %s483_s18, 5 }
 0x10c   : > { %s2480_s0 = sshll.u32 %s436_s14, 4  ;;  %p4438_p13 = por %p175_p5, %p5775_p11 }
 0x10d   : > { %s442_s27 = sadd.s32 %s2480_s0, %s4092_s5  ;;  %s5780_s9 = sand.u32 1, %s3754_s2  }
 0x10e   : > { %5772 = sst [smem:[#allocation68_spill]] %s4421_s1  ;;  %s2481_s3 = sshll.u32 %s442_s27, 6 }
 0x10f   : > { %s5776_s24 = scalar_select %p4438_p13, 1, 0 }
 0x110   : > { %s5779_s1 = smov %s5778_s23  ;;  %s4445_s16 = scalar_lea.hbm %s5778_s23, %s2481_s3 }
 0x111   : > { %5777 = sst [smem:[#allocation92_spill]] %s5776_s24  ;;  %s4451_s14 = scalar_lea.sflag [#allocation6], %s5780_s9 }
 0x112   : > { %s3268_s27 = scalar_lea.hbm %s4445_s16, 512  ;;  %p3270_p6 = pneg %p4396_p0 }
 0x113   : > { %p3269_p7 = scmp.ne.s32.totalorder %s4445_s16, %s3268_s27  ;;  %s3273_s0 = scalar_lea.hbm %s5779_s1, 65536 }
 0x114   : > { %p3274_p4 = scmp.lt.u32.totalorder %s4445_s16, %s5779_s1  ;;  %p3275_p3 = scmp.lt.u32.totalorder %s3273_s0, %s3268_s27 }
 0x115   : > { %p3271_p2 = pnand %p3270_p6, %p3269_p7  ;;  %p3277_p5 = scmp.lt.u32.totalorder %s3268_s27, %s4445_s16 }
 0x116   : > { %p3276_p8 = por %p3275_p3, %p3274_p4 }
 0x117   : > { %p3272_p10 = pneg %p3271_p2 }
 0x118   : > { %p3278_p9 = por %p3277_p5, %p3276_p8 }
 0x11a   : > { %p3279_p11 = pnand %p3278_p9, %p3272_p10 }
 0x11c   : > { %3282 = shalt.err (!%p3279_p11)
}
 0x11d   : > { %s3283_s18 = scalar_lea.vmem %s4401_s8, 512  ;;  %s3783_s9 = smov [#allocation9]  }
 0x11e   : > { %p3284_p7 = scmp.ne.s32.totalorder %s4401_s8, %s3283_s18  ;;  %s3288_s28 = sshll.u32 %s3783_s9, 4  ;;  %s3289_s28 = int_to_ptr.vmem [resolvable:$false] %s3288_s28 }
 0x11f   : > { %s3290_s23 = scalar_lea.vmem %s3289_s28, 1024  ;;  %p3291_p1 = scmp.lt.s32.totalorder %s4401_s8, %s3289_s28 }
 0x120   : > { %p3286_p2 = pnand %p3284_p7, %p3270_p6  ;;  %p3292_p4 = scmp.lt.s32.totalorder %s3290_s23, %s3283_s18 }
 0x122   : > { %p3287_p13 = pneg %p3286_p2  ;;  %p3293_p3 = por %p3292_p4, %p3291_p1 }
 0x124   : > { %p3294_p8 = pnand %p3293_p3, %p3287_p13 }
 0x126   : > { %3297 = shalt.err (!%p3294_p8)
}
 0x127   : > { %s5781_s27 = sld [smem:[#allocation68_spill]]  ;;  %s5782_s3 = sld [smem:[#allocation66_spill]] }
 0x128   : > { %2848 = dma.hbm_to_vmem [thread:$0]  (!%p4396_p0), %s4445_s16, 512, %s4401_s8, %s4451_s14, %s5742_s20, %s5742_s20, %s5741_s26  }
 0x129   : > { %s485_s7 = scalar_lea.vmem [#allocation12], %s4447_s11  ;;  %s5783_s9 = sld [smem:[#allocation60_spill]] }
 0x12a   : > { %s497_s18 = sshll.u32 %s485_s7, 4  ;;  %s5784_s28 = sld [smem:[#allocation59_spill]]  ;;  %s4486_s18 = int_to_ptr.vmem [resolvable:$true] %s497_s18 }
 0x12b   : > { %s2807_s23 = scalar_select %p4432_p12, [#allocation4], [#allocation26] }
 0x12c   : > { %s5785_s1 = sadd.s32 1, %s5766_s15  ;;  %s5787_s8 = sadd.s32 2, %s4029_s13 }
 0x12d   : > { %s157_s6 = ssub.s32 %s4418_s10, %s5781_s27  ;;  %s5975_s8 = smov (!%p4432_p12, %s5787_s8), 0 }
 0x12e   : > { %s159_s0 = sor.u32 %s157_s6, %s4050_s21  ;;  %p5788_p0 = scmp.lt.s32.totalorder %s5710_s25, 4 }
 0x12f   : > { %p160_p1 = scmp.eq.s32.totalorder %s159_s0, 0  ;;  %s220_s11 = sadd.s32 4, %s4029_s13 }
 0x130   : > { %s5977_s23 = smov (!%p5788_p0, %s2807_s23), [#allocation34]  ;;  %p5789_p13 = pmov %p5788_p0 }
 0x131   : > { %s5973_s15 = smov (!%p160_p1, %s5766_s15), %s5785_s1  ;;  %p5790_p6 = pmov %p5788_p0 }
 0x132   : > { %5786 = sst [smem:[#allocation59_spill]] %s5973_s15  ;;  %s5979_s8 = smov (!%p5789_p13, %s5975_s8), 0 }
 0x133   : > { %p4507_p10 = pnand %p5790_p6, %p4432_p12  ;;  %s488_s16 = sld [smem:[%s5977_s23 + %s5979_s8]] }
 0x134   : > { %s4514_s1 = sld [smem:[#allocation4 + %s220_s11]]  ;;  %s223_s14 = sadd.s32 4, %s4037_s29 }
 0x135   : > { %s4517_s27 = sld [smem:[#allocation4 + %s223_s14]]  ;;  %s230_s6 = sadd.s32 1, %s5782_s3 }
 0x136   : > { %p237_p5 = scmp.ne.s32.totalorder %s5782_s3, %s5783_s9  ;;  %p243_p9 = scmp.ne.s32.totalorder %s5783_s9, %s5784_s28 }
 0x137   : > { %p5792_p12 = scmp.eq.s32.totalorder %s5710_s25, 0  ;;  %s5794_s15 = sld [smem:[#allocation105_spill]] }
 0x138   : > { %p5796_p7 = scmp.eq.s32.totalorder %s4023_s12, 0  ;;  %p3300_p3 = pneg %p4507_p10 }
 0x139   : > { %s2490_s0 = sshll.u32 %s488_s16, 4  ;;  %p4527_p11 = por %p237_p5, %p5792_p12 }
 0x13a   : > { %s494_s7 = sadd.s32 %s2490_s0, %s4092_s5  ;;  %p4538_p2 = por %p243_p9, %p5796_p7 }
 0x13b   : > { %s2491_s17 = sshll.u32 %s494_s7, 6 }
 0x13c   : > { %s5797_s16 = scalar_select %p4538_p2, 1, 0 }
 0x13d   : > { %s5795_s4 = smov %s5794_s15  ;;  %s4534_s24 = scalar_lea.hbm %s5794_s15, %s2491_s17 }
 0x13e   : > { %5798 = sst [smem:[#allocation68_spill]] %s5797_s16  ;;  %s3298_s9 = scalar_lea.hbm %s4534_s24, 512 }
 0x13f   : > { %p3299_p4 = scmp.ne.s32.totalorder %s4534_s24, %s3298_s9  ;;  %s3303_s14 = scalar_lea.hbm %s5795_s4, 65536 }
 0x140   : > { %p3304_p0 = scmp.lt.u32.totalorder %s4534_s24, %s5795_s4  ;;  %p3305_p13 = scmp.lt.u32.totalorder %s3303_s14, %s3298_s9 }
 0x141   : > { %p3301_p8 = pnand %p3300_p3, %p3299_p4  ;;  %p3307_p5 = scmp.lt.u32.totalorder %s3298_s9, %s4534_s24 }
 0x142   : > { %p3306_p6 = por %p3305_p13, %p3304_p0 }
 0x143   : > { %p3302_p1 = pneg %p3301_p8 }
 0x144   : > { %p3308_p9 = por %p3307_p5, %p3306_p6 }
 0x146   : > { %p3309_p12 = pnand %p3308_p9, %p3302_p1 }
 0x148   : > { %3312 = shalt.err (!%p3309_p12)
}
 0x149   : > { %s3313_s17 = scalar_lea.vmem %s4486_s18, 512  ;;  %s3784_s23 = smov [#allocation12]  }
 0x14a   : > { %p3314_p7 = scmp.ne.s32.totalorder %s4486_s18, %s3313_s17  ;;  %s3318_s8 = sshll.u32 %s3784_s23, 4  ;;  %s3319_s8 = int_to_ptr.vmem [resolvable:$false] %s3318_s8 }
 0x14b   : > { %s3320_s28 = scalar_lea.vmem %s3319_s8, 1024  ;;  %p3321_p2 = scmp.lt.s32.totalorder %s4486_s18, %s3319_s8 }
 0x14c   : > { %p3316_p4 = pnand %p3314_p7, %p3300_p3  ;;  %p3322_p0 = scmp.lt.s32.totalorder %s3320_s28, %s3313_s17 }
 0x14e   : > { %p3317_p8 = pneg %p3316_p4  ;;  %p3323_p13 = por %p3322_p0, %p3321_p2 }
 0x150   : > { %p3324_p6 = pnand %p3323_p13, %p3317_p8 }
 0x152   : > { %3327 = shalt.err (!%p3324_p6)
}
 0x153   : > { %s5799_s9 = scalar_lea.sflag [#allocation11], %s4095_s30  ;;  %s225_s10 = ssub.s32 %s4514_s1, %s4517_s27 }
 0x154   : > { %2858 = dma.hbm_to_vmem [thread:$0]  (!%p4507_p10), %s4534_s24, 512, %s4486_s18, %s5799_s9, %s5742_s20, %s5742_s20, %s5741_s26  }
 0x155   : > { %s535_s15 = sand.u32 1, %s5782_s3   ;;  %s227_s14 = sor.u32 %s225_s10, %s4050_s21 }
 0x156   : > { %s2497_s0 = sshll.u32 %s535_s15, 5  ;;  %p228_p2 = scmp.eq.s32.totalorder %s227_s14, 0 }
 0x157   : > { %s2813_s7 = scalar_select %p4527_p11, [#allocation4], [#allocation28] }
 0x158   : > { %s5800_s17 = sld [smem:[#allocation65_spill]]  ;;  %s5981_s3 = smov (!%p228_p2, %s5782_s3), %s230_s6 }
 0x159   : > { %5801 = sst [smem:[#allocation93_spill]] %s5981_s3  ;;  %s5983_s11 = smov (!%p4527_p11, %s220_s11), 0 }
 0x15a   : > { %p5802_p3 = scmp.lt.s32.totalorder %s5710_s25, 4  ;;  %s5803_s24 = sld [smem:[#allocation56_spill]] }
 0x15b   : > { %s5805_s18 = sld [smem:[#allocation64_spill]]  ;;  %s537_s1 = scalar_lea.vmem [#allocation15], %s2497_s0 }
 0x15c   : > { %s5985_s7 = smov (!%p5802_p3, %s2813_s7), [#allocation36]  ;;  %p5804_p10 = pmov %p5802_p3 }
 0x15d   : > { %s549_s27 = sshll.u32 %s537_s1, 4  ;;  %p5806_p1 = pmov %p5802_p3  ;;  %s4599_s27 = int_to_ptr.vmem [resolvable:$true] %s549_s27 }
 0x15e   : > { %s5987_s11 = smov (!%p5804_p10, %s5983_s11), 0  ;;  %s288_s8 = sadd.s32 6, %s4029_s13 }
 0x15f   : > { %p4595_p5 = pnand %p5806_p1, %p4527_p11  ;;  %s540_s6 = sld [smem:[%s5985_s7 + %s5987_s11]] }
 0x160   : > { %s4604_s28 = sld [smem:[#allocation4 + %s288_s8]]  ;;  %s291_s9 = sadd.s32 6, %s4037_s29 }
 0x161   : > { %s4607_s15 = sld [smem:[#allocation4 + %s291_s9]]  ;;  %s298_s2 = sadd.s32 1, %s5800_s17 }
 0x162   : > { %p305_p11 = scmp.ne.s32.totalorder %s5800_s17, %s5803_s24  ;;  %s5808_s3 = sld [smem:[#allocation107_spill]] }
 0x163   : > { %p3330_p7 = pneg %p4595_p5 }
 0x165   : > { %s2500_s10 = sshll.u32 %s540_s6, 4 }
 0x166   : > { %s546_s14 = sadd.s32 %s2500_s10, %s4092_s5 }
 0x167   : > { %s2501_s0 = sshll.u32 %s546_s14, 6 }
 0x168   : > { %s5809_s26 = smov %s5808_s3  ;;  %s4616_s16 = scalar_lea.hbm %s5808_s3, %s2501_s0 }
 0x169   : > { %s3328_s11 = scalar_lea.hbm %s4616_s16, 512  ;;  %s3333_s9 = scalar_lea.hbm %s5809_s26, 65536 }
 0x16a   : > { %p3329_p12 = scmp.ne.s32.totalorder %s4616_s16, %s3328_s11  ;;  %p3334_p0 = scmp.lt.u32.totalorder %s4616_s16, %s5809_s26 }
 0x16b   : > { %p3335_p13 = scmp.lt.u32.totalorder %s3333_s9, %s3328_s11  ;;  %p3337_p2 = scmp.lt.u32.totalorder %s3328_s11, %s4616_s16 }
 0x16c   : > { %p3331_p4 = pnand %p3330_p7, %p3329_p12 }
 0x16d   : > { %p3336_p6 = por %p3335_p13, %p3334_p0 }
 0x16e   : > { %p3332_p8 = pneg %p3331_p4 }
 0x16f   : > { %p3338_p3 = por %p3337_p2, %p3336_p6 }
 0x171   : > { %p3339_p10 = pnand %p3338_p3, %p3332_p8 }
 0x173   : > { %3342 = shalt.err (!%p3339_p10)
}
 0x174   : > { %s3343_s10 = scalar_lea.vmem %s4599_s27, 512  ;;  %s3785_s14 = smov [#allocation15]  }
 0x175   : > { %p3344_p1 = scmp.ne.s32.totalorder %s4599_s27, %s3343_s10  ;;  %s3348_s0 = sshll.u32 %s3785_s14, 4  ;;  %s3349_s0 = int_to_ptr.vmem [resolvable:$false] %s3348_s0 }
 0x176   : > { %s3350_s1 = scalar_lea.vmem %s3349_s0, 1024  ;;  %p3351_p9 = scmp.lt.s32.totalorder %s4599_s27, %s3349_s0 }
 0x177   : > { %p3346_p12 = pnand %p3344_p1, %p3330_p7  ;;  %p3352_p0 = scmp.lt.s32.totalorder %s3350_s1, %s3343_s10 }
 0x179   : > { %p3347_p4 = pneg %p3346_p12  ;;  %p3353_p13 = por %p3352_p0, %p3351_p9 }
 0x17b   : > { %p3354_p6 = pnand %p3353_p13, %p3347_p4 }
 0x17d   : > { %3357 = shalt.err (!%p3354_p6)
}
 0x17e   : > { %s5810_s11 = smov 4   ;;  %s5811_s7 = scalar_lea.sflag [#allocation14], %s4095_s30 }
 0x17f   : > { %2868 = dma.hbm_to_vmem [thread:$0]  (!%p4595_p5), %s4616_s16, 512, %s4599_s27, %s5811_s7, %s5742_s20, %s5742_s20, %s5810_s11  }
 0x180   : > { %p5812_p9 = scmp.eq.s32.totalorder %s5710_s25, 0  ;;  %p5813_p8 = scmp.eq.s32.totalorder %s4023_s12, 0 }
 0x181   : > { %p5814_p2 = scmp.ne.s32.totalorder %s5803_s24, %s5805_s18  ;;  %s293_s6 = ssub.s32 %s4604_s28, %s4607_s15 }
 0x182   : > { %p307_p7 = por %p305_p11, %p5812_p9  ;;  %s587_s9 = sand.u32 1, %s5800_s17  }
 0x183   : > { %p4660_p3 = por %p5814_p2, %p5813_p8  ;;  %s295_s4 = sor.u32 %s293_s6, %s4050_s21 }
 0x184   : > { %s2507_s3 = sshll.u32 %s587_s9, 5  ;;  %p296_p10 = scmp.eq.s32.totalorder %s295_s4, 0 }
 0x185   : > { %s2819_s10 = scalar_select %p307_p7, [#allocation4], [#allocation30] }
 0x186   : > { %s5989_s17 = smov (!%p296_p10, %s5800_s17), %s298_s2  ;;  %s5817_s16 = sld [smem:[#allocation54_spill]] }
 0x187   : > { %5816 = sst [smem:[#allocation94_spill]] %s5989_s17  ;;  %s5818_s24 = sld [smem:[#allocation55_spill]] }
 0x188   : > { %s5991_s8 = smov (!%p307_p7, %s288_s8), 0  ;;  %p5819_p5 = scmp.lt.s32.totalorder %s5710_s25, 4 }
 0x189   : > { %s5821_s18 = sld [smem:[#allocation63_spill]]  ;;  %s589_s15 = scalar_lea.vmem [#allocation18], %s2507_s3 }
 0x18a   : > { %s5993_s10 = smov (!%p5819_p5, %s2819_s10), [#allocation38]  ;;  %p5820_p11 = pmov %p5819_p5 }
 0x18b   : > { %p5822_p1 = pmov %p5819_p5  ;;  %s601_s2 = sshll.u32 %s589_s15, 4  ;;  %s4694_s2 = int_to_ptr.vmem [resolvable:$true] %s601_s2 }
 0x18c   : > { %s5995_s8 = smov (!%p5820_p11, %s5991_s8), 0  ;;  %s322_s14 = sadd.s32 7, %s4029_s13 }
 0x18d   : > { %p4681_p12 = pnand %p5822_p1, %p307_p7  ;;  %s592_s28 = sld [smem:[%s5993_s10 + %s5995_s8]] }
 0x18e   : > { %s4688_s0 = sld [smem:[#allocation4 + %s322_s14]]  ;;  %s325_s1 = sadd.s32 7, %s4037_s29 }
 0x18f   : > { %s4691_s6 = sld [smem:[#allocation4 + %s325_s1]]  ;;  %p3360_p6 = pneg %p4681_p12 }
 0x190   : > { %s5824_s8 = sld [smem:[#allocation109_spill]] }
 0x193   : > { %s2510_s7 = sshll.u32 %s592_s28, 4 }
 0x194   : > { %s598_s9 = sadd.s32 %s2510_s7, %s4092_s5 }
 0x195   : > { %s2511_s4 = sshll.u32 %s598_s9, 6 }
 0x196   : > { %s5825_s11 = smov %s5824_s8  ;;  %s4701_s10 = scalar_lea.hbm %s5824_s8, %s2511_s4 }
 0x197   : > { %s3358_s3 = scalar_lea.hbm %s4701_s10, 512  ;;  %s3363_s15 = scalar_lea.hbm %s5825_s11, 65536 }
 0x198   : > { %p3359_p13 = scmp.ne.s32.totalorder %s4701_s10, %s3358_s3  ;;  %p3364_p8 = scmp.lt.u32.totalorder %s4701_s10, %s5825_s11 }
 0x199   : > { %p3365_p2 = scmp.lt.u32.totalorder %s3363_s15, %s3358_s3  ;;  %p3367_p5 = scmp.lt.u32.totalorder %s3358_s3, %s4701_s10 }
 0x19a   : > { %p3361_p9 = pnand %p3360_p6, %p3359_p13 }
 0x19b   : > { %p3366_p10 = por %p3365_p2, %p3364_p8 }
 0x19c   : > { %p3362_p7 = pneg %p3361_p9 }
 0x19d   : > { %p3368_p11 = por %p3367_p5, %p3366_p10 }
 0x19f   : > { %p3369_p1 = pnand %p3368_p11, %p3362_p7 }
 0x1a1   : > { %3372 = shalt.err (!%p3369_p1)
}
 0x1a2   : > { %s3373_s1 = scalar_lea.vmem %s4694_s2, 512  ;;  %s3786_s7 = smov [#allocation18]  }
 0x1a3   : > { %p3374_p13 = scmp.ne.s32.totalorder %s4694_s2, %s3373_s1  ;;  %s3378_s9 = sshll.u32 %s3786_s7, 4  ;;  %s3379_s9 = int_to_ptr.vmem [resolvable:$false] %s3378_s9 }
 0x1a4   : > { %s3380_s4 = scalar_lea.vmem %s3379_s9, 1024  ;;  %p3381_p0 = scmp.lt.s32.totalorder %s4694_s2, %s3379_s9 }
 0x1a5   : > { %p3376_p9 = pnand %p3374_p13, %p3360_p6  ;;  %p3382_p8 = scmp.lt.s32.totalorder %s3380_s4, %s3373_s1 }
 0x1a7   : > { %p3377_p4 = pneg %p3376_p9  ;;  %p3383_p2 = por %p3382_p8, %p3381_p0 }
 0x1a9   : > { %p3384_p10 = pnand %p3383_p2, %p3377_p4 }
 0x1ab   : > { %3387 = shalt.err (!%p3384_p10)
}
 0x1ac   : > { %s5826_s8 = smov 4   ;;  %s5827_s3 = scalar_lea.sflag [#allocation17], %s4095_s30 }
 0x1ad   : > { %2878 = dma.hbm_to_vmem [thread:$0]  (!%p4681_p12), %s4701_s10, 512, %s4694_s2, %s5827_s3, %s5742_s20, %s5742_s20, %s5826_s8  }
 0x1ae   : > { %s332_s30 = sadd.s32 1, %s5818_s24  ;;  %p5828_p4 = scmp.eq.s32.totalorder %s4023_s12, 0 }
 0x1af   : > { %p5829_p0 = scmp.ne.s32.totalorder %s5817_s16, %s5821_s18  ;;  %s327_s29 = ssub.s32 %s4688_s0, %s4691_s6 }
 0x1b0   : > { %s611_s28 = sand.u32 1, %s5818_s24   ;;  %s329_s15 = sor.u32 %s327_s29, %s4050_s21 }
 0x1b1   : > { %p4741_p6 = por %p5829_p0, %p5828_p4  ;;  %p5831_p7 = scmp.eq.s32.totalorder %s5710_s25, 0 }
 0x1b2   : > { %p5832_p5 = scmp.ne.s32.totalorder %s5818_s24, %s5817_s16  ;;  %p330_p1 = scmp.eq.s32.totalorder %s329_s15, 0 }
 0x1b3   : > { %s5830_s27 = scalar_select %p4741_p6, 1, 0 }
 0x1b4   : > { %p341_p11 = por %p5832_p5, %p5831_p7  ;;  %s2512_s26 = sshll.u32 %s611_s28, 5 }
 0x1b5   : > { %p5833_p13 = scmp.lt.s32.totalorder %s5710_s25, 4  ;;  %s5997_s24 = smov (!%p330_p1, %s5818_s24), %s332_s30 }
 0x1b6   : > { %5835 = sst [smem:[#allocation95_spill]] %s5997_s24  ;;  %s5999_s14 = smov (!%p341_p11, %s322_s14), 0 }
 0x1b7   : > { %p4756_p9 = pnand %p5833_p13, %p341_p11  ;;  %p5836_p12 = pmov %p5833_p13 }
 0x1b8   : > { %s2822_s18 = scalar_select %p341_p11, [#allocation4], [#allocation31] }
 0x1b9   : > { %p5837_p8 = pmov %p5836_p12  ;;  %s615_s16 = scalar_lea.vmem [#allocation19], %s2512_s26 }
 0x1ba   : > { %s6001_s18 = smov (!%p5836_p12, %s2822_s18), [#allocation39]  ;;  %s627_s2 = sshll.u32 %s615_s16, 4  ;;  %s4770_s2 = int_to_ptr.vmem [resolvable:$true] %s627_s2 }
 0x1bb   : > { %s6003_s14 = smov (!%p5837_p8, %s5999_s14), 0  ;;  %s5838_s9 = sld [smem:[#allocation110_spill]] }
 0x1bc   : > { %s618_s21 = sld [smem:[%s6001_s18 + %s6003_s14]]  ;;  %s4777_s13 = scalar_lea.sflag [#allocation20], %s611_s28 }
 0x1bd   : > { %p3390_p10 = pneg %p4756_p9 }
 0x1c1   : > { %s5839_s4 = smov %s5838_s9 }
 0x1c2   : > { %s2515_s0 = sshll.u32 %s618_s21, 4  ;;  %s3393_s29 = scalar_lea.hbm %s5839_s4, 65536 }
 0x1c3   : > { %s624_s6 = sadd.s32 %s2515_s0, %s4092_s5 }
 0x1c4   : > { %s2516_s10 = sshll.u32 %s624_s6, 6 }
 0x1c5   : > { %s4775_s3 = scalar_lea.hbm %s5838_s9, %s2516_s10 }
 0x1c6   : > { %s3388_s30 = scalar_lea.hbm %s4775_s3, 512  ;;  %p3394_p7 = scmp.lt.u32.totalorder %s4775_s3, %s5839_s4 }
 0x1c7   : > { %p3389_p2 = scmp.ne.s32.totalorder %s4775_s3, %s3388_s30  ;;  %p3395_p5 = scmp.lt.u32.totalorder %s3393_s29, %s3388_s30 }
 0x1c8   : > { %p3397_p1 = scmp.lt.u32.totalorder %s3388_s30, %s4775_s3 }
 0x1c9   : > { %p3391_p4 = pnand %p3390_p10, %p3389_p2  ;;  %p3396_p11 = por %p3395_p5, %p3394_p7 }
 0x1cb   : > { %p3392_p0 = pneg %p3391_p4  ;;  %p3398_p13 = por %p3397_p1, %p3396_p11 }
 0x1cd   : > { %p3399_p12 = pnand %p3398_p13, %p3392_p0 }
 0x1cf   : > { %3402 = shalt.err (!%p3399_p12)
}
 0x1d0   : > { %s3403_s28 = scalar_lea.vmem %s4770_s2, 512  ;;  %s3787_s18 = smov [#allocation19]  }
 0x1d1   : > { %p3404_p8 = scmp.ne.s32.totalorder %s4770_s2, %s3403_s28  ;;  %s3408_s21 = sshll.u32 %s3787_s18, 4  ;;  %s3409_s21 = int_to_ptr.vmem [resolvable:$false] %s3408_s21 }
 0x1d2   : > { %s3410_s16 = scalar_lea.vmem %s3409_s21, 1024  ;;  %p3411_p6 = scmp.lt.s32.totalorder %s4770_s2, %s3409_s21 }
 0x1d3   : > { %p3406_p2 = pnand %p3404_p8, %p3390_p10  ;;  %p3412_p7 = scmp.lt.s32.totalorder %s3410_s16, %s3403_s28 }
 0x1d5   : > { %p3407_p4 = pneg %p3406_p2  ;;  %p3413_p5 = por %p3412_p7, %p3411_p6 }
 0x1d7   : > { %p3414_p11 = pnand %p3413_p5, %p3407_p4 }
 0x1d9   : > { %3417 = shalt.err (!%p3414_p11)
}
 0x1da   : > { %2883 = dma.hbm_to_vmem [thread:$0]  (!%p4756_p9), %s4775_s3, 512, %s4770_s2, %s4777_s13, %s5742_s20, %s5742_s20, %s5826_s8  }
 0x1db   : > { %p5840_p10 = scmp.ne.s32.totalorder %s5753_s22, 0 }
 0x1dd   : > { %639 = sbr.rel (%p5840_p10) target bundleno = 11906 (0x2e82), region = 56 }
 0x1e4   : > { %p5841_p0 = scmp.eq.s32.totalorder %s4023_s12, 0 }
 0x1e6   : > { %3605 = dma.done.wait (%p5841_p0), [#allocation8], 16   ;;  %p5842_p1 = pmov %p5841_p0 }
 0x1e7   : > { %s5843_s0 = sld [smem:[#allocation73_spill]]  ;;  %p5844_p6 = scmp.ne.s32.totalorder %s5763_s19, 0 }
 0x1e8   : > { %3607 = vsyncadd (%p5842_p1), [#allocation8], 4294967280 }
 0x1ed   : > { %s645_s6 = sand.u32 1, %s5843_s0  }
 0x1ee   : > { %s2519_s17 = sshll.u32 %s645_s6, 5  ;;  %s646_s10 = scalar_lea.sflag [#allocation6], %s645_s6 }
 0x1ef   : > { %s4815_s1 = scalar_lea.vmem [#allocation9], %s2519_s17 }
 0x1f0   : > { %3609 = dma.done.wait (%p5844_p6), %s646_s10, 512  }
 0x1f1   : > { %3611 = vsyncadd (%p5844_p6), %s646_s10, 4294966784  ;;  %s5845_s20 = sld [smem:[#allocation71_spill]]  ;;  %s5846_s22 = sld [smem:[#allocation82_spill]] }
 0x1f2   : > { %s654_s8 = sand.u32 1, %s4023_s12  }
 0x1f3   : > { %s655_s9 = scalar_lea.sflag [#allocation11], %s654_s8 }
 0x1f7   : > { %s656_s2 = sand.u32 1, %s5845_s20   ;;  %p5847_p9 = scmp.ne.s32.totalorder %s5846_s22, 0 }
 0x1f8   : > { %s2520_s7 = sshll.u32 %s656_s2, 5 }
 0x1f9   : > { %s4823_s3 = scalar_lea.vmem [#allocation10], %s2520_s7 }
 0x1fa   : > { %3613 = dma.done.wait (%p5847_p9), %s655_s9, 512  }
 0x1fb   : > { %3615 = vsyncadd (%p5847_p9), %s655_s9, 4294966784  ;;  %s5848_s13 = sld [smem:[#allocation69_spill]]  ;;  %s5849_s30 = sld [smem:[#allocation92_spill]] }
 0x201   : > { %s665_s5 = sand.u32 1, %s5848_s13   ;;  %p5850_p13 = scmp.ne.s32.totalorder %s5849_s30, 0 }
 0x202   : > { %s2521_s14 = sshll.u32 %s665_s5, 5 }
 0x203   : > { %s4830_s19 = scalar_lea.vmem [#allocation12], %s2521_s14 }
 0x204   : > { %3617 = dma.done.wait (%p5850_p13), %s655_s9, 512  }
 0x205   : > { %3619 = vsyncadd (%p5850_p13), %s655_s9, 4294966784  ;;  %s5851_s12 = sld [smem:[#allocation61_spill]]  ;;  %s673_s28 = scalar_lea.sflag [#allocation14], %s654_s8 }
 0x206   : > { %s5852_s29 = sld [smem:[#allocation87_spill]] }
 0x20b   : > { %s674_s15 = sand.u32 1, %s5851_s12  }
 0x20c   : > { %s2522_s26 = sshll.u32 %s674_s15, 5  ;;  %p5853_p12 = scmp.ne.s32.totalorder %s5852_s29, 0 }
 0x20d   : > { %s4837_s18 = scalar_lea.vmem [#allocation13], %s2522_s26 }
 0x20e   : > { %3621 = dma.done.wait (%p5853_p12), %s673_s28, 512  }
 0x20f   : > { %3623 = vsyncadd (%p5853_p12), %s673_s28, 4294966784  ;;  %s5854_s21 = sld [smem:[#allocation60_spill]]  ;;  %s5855_s16 = sld [smem:[#allocation68_spill]] }
 0x215   : > { %s683_s0 = sand.u32 1, %s5854_s21   ;;  %p5856_p8 = scmp.ne.s32.totalorder %s5855_s16, 0 }
 0x216   : > { %s2523_s6 = sshll.u32 %s683_s0, 5 }
 0x217   : > { %s4844_s17 = scalar_lea.vmem [#allocation15], %s2523_s6 }
 0x218   : > { %3625 = dma.done.wait (%p5856_p8), %s673_s28, 512  }
 0x219   : > { %3627 = vsyncadd (%p5856_p8), %s673_s28, 4294966784  ;;  %s5857_s10 = sld [smem:[#allocation58_spill]]  ;;  %s5858_s20 = sld [smem:[#allocation89_spill]] }
 0x21a   : > { %s691_s7 = scalar_lea.sflag [#allocation17], %s654_s8 }
 0x21f   : > { %s692_s22 = sand.u32 1, %s5857_s10   ;;  %p5859_p2 = scmp.ne.s32.totalorder %s5858_s20, 0 }
 0x220   : > { %s2524_s2 = sshll.u32 %s692_s22, 5 }
 0x221   : > { %s4851_s9 = scalar_lea.vmem [#allocation16], %s2524_s2 }
 0x222   : > { %3629 = dma.done.wait (%p5859_p2), %s691_s7, 512  }
 0x223   : > { %3631 = vsyncadd (%p5859_p2), %s691_s7, 4294966784  ;;  %s5860_s13 = sld [smem:[#allocation56_spill]] }
 0x229   : > { %s701_s30 = sand.u32 1, %s5860_s13  }
 0x22a   : > { %s2525_s5 = sshll.u32 %s701_s30, 5 }
 0x22b   : > { %s4858_s14 = scalar_lea.vmem [#allocation18], %s2525_s5 }
 0x22c   : > { %3633 = dma.done.wait (%p4660_p3), %s691_s7, 512  }
 0x22d   : > { %3635 = vsyncadd (%p4660_p3), %s691_s7, 4294966784  ;;  %s5861_s12 = sld [smem:[#allocation54_spill]]  ;;  %p5862_p4 = scmp.ne.s32.totalorder %s5830_s27, 0 }
 0x233   : > { %s708_s8 = sand.u32 1, %s5861_s12  }
 0x234   : > { %s2526_s29 = sshll.u32 %s708_s8, 5  ;;  %s709_s15 = scalar_lea.sflag [#allocation20], %s708_s8 }
 0x235   : > { %s4865_s26 = scalar_lea.vmem [#allocation19], %s2526_s29 }
 0x236   : > { %3637 = dma.done.wait (%p5862_p4), %s709_s15, 512  }
 0x237   : > { %3639 = vsyncadd (%p5862_p4), %s709_s15, 4294966784 }
 0x238   : > { %717 = sfence }
 0x239   : > { %s5863_s28 = sld [smem:[#allocation53_spill]]  ;;  %s5864_s21 = sld [smem:[#allocation75_spill]]  ;;  %v2562_v0 = vld [vmem:[%s4815_s1] sm:$0xff]   ;;  %v2689_v1 = vld [vmem:[%s4815_s1 + $0x8] sm:$0xff]   ;;  %v2690_v2 = vld [vmem:[%s4815_s1 + $0x10] sm:$0xff]  }
 0x23a   : > { %v2563_v3 = vunpack.c.l.bf16 %v2562_v0  ;;  %v2564_v4 = vunpack.c.h.bf16 %v2562_v0  ;;  %v2567_v5 = vunpack.c.l.bf16 %v2689_v1  ;;  %v2568_v6 = vunpack.c.h.bf16 %v2689_v1  ;;  %v2691_v7 = vld [vmem:[%s4815_s1 + $0x18] sm:$0xff]   ;;  %v2578_v8 = vld [vmem:[%s4823_s3] sm:$0xff]   ;;  %v2692_v9 = vld [vmem:[%s4823_s3 + $0x8] sm:$0xff]  }
 0x23b   : > { %v2571_v10 = vunpack.c.l.bf16 %v2690_v2  ;;  %v2572_v11 = vunpack.c.h.bf16 %v2690_v2  ;;  %v2575_v12 = vunpack.c.l.bf16 %v2691_v7  ;;  %v2576_v13 = vunpack.c.h.bf16 %v2691_v7  ;;  %v2693_v14 = vld [vmem:[%s4823_s3 + $0x10] sm:$0xff]   ;;  %v2694_v15 = vld [vmem:[%s4823_s3 + $0x18] sm:$0xff]   ;;  %v4890_v16 = vld [vmem:[%s4830_s19] sm:$0xff]  }
 0x23c   : > { %v2579_v17 = vunpack.c.l.bf16 %v2578_v8  ;;  %v2580_v18 = vunpack.c.h.bf16 %v2578_v8  ;;  %v2583_v19 = vunpack.c.l.bf16 %v2692_v9  ;;  %v2584_v20 = vunpack.c.h.bf16 %v2692_v9  ;;  %v2695_v21 = vld [vmem:[%s4830_s19 + $0x8] sm:$0xff]   ;;  %v2696_v22 = vld [vmem:[%s4830_s19 + $0x10] sm:$0xff]   ;;  %v2697_v23 = vld [vmem:[%s4830_s19 + $0x18] sm:$0xff]  }
 0x23d   : > { %v2587_v24 = vunpack.c.l.bf16 %v2693_v14  ;;  %v2588_v25 = vunpack.c.h.bf16 %v2693_v14  ;;  %v2591_v26 = vunpack.c.l.bf16 %v2694_v15  ;;  %v2592_v27 = vunpack.c.h.bf16 %v2694_v15  ;;  %v4898_v28 = vld [vmem:[%s4837_s18] sm:$0xff]   ;;  %v4901_v29 = vld [vmem:[%s4837_s18 + $0x8] sm:$0xff]   ;;  %v2699_v42 = vld [vmem:[%s4837_s18 + $0x10] sm:$0xff]  }
 0x23e   : > { %v2595_v30 = vunpack.c.l.bf16 %v4890_v16  ;;  %v2596_v31 = vunpack.c.h.bf16 %v4890_v16  ;;  %v2599_v32 = vunpack.c.l.bf16 %v2695_v21  ;;  %v2600_v33 = vunpack.c.h.bf16 %v2695_v21  ;;  %v2700_v15 = vld [vmem:[%s4837_s18 + $0x18] sm:$0xff]  }
 0x23f   : > { %s4872_s23 = sand.u32 1, %s5863_s28   ;;  %s4875_s16 = sshll.u32 %s5864_s21, 3  ;;  %v2603_v34 = vunpack.c.l.bf16 %v2696_v22  ;;  %v2604_v35 = vunpack.c.h.bf16 %v2696_v22  ;;  %v2607_v36 = vunpack.c.l.bf16 %v2697_v23  ;;  %v2608_v37 = vunpack.c.h.bf16 %v2697_v23 }
 0x240   : > { %5865 = sst [smem:[#allocation96_spill]] %s4872_s23  ;;  %s2527_s27 = sshll.u32 %s4872_s23, 3  ;;  %v2611_v39 = vunpack.c.l.bf16 %v4898_v28  ;;  %v2612_v40 = vunpack.c.h.bf16 %v4898_v28  ;;  %v2615_v41 = vunpack.c.l.bf16 %v4901_v29  ;;  %v2616_v53 = vunpack.c.h.bf16 %v4901_v29 }
 0x241   : > { %s4883_s0 = sld [smem:[#allocation5 + %s4875_s16]]  ;;  %s856_s1 = sadd.s32 1, %s4875_s16  ;;  %v2619_v54 = vunpack.c.l.bf16 %v2699_v42 }
 0x242   : > { %s891_s6 = sadd.s32 2, %s4875_s16  ;;  %s857_s10 = sld [smem:[#allocation5 + %s856_s1]] }
 0x243   : > { %s892_s3 = sld [smem:[#allocation5 + %s891_s6]]  ;;  %s926_s19 = sadd.s32 3, %s4875_s16 }
 0x244   : > { %s4912_s20 = sld [smem:[#allocation5 + %s926_s19]]  ;;  %s961_s22 = sadd.s32 4, %s4875_s16 }
 0x245   : > { %s4916_s2 = sld [smem:[#allocation5 + %s961_s22]]  ;;  %s996_s18 = sadd.s32 5, %s4875_s16 }
 0x246   : > { %s4926_s7 = sld [smem:[#allocation5 + %s996_s18]]  ;;  %s4950_s5 = scalar_lea.vmem [#allocation21], %s2527_s27 }
 0x247   : > { %v831_v38 = vstv %s4883_s0  ;;  %5866 = sst [smem:[#allocation97_spill]] %s4950_s5  ;;  %p2530_p3 = scmp.ne.s32.totalorder %s5864_s21, 0 }
 0x248   : > { %v832_v43 = vmul.f32 %v2563_v3, %v831_v38  ;;  %v833_v44 = vmul.f32 %v2564_v4, %v831_v38  ;;  %v834_v45 = vmul.f32 %v2567_v5, %v831_v38  ;;  %v835_v46 = vmul.f32 %v2568_v6, %v831_v38 }
 0x249   : > { %v836_v47 = vmul.f32 %v2571_v10, %v831_v38  ;;  %v837_v48 = vmul.f32 %v2572_v11, %v831_v38  ;;  %v838_v49 = vmul.f32 %v2575_v12, %v831_v38  ;;  %v839_v50 = vmul.f32 %v2576_v13, %v831_v38 }
 0x24a   : > { %v858_v51 = vstv %s857_s10  ;;  %v893_v52 = vstv %s892_s3 }
 0x24b   : > { %v859_v55 = vmul.f32 %v2579_v17, %v858_v51  ;;  %v860_v56 = vmul.f32 %v2580_v18, %v858_v51  ;;  %v861_v57 = vmul.f32 %v2583_v19, %v858_v51  ;;  %v862_v58 = vmul.f32 %v2584_v20, %v858_v51 }
 0x24c   : > { %v863_v59 = vmul.f32 %v2587_v24, %v858_v51  ;;  %v864_v60 = vmul.f32 %v2588_v25, %v858_v51  ;;  %v865_v61 = vmul.f32 %v2591_v26, %v858_v51  ;;  %v866_v62 = vmul.f32 %v2592_v27, %v858_v51 }
 0x24d   : > { %v867_v63 = vadd.f32 %v859_v55, %v832_v43  ;;  %v868_v0 = vadd.f32 %v860_v56, %v833_v44  ;;  %v869_v1 = vadd.f32 %v861_v57, %v834_v45  ;;  %v870_v2 = vadd.f32 %v862_v58, %v835_v46  ;;  %v2702_v45 = vld [vmem:[%s4844_s17 + $0x10] sm:$0xff]   ;;  %v2703_v46 = vld [vmem:[%s4844_s17 + $0x18] sm:$0xff]  }
 0x24e   : > { %v871_v3 = vadd.f32 %v863_v59, %v836_v47  ;;  %v872_v4 = vadd.f32 %v864_v60, %v837_v48  ;;  %v873_v5 = vadd.f32 %v865_v61, %v838_v49  ;;  %v874_v6 = vadd.f32 %v866_v62, %v839_v50  ;;  %v2642_v48 = vld [vmem:[%s4851_s9] sm:$0xff]   ;;  %v2704_v49 = vld [vmem:[%s4851_s9 + $0x8] sm:$0xff]  }
 0x24f   : > { %v894_v7 = vmul.f32 %v2595_v30, %v893_v52  ;;  %v895_v8 = vmul.f32 %v2596_v31, %v893_v52  ;;  %v896_v9 = vmul.f32 %v2599_v32, %v893_v52  ;;  %v897_v10 = vmul.f32 %v2600_v33, %v893_v52 }
 0x250   : > { %v898_v11 = vmul.f32 %v2603_v34, %v893_v52  ;;  %v899_v12 = vmul.f32 %v2604_v35, %v893_v52  ;;  %v900_v13 = vmul.f32 %v2607_v36, %v893_v52  ;;  %v901_v14 = vmul.f32 %v2608_v37, %v893_v52  ;;  %v2626_v36 = vld [vmem:[%s4844_s17] sm:$0xff]   ;;  %v2701_v37 = vld [vmem:[%s4844_s17 + $0x8] sm:$0xff]   ;;  %s1031_s17 = sadd.s32 6, %s4875_s16 }
 0x251   : > { %v902_v16 = vadd.f32 %v894_v7, %v867_v63  ;;  %v903_v17 = vadd.f32 %v895_v8, %v868_v0  ;;  %v904_v18 = vadd.f32 %v896_v9, %v869_v1  ;;  %v905_v19 = vadd.f32 %v897_v10, %v870_v2  ;;  %v2706_v7 = vld [vmem:[%s4851_s9 + $0x18] sm:$0xff]   ;;  %s4933_s13 = sld [smem:[#allocation5 + %s1031_s17]] }
 0x252   : > { %v906_v20 = vadd.f32 %v898_v11, %v871_v3  ;;  %v907_v21 = vadd.f32 %v899_v12, %v872_v4  ;;  %v908_v22 = vadd.f32 %v900_v13, %v873_v5  ;;  %v909_v23 = vadd.f32 %v901_v14, %v874_v6  ;;  %v2705_v6 = vld [vmem:[%s4851_s9 + $0x10] sm:$0xff]   ;;  %v2658_v12 = vld [vmem:[%s4858_s14] sm:$0xff]   ;;  %s1066_s9 = sadd.s32 7, %s4875_s16 }
 0x253   : > { %v2620_v24 = vunpack.c.h.bf16 %v2699_v42  ;;  %v2623_v25 = vunpack.c.l.bf16 %v2700_v15  ;;  %v2624_v26 = vunpack.c.h.bf16 %v2700_v15  ;;  %v928_v27 = vstv %s4912_s20  ;;  %s4941_s30 = sld [smem:[#allocation5 + %s1066_s9]] }
 0x254   : > { %v929_v28 = vmul.f32 %v2611_v39, %v928_v27  ;;  %v930_v29 = vmul.f32 %v2612_v40, %v928_v27  ;;  %v931_v30 = vmul.f32 %v2615_v41, %v928_v27  ;;  %v932_v31 = vmul.f32 %v2616_v53, %v928_v27 }
 0x255   : > { %v933_v32 = vmul.f32 %v2619_v54, %v928_v27  ;;  %v934_v33 = vmul.f32 %v2620_v24, %v928_v27  ;;  %v935_v34 = vmul.f32 %v2623_v25, %v928_v27  ;;  %v936_v35 = vmul.f32 %v2624_v26, %v928_v27 }
 0x256   : > { %v937_v38 = vadd.f32 %v929_v28, %v902_v16  ;;  %v938_v42 = vadd.f32 %v930_v29, %v903_v17  ;;  %v939_v43 = vadd.f32 %v931_v30, %v904_v18  ;;  %v940_v44 = vadd.f32 %v932_v31, %v905_v19 }
 0x257   : > { %v941_v39 = vadd.f32 %v933_v32, %v906_v20  ;;  %v942_v40 = vadd.f32 %v934_v33, %v907_v21  ;;  %v943_v41 = vadd.f32 %v935_v34, %v908_v22  ;;  %v944_v47 = vadd.f32 %v936_v35, %v909_v23  ;;  %v2707_v33 = vld [vmem:[%s4858_s14 + $0x8] sm:$0xff]   ;;  %v2708_v34 = vld [vmem:[%s4858_s14 + $0x10] sm:$0xff]  }
 0x258   : > { %v2627_v50 = vunpack.c.l.bf16 %v2626_v36  ;;  %v2628_v51 = vunpack.c.h.bf16 %v2626_v36  ;;  %v2631_v52 = vunpack.c.l.bf16 %v2701_v37  ;;  %v2632_v53 = vunpack.c.h.bf16 %v2701_v37 }
 0x259   : > { %v2635_v54 = vunpack.c.l.bf16 %v2702_v45  ;;  %v2636_v55 = vunpack.c.h.bf16 %v2702_v45  ;;  %v2639_v56 = vunpack.c.l.bf16 %v2703_v46  ;;  %v2640_v57 = vunpack.c.h.bf16 %v2703_v46 }
 0x25a   : > { %v963_v58 = vstv %s4916_s2  ;;  %v2643_v59 = vunpack.c.l.bf16 %v2642_v48  ;;  %v2644_v60 = vunpack.c.h.bf16 %v2642_v48  ;;  %v2647_v61 = vunpack.c.l.bf16 %v2704_v49 }
 0x25b   : > { %v964_v62 = vmul.f32 %v2627_v50, %v963_v58  ;;  %v965_v63 = vmul.f32 %v2628_v51, %v963_v58  ;;  %v966_v0 = vmul.f32 %v2631_v52, %v963_v58  ;;  %v967_v1 = vmul.f32 %v2632_v53, %v963_v58 }
 0x25c   : > { %v968_v2 = vmul.f32 %v2635_v54, %v963_v58  ;;  %v969_v3 = vmul.f32 %v2636_v55, %v963_v58  ;;  %v970_v4 = vmul.f32 %v2639_v56, %v963_v58  ;;  %v971_v5 = vmul.f32 %v2640_v57, %v963_v58 }
 0x25d   : > { %v972_v8 = vadd.f32 %v964_v62, %v937_v38  ;;  %v973_v9 = vadd.f32 %v965_v63, %v938_v42  ;;  %v974_v10 = vadd.f32 %v966_v0, %v939_v43  ;;  %v975_v11 = vadd.f32 %v967_v1, %v940_v44  ;;  %v2709_v42 = vld [vmem:[%s4858_s14 + $0x18] sm:$0xff]   ;;  %v2674_v43 = vld [vmem:[%s4865_s26] sm:$0xff]   ;;  %v2711_v62 = vld [vmem:[%s4865_s26 + $0x10] sm:$0xff]   ;;  %s4954_s14 = scalar_lea.vmem [#allocation22], %s2527_s27 }
 0x25e   : > { %v976_v13 = vadd.f32 %v968_v2, %v941_v39  ;;  %v977_v14 = vadd.f32 %v969_v3, %v942_v40  ;;  %v978_v15 = vadd.f32 %v970_v4, %v943_v41  ;;  %v979_v16 = vadd.f32 %v971_v5, %v944_v47  ;;  %v2712_v3 = vld [vmem:[%s4865_s26 + $0x18] sm:$0xff]   ;;  %5867 = sst [smem:[#allocation98_spill]] %s4954_s14 }
 0x25f   : > { %v2648_v17 = vunpack.c.h.bf16 %v2704_v49  ;;  %v2651_v18 = vunpack.c.l.bf16 %v2705_v6  ;;  %v2652_v19 = vunpack.c.h.bf16 %v2705_v6  ;;  %v2655_v20 = vunpack.c.l.bf16 %v2706_v7 }
 0x260   : > { %v2656_v21 = vunpack.c.h.bf16 %v2706_v7  ;;  %v998_v22 = vstv %s4926_s7  ;;  %v2659_v23 = vunpack.c.l.bf16 %v2658_v12  ;;  %v2660_v24 = vunpack.c.h.bf16 %v2658_v12 }
 0x261   : > { %v999_v25 = vmul.f32 %v2643_v59, %v998_v22  ;;  %v1000_v26 = vmul.f32 %v2644_v60, %v998_v22  ;;  %v1001_v27 = vmul.f32 %v2647_v61, %v998_v22  ;;  %v1002_v28 = vmul.f32 %v2648_v17, %v998_v22  ;;  %v2710_v61 = vld [vmem:[%s4865_s26 + $0x8] sm:$0xff]  }
 0x262   : > { %v1003_v29 = vmul.f32 %v2651_v18, %v998_v22  ;;  %v1004_v30 = vmul.f32 %v2652_v19, %v998_v22  ;;  %v1005_v31 = vmul.f32 %v2655_v20, %v998_v22  ;;  %v1006_v32 = vmul.f32 %v2656_v21, %v998_v22 }
 0x263   : > { %v1007_v35 = vadd.f32 %v999_v25, %v972_v8  ;;  %v1008_v36 = vadd.f32 %v1000_v26, %v973_v9  ;;  %v1009_v37 = vadd.f32 %v1001_v27, %v974_v10  ;;  %v1010_v38 = vadd.f32 %v1002_v28, %v975_v11 }
 0x264   : > { %v1011_v44 = vadd.f32 %v1003_v29, %v976_v13  ;;  %v1012_v45 = vadd.f32 %v1004_v30, %v977_v14  ;;  %v1013_v46 = vadd.f32 %v1005_v31, %v978_v15  ;;  %v1014_v39 = vadd.f32 %v1006_v32, %v979_v16 }
 0x265   : > { %v2663_v40 = vunpack.c.l.bf16 %v2707_v33  ;;  %v2664_v41 = vunpack.c.h.bf16 %v2707_v33  ;;  %v2667_v47 = vunpack.c.l.bf16 %v2708_v34  ;;  %v2668_v48 = vunpack.c.h.bf16 %v2708_v34 }
 0x266   : > { %v2671_v49 = vunpack.c.l.bf16 %v2709_v42  ;;  %v2672_v50 = vunpack.c.h.bf16 %v2709_v42  ;;  %v1033_v51 = vstv %s4933_s13  ;;  %v2675_v52 = vunpack.c.l.bf16 %v2674_v43 }
 0x267   : > { %v1034_v53 = vmul.f32 %v2659_v23, %v1033_v51  ;;  %v1035_v54 = vmul.f32 %v2660_v24, %v1033_v51  ;;  %v1036_v55 = vmul.f32 %v2663_v40, %v1033_v51  ;;  %v1037_v56 = vmul.f32 %v2664_v41, %v1033_v51 }
 0x268   : > { %v1038_v57 = vmul.f32 %v2667_v47, %v1033_v51  ;;  %v1039_v58 = vmul.f32 %v2668_v48, %v1033_v51  ;;  %v1040_v59 = vmul.f32 %v2671_v49, %v1033_v51  ;;  %v1041_v60 = vmul.f32 %v2672_v50, %v1033_v51 }
 0x269   : > { %v1042_v63 = vadd.f32 %v1034_v53, %v1007_v35  ;;  %v1043_v0 = vadd.f32 %v1035_v54, %v1008_v36  ;;  %v1044_v1 = vadd.f32 %v1036_v55, %v1009_v37  ;;  %v1045_v2 = vadd.f32 %v1037_v56, %v1010_v38 }
 0x26a   : > { %v1046_v4 = vadd.f32 %v1038_v57, %v1011_v44  ;;  %v1047_v5 = vadd.f32 %v1039_v58, %v1012_v45  ;;  %v1048_v6 = vadd.f32 %v1040_v59, %v1013_v46  ;;  %v1049_v7 = vadd.f32 %v1041_v60, %v1014_v39  ;;  %1088 = sbr.rel (%p2530_p3) target bundleno = 629 (0x275), region = 96 }
 0x26b   : > { %v2676_v8 = vunpack.c.h.bf16 %v2674_v43  ;;  %v2679_v9 = vunpack.c.l.bf16 %v2710_v61  ;;  %v2680_v10 = vunpack.c.h.bf16 %v2710_v61  ;;  %v2683_v11 = vunpack.c.l.bf16 %v2711_v62 }
 0x26c   : > { %v2684_v12 = vunpack.c.h.bf16 %v2711_v62  ;;  %v2687_v13 = vunpack.c.l.bf16 %v2712_v3  ;;  %v2688_v14 = vunpack.c.h.bf16 %v2712_v3  ;;  %v1068_v15 = vstv %s4941_s30 }
 0x26d   : > { %v1069_v16 = vmul.f32 %v2675_v52, %v1068_v15  ;;  %v1070_v17 = vmul.f32 %v2676_v8, %v1068_v15  ;;  %v1071_v18 = vmul.f32 %v2679_v9, %v1068_v15  ;;  %v1072_v19 = vmul.f32 %v2680_v10, %v1068_v15 }
 0x26e   : > { %v1073_v20 = vmul.f32 %v2683_v11, %v1068_v15  ;;  %v1074_v21 = vmul.f32 %v2684_v12, %v1068_v15  ;;  %v1075_v22 = vmul.f32 %v2687_v13, %v1068_v15  ;;  %v1076_v23 = vmul.f32 %v2688_v14, %v1068_v15 }
 0x26f   : > { %v1077_v24 = vadd.f32 %v1069_v16, %v1042_v63  ;;  %v1078_v25 = vadd.f32 %v1070_v17, %v1043_v0  ;;  %v1079_v26 = vadd.f32 %v1071_v18, %v1044_v1  ;;  %v1080_v27 = vadd.f32 %v1072_v19, %v1045_v2 }
 0x270   : > { %v1081_v28 = vadd.f32 %v1073_v20, %v1046_v4  ;;  %v1082_v29 = vadd.f32 %v1074_v21, %v1047_v5  ;;  %v1083_v30 = vadd.f32 %v1075_v22, %v1048_v6  ;;  %v1084_v31 = vadd.f32 %v1076_v23, %v1049_v7 }
 0x271   : > { %1089 = vst [vmem:[#allocation2] sm:$0xff] %v1077_v24  ;;  %1090 = vst [vmem:[#allocation2 + $0x8] sm:$0xff] %v1078_v25 }
 0x272   : > { %1091 = vst [vmem:[#allocation2 + $0x10] sm:$0xff] %v1079_v26  ;;  %1092 = vst [vmem:[#allocation2 + $0x18] sm:$0xff] %v1080_v27 }
 0x273   : > { %1093 = vst [vmem:[#allocation2 + $0x20] sm:$0xff] %v1081_v28  ;;  %1094 = vst [vmem:[#allocation2 + $0x28] sm:$0xff] %v1082_v29 }
 0x274   : > { %1095 = vst [vmem:[#allocation2 + $0x30] sm:$0xff] %v1083_v30  ;;  %1096 = vst [vmem:[#allocation2 + $0x38] sm:$0xff] %v1084_v31 }
 0x275 PF: > { %s5868_s12 = sld [smem:[#allocation75_spill]] }
 0x27b   : > { %p2531_p7 = scmp.eq.s32.totalorder %s5868_s12, 0 }
 0x27c   : > { %v1101_v32 = vld [vmem:[#allocation2] sm:$0xff] (!%p2531_p7)  ;;  %v1102_v33 = vld [vmem:[#allocation2 + $0x8] sm:$0xff] (!%p2531_p7)  ;;  %v1103_v34 = vld [vmem:[#allocation2 + $0x10] sm:$0xff] (!%p2531_p7) }
 0x27d   : > { %1100 = sbr.rel (%p2531_p7) target bundleno = 644 (0x284), region = 100  ;;  %v1109_v35 = vadd.f32 (!%p2531_p7), %v1101_v32, %v1077_v24  ;;  %v1110_v36 = vadd.f32 (!%p2531_p7), %v1102_v33, %v1078_v25  ;;  %v1111_v37 = vadd.f32 (!%p2531_p7), %v1103_v34, %v1079_v26  ;;  %v1104_v38 = vld [vmem:[#allocation2 + $0x18] sm:$0xff] (!%p2531_p7)  ;;  %v1105_v42 = vld [vmem:[#allocation2 + $0x20] sm:$0xff] (!%p2531_p7)  ;;  %v1106_v43 = vld [vmem:[#allocation2 + $0x28] sm:$0xff] (!%p2531_p7) }
 0x27e   : > { %v1112_v44 = vadd.f32 (!%p2531_p7), %v1104_v38, %v1080_v27  ;;  %v1113_v45 = vadd.f32 (!%p2531_p7), %v1105_v42, %v1081_v28  ;;  %v1114_v46 = vadd.f32 (!%p2531_p7), %v1106_v43, %v1082_v29  ;;  %v1107_v39 = vld [vmem:[#allocation2 + $0x30] sm:$0xff] (!%p2531_p7)  ;;  %v1108_v40 = vld [vmem:[#allocation2 + $0x38] sm:$0xff] (!%p2531_p7) }
 0x27f   : > { %1117 = vst [vmem:[#allocation2] sm:$0xff] (!%p2531_p7), %v1109_v35  ;;  %1118 = vst [vmem:[#allocation2 + $0x8] sm:$0xff] (!%p2531_p7), %v1110_v36  ;;  %v1115_v41 = vadd.f32 (!%p2531_p7), %v1107_v39, %v1083_v30  ;;  %v1116_v47 = vadd.f32 (!%p2531_p7), %v1108_v40, %v1084_v31 }
 0x280   : > { %1119 = vst [vmem:[#allocation2 + $0x10] sm:$0xff] (!%p2531_p7), %v1111_v37  ;;  %1120 = vst [vmem:[#allocation2 + $0x18] sm:$0xff] (!%p2531_p7), %v1112_v44 }
 0x281   : > { %1121 = vst [vmem:[#allocation2 + $0x20] sm:$0xff] (!%p2531_p7), %v1113_v45  ;;  %1122 = vst [vmem:[#allocation2 + $0x28] sm:$0xff] (!%p2531_p7), %v1114_v46 }
 0x282   : > { %1123 = vst [vmem:[#allocation2 + $0x30] sm:$0xff] (!%p2531_p7), %v1115_v41  ;;  %1124 = vst [vmem:[#allocation2 + $0x38] sm:$0xff] (!%p2531_p7), %v1116_v47 }
 0x284 PF: > { %s5869_s8 = sld [smem:[#allocation75_spill]] }
 0x28a   : > { %p2532_p5 = scmp.ne.s32.totalorder %s5869_s8, 1 }
 0x28c   : > { %1128 = sbr.rel (%p2532_p5) target bundleno = 11846 (0x2e46), region = 104 }
 0x293   : > { %s5870_s29 = sld [smem:[#allocation76_spill]] }
 0x299   : > { %s4960_s15 = sshll.u32 %s5870_s29, 13 }
 0x29a   : > { %s1130_s26 = ssub.s32 10000, %s4960_s15 }
 0x29b   : > { %p2534_p11 = scmp.ge.s32.totalorder %s1130_s26, 8192 }
 0x29c   : > { %v1135_v48 = vlaneseq (!%p2534_p11)  ;;  %v1162_v55 = vstv (!%p2534_p11), %s1130_s26  ;;  %v1171_v60 = vld [vmem:[#allocation2] sm:$0xff] (!%p2534_p11)  ;;  %v1172_v3 = vld [vmem:[#allocation2 + $0x8] sm:$0xff] (!%p2534_p11)  ;;  %v1173_v5 = vld [vmem:[#allocation2 + $0x10] sm:$0xff] (!%p2534_p11) }
 0x29d   : > { %1134 = sbr.rel (%p2534_p11) target bundleno = 686 (0x2ae), region = 108  ;;  %v1174_v9 = vld [vmem:[#allocation2 + $0x18] sm:$0xff] (!%p2534_p11)  ;;  %v1175_v11 = vld [vmem:[#allocation2 + $0x20] sm:$0xff] (!%p2534_p11)  ;;  %v1176_v14 = vld [vmem:[#allocation2 + $0x28] sm:$0xff] (!%p2534_p11) }
 0x29e   : > { %v1136_v49 = vshrl.u32 (!%p2534_p11), %v1135_v48, 7  ;;  %v1145_v50 = vand.u32 (!%p2534_p11), 127, %v1135_v48  ;;  %v1177_v21 = vld [vmem:[#allocation2 + $0x30] sm:$0xff] (!%p2534_p11)  ;;  %v1178_v24 = vld [vmem:[#allocation2 + $0x38] sm:$0xff] (!%p2534_p11) }
 0x2a0   : > { %v1146_v51 = vmul.u32 (!%p2534_p11), 128, %v1136_v49  ;;  %v1137_v52 = vadd.s32 (!%p2534_p11), 8, %v1136_v49  ;;  %v1138_v53 = vadd.s32 (!%p2534_p11), 16, %v1136_v49  ;;  %v1139_v54 = vadd.s32 (!%p2534_p11), 24, %v1136_v49 }
 0x2a1   : > { %v1140_v56 = vadd.s32 (!%p2534_p11), 32, %v1136_v49  ;;  %v1141_v57 = vadd.s32 (!%p2534_p11), 40, %v1136_v49  ;;  %v1142_v58 = vadd.s32 (!%p2534_p11), 48, %v1136_v49  ;;  %v1143_v63 = vadd.s32 (!%p2534_p11), 56, %v1136_v49 }
 0x2a2   : > { %v1154_v59 = vadd.s32 (!%p2534_p11), %v1146_v51, %v1145_v50  ;;  %v1147_v61 = vmul.u32 (!%p2534_p11), 128, %v1137_v52  ;;  %v1148_v62 = vmul.u32 (!%p2534_p11), 128, %v1138_v53 }
 0x2a3   : > { %v1149_v0 = vmul.u32 (!%p2534_p11), 128, %v1139_v54  ;;  %v1150_v1 = vmul.u32 (!%p2534_p11), 128, %v1140_v56 }
 0x2a4   : > { %vm1163_vm0 = vcmp.lt.s32.totalorder %v1154_v59, %v1162_v55  ;;  %v1155_v2 = vadd.s32 %v1147_v61, %v1145_v50  ;;  %v1156_v4 = vadd.s32 %v1148_v62, %v1145_v50  ;;  %v1151_v6 = vmul.u32 128, %v1141_v57 }
 0x2a5   : > { %v1179_v7 = vsel %vm1163_vm0, %v1171_v60, -inf  ;;  %v1157_v8 = vadd.s32 %v1149_v0, %v1145_v50  ;;  %v1158_v10 = vadd.s32 %v1150_v1, %v1145_v50  ;;  %v1152_v12 = vmul.u32 128, %v1142_v58 }
 0x2a6   : > { %1187 = vst [vmem:[#allocation2] sm:$0xff] %v1179_v7  ;;  %vm1164_vm1 = vcmp.lt.s32.totalorder %v1155_v2, %v1162_v55  ;;  %vm1165_vm2 = vcmp.lt.s32.totalorder %v1156_v4, %v1162_v55  ;;  %v1159_v13 = vadd.s32 %v1151_v6, %v1145_v50  ;;  %v1153_v15 = vmul.u32 128, %v1143_v63 }
 0x2a7   : > { %v1180_v16 = vsel %vm1164_vm1, %v1172_v3, -inf  ;;  %v1181_v17 = vsel %vm1165_vm2, %v1173_v5, -inf  ;;  %vm1166_vm3 = vcmp.lt.s32.totalorder %v1157_v8, %v1162_v55  ;;  %vm1167_vm4 = vcmp.lt.s32.totalorder %v1158_v10, %v1162_v55 }
 0x2a8   : > { %1188 = vst [vmem:[#allocation2 + $0x8] sm:$0xff] %v1180_v16  ;;  %1189 = vst [vmem:[#allocation2 + $0x10] sm:$0xff] %v1181_v17  ;;  %v1182_v18 = vsel %vm1166_vm3, %v1174_v9, -inf  ;;  %v1183_v19 = vsel %vm1167_vm4, %v1175_v11, -inf  ;;  %vm1168_vm5 = vcmp.lt.s32.totalorder %v1159_v13, %v1162_v55  ;;  %v1160_v20 = vadd.s32 %v1152_v12, %v1145_v50 }
 0x2a9   : > { %1190 = vst [vmem:[#allocation2 + $0x18] sm:$0xff] %v1182_v18  ;;  %1191 = vst [vmem:[#allocation2 + $0x20] sm:$0xff] %v1183_v19  ;;  %v1184_v22 = vsel %vm1168_vm5, %v1176_v14, -inf  ;;  %v1161_v23 = vadd.s32 %v1153_v15, %v1145_v50 }
 0x2aa   : > { %1192 = vst [vmem:[#allocation2 + $0x28] sm:$0xff] %v1184_v22  ;;  %vm1169_vm6 = vcmp.lt.s32.totalorder %v1160_v20, %v1162_v55 }
 0x2ab   : > { %v1185_v25 = vsel %vm1169_vm6, %v1177_v21, -inf  ;;  %vm1170_vm7 = vcmp.lt.s32.totalorder %v1161_v23, %v1162_v55 }
 0x2ac   : > { %1193 = vst [vmem:[#allocation2 + $0x30] sm:$0xff] %v1185_v25  ;;  %v1186_v26 = vsel %vm1170_vm7, %v1178_v24, -inf }
 0x2ad   : > { %1194 = vst [vmem:[#allocation2 + $0x38] sm:$0xff] %v1186_v26 }
 0x2ae PF: > { %v1195_v29 = vld [vmem:[#allocation2] sm:$0xff]  ;;  %v1203_v3 = vlaneseq  ;;  %vm1264_vm12 = vcmask 31744  }
 0x2af   : > { %v1196_v31 = vld [vmem:[#allocation2 + $0x8] sm:$0xff]  ;;  %v1197_v35 = vld [vmem:[#allocation2 + $0x10] sm:$0xff] }
 0x2b0   : > { %v1199_v27 = vld [vmem:[#allocation2 + $0x20] sm:$0xff]  ;;  %v1205_v34 = vmax.f32 %v1195_v29, %v1196_v31  ;;  %v1198_v36 = vld [vmem:[#allocation2 + $0x18] sm:$0xff]  ;;  %v4963_v4 = vand.u32 127, %v1203_v3  ;;  %v1258_v29 = vshrl.u32 %v1203_v3, 7 }
 0x2b1   : > { %v1200_v28 = vld [vmem:[#allocation2 + $0x28] sm:$0xff]  ;;  %v1218_v38 = vmax.f32 %v1197_v35, %v1198_v36 }
 0x2b2   : > { %v1231_v30 = vmax.f32 %v1199_v27, %v1200_v28  ;;  %1206 = vmax.xlane.f32.xlu0 %v1205_v34  ;;  %vm1215_vm8 = vcmp.eq.s32.totalorder %v4963_v4, 0  ;;  %vm1228_vm9 = vcmp.eq.s32.totalorder %v4963_v4, 1  ;;  %vm1241_vm10 = vcmp.eq.s32.totalorder %v4963_v4, 2 }
 0x2b3   : > { %v1201_v32 = vld [vmem:[#allocation2 + $0x30] sm:$0xff]  ;;  %vm1254_vm11 = vcmp.eq.s32.totalorder %v4963_v4, 3 }
 0x2b4   : > { %v1202_v33 = vld [vmem:[#allocation2 + $0x38] sm:$0xff]  ;;  %1232 = vmax.xlane.f32.xlu1 %v1231_v30  ;;  %v1259_v30 = vadd.s32 8, %v1258_v29 }
 0x2b5   : > { %v1244_v37 = vmax.f32 %v1201_v32, %v1202_v33  ;;  %v1260_v32 = vmul.u32 128, %v1258_v29 }
 0x2b6   : > { %1219 = vmax.xlane.f32.xlu0 %v1218_v38  ;;  %v1261_v31 = vmul.u32 128, %v1259_v30 }
 0x2b7   : > { %v4990_v36 = vadd.s32 %v1260_v32, %v4963_v4 }
 0x2b8   : > { %1245 = vmax.xlane.f32.xlu1 %v1244_v37  ;;  %v4983_v33 = vadd.s32 %v1261_v31, %v4963_v4 }
 0x33f   : > { %v1207_v44 = vpop.xlane.xlu0 %1206 }
 0x340   : > { %v1208_v45 = vrot.slane %v1207_v44, 4 }
 0x341   : > { %v1233_v42 = vpop.xlane.xlu1 %1232 }
 0x342   : > { %v1234_v43 = vrot.slane %v1233_v42, 4  ;;  %v1209_v39 = vmax.f32 %v1207_v44, %v1208_v45 }
 0x343   : > { %v1220_v48 = vpop.xlane.xlu0 %1219 }
 0x344   : > { %v1235_v46 = vmax.f32 %v1233_v42, %v1234_v43  ;;  %v1210_v49 = vrot.slane %v1209_v39, 2  ;;  %v1221_v50 = vrot.slane %v1220_v48, 4 }
 0x345   : > { %v1246_v40 = vpop.xlane.xlu1 %1245 }
 0x346   : > { %v1236_v41 = vrot.slane %v1235_v46, 2  ;;  %v1247_v47 = vrot.slane %v1246_v40, 4  ;;  %v1222_v52 = vmax.f32 %v1220_v48, %v1221_v50  ;;  %v1211_v53 = vmax.f32 %v1209_v39, %v1210_v49 }
 0x348   : > { %v1248_v51 = vmax.f32 %v1246_v40, %v1247_v47  ;;  %v1237_v55 = vmax.f32 %v1235_v46, %v1236_v41  ;;  %v1223_v56 = vrot.slane %v1222_v52, 2  ;;  %v1212_v57 = vrot.slane %v1211_v53, 1 }
 0x34a   : > { %v1249_v54 = vrot.slane %v1248_v51, 2  ;;  %v1213_v59 = vmax.f32 %v1211_v53, %v1212_v57  ;;  %v1224_v60 = vmax.f32 %v1222_v52, %v1223_v56  ;;  %v1238_v61 = vrot.slane %v1237_v55, 1 }
 0x34c   : > { %v1250_v58 = vmax.f32 %v1248_v51, %v1249_v54  ;;  %2713 = vpush %v1213_v59  ;;  %v1225_v63 = vrot.slane %v1224_v60, 1  ;;  %v1239_v2 = vmax.f32 %v1237_v55, %v1238_v61 }
 0x34e   : > { %v1251_v62 = vrot.slane %v1250_v58, 1  ;;  %v1226_v0 = vmax.f32 %v1224_v60, %v1225_v63 }
 0x350   : > { %v1252_v1 = vmax.f32 %v1250_v58, %v1251_v62  ;;  %2715 = vpush %v1226_v0 }
 0x351   : > { %2717 = vpush %v1239_v2 }
 0x352   : > { %2719 = vpush %v1252_v1 }
 0x37d   : > { %s2714_s28 = spop %2713 }
 0x37e   : > { %v1216_v5 = vstv %s2714_s28 }
 0x37f   : > { %v1217_v6 = vsel %vm1215_vm8, %v1216_v5, -inf }
 0x381   : > { %s2716_s21 = spop %2715 }
 0x382   : > { %v1229_v7 = vstv %s2716_s21  ;;  %s2718_s16 = spop %2717 }
 0x383   : > { %v1230_v8 = vsel %vm1228_vm9, %v1229_v7, %v1217_v6  ;;  %v1242_v9 = vstv %s2718_s16  ;;  %s2720_s27 = spop %2719 }
 0x384   : > { %v1243_v10 = vsel %vm1241_vm10, %v1242_v9, %v1230_v8  ;;  %v1255_v11 = vstv %s2720_s27 }
 0x385   : > { %v4969_v12 = vsel %vm1254_vm11, %v1255_v11, %v1243_v10 }
 0x386   : > { %v1265_v13 = vsel %vm1264_vm12, %v4969_v12, -inf }
 0x387   : > { %1266 = vmax.xlane.f32.xlu0 %v1265_v13 }
 0x414   : > { %v1267_v14 = vpop.xlane.xlu0 %1266 }
 0x415   : > { %2721 = vpush %v1267_v14 }
 0x446   : > { %s2722_s0 = spop %2721 }
 0x447   : > { %v4973_v15 = vstv %s2722_s0 }
 0x448   : > { %vm1270_vm13 = vcmp.eq.f32.partialorder %v4969_v12, %v4973_v15 }
 0x449   : > { %v1271_v16 = vsel %vm1270_vm13, %v4963_v4, 4 }
 0x44a   : > { %v1272_v17 = vsel %vm1264_vm12, %v1271_v16, 2147483647 }
 0x44b   : > { %v1274_v18 = vshra.s32 %v1272_v17, 16  ;;  %v1273_v20 = vand.u32 65535, %v1272_v17 }
 0x44d   : > { %v1276_v19 = vcvt.s32.f32 %v1274_v18  ;;  %v1275_v22 = vcvt.s32.f32 %v1273_v20 }
 0x44f   : > { %1277 = vmin.xlane.f32.xlu1 %v1276_v19 }
 0x4dc   : > { %v1278_v21 = vpop.xlane.xlu1 %1277 }
 0x4dd   : > { %vm1279_vm14 = vcmp.eq.f32.partialorder %v1276_v19, %v1278_v21  ;;  %v1284_v24 = vcvt.f32.s32 %v1278_v21 }
 0x4de   : > { %v1280_v23 = vsel %vm1279_vm14, %v1275_v22, inf }
 0x4df   : > { %1281 = vmin.xlane.f32.xlu0 %v1280_v23  ;;  %v1285_v26 = vshll.u32 %v1284_v24, 16 }
 0x56c   : > { %v1282_v25 = vpop.xlane.xlu0 %1281 }
 0x56d   : > { %v1283_v27 = vcvt.f32.s32 %v1282_v25 }
 0x56f   : > { %v1286_v28 = vadd.s32 %v1285_v26, %v1283_v27 }
 0x571   : > { %2723 = vpush %v1286_v28 }
 0x5a2   : > { %s4979_s1 = spop %2723 }
 0x5a3   : > { %s2535_s6 = sshll.u32 %s4979_s1, 4  ;;  %v1336_v5 = vstv %s4979_s1 }
 0x5a4   : > { %s4985_s10 = scalar_lea.vmem [#allocation2], %s2535_s6  ;;  %vm1337_vm8 = vcmp.eq.s32.totalorder %v4963_v4, %v1336_v5 }
 0x5a5   : > { %v1290_v34 = vld [vmem:[%s4985_s10] sm:$0xff]  ;;  %v1291_v35 = vld [vmem:[%s4985_s10 + $0x8] sm:$0xff] }
 0x5a6   : > { %vm1292_vm15 = vcmp.eq.f32.partialorder %v1290_v34, %v4973_v15  ;;  %vm1293_vm0 = vcmp.eq.f32.partialorder %v1291_v35, %v4973_v15 }
 0x5a7   : > { %v1294_v37 = vsel %vm1292_vm15, %v4990_v36, 2048  ;;  %v1295_v38 = vsel %vm1293_vm0, %v4983_v33, 2048 }
 0x5a8   : > { %vm1296_vm1 = vcmp.lt.s32.totalorder %v1294_v37, %v1295_v38 }
 0x5a9   : > { %v1297_v42 = vsel %vm1296_vm1, %v1294_v37, %v1295_v38 }
 0x5aa   : > { %v1299_v43 = vshra.s32 %v1297_v42, 16  ;;  %v1298_v45 = vand.u32 65535, %v1297_v42 }
 0x5ac   : > { %v1301_v44 = vcvt.s32.f32 %v1299_v43  ;;  %v1300_v39 = vcvt.s32.f32 %v1298_v45 }
 0x5ae   : > { %1302 = vmin.xlane.f32.xlu1 %v1301_v44 }
 0x63b   : > { %v1303_v46 = vpop.xlane.xlu1 %1302 }
 0x63c   : > { %vm1304_vm2 = vcmp.eq.f32.partialorder %v1301_v44, %v1303_v46  ;;  %v1309_v41 = vcvt.f32.s32 %v1303_v46 }
 0x63d   : > { %v1305_v40 = vsel %vm1304_vm2, %v1300_v39, inf }
 0x63e   : > { %1306 = vmin.xlane.f32.xlu0 %v1305_v40  ;;  %v1310_v48 = vshll.u32 %v1309_v41, 16 }
 0x6cb   : > { %v1307_v47 = vpop.xlane.xlu0 %1306 }
 0x6cc   : > { %v1308_v49 = vcvt.f32.s32 %v1307_v47 }
 0x6ce   : > { %v1311_v50 = vadd.s32 %v1310_v48, %v1308_v49 }
 0x6d0   : > { %v1312_v51 = vrot.slane %v1311_v50, 4 }
 0x6d2   : > { %vm1313_vm3 = vcmp.lt.s32.totalorder %v1311_v50, %v1312_v51 }
 0x6d3   : > { %v1314_v52 = vsel %vm1313_vm3, %v1311_v50, %v1312_v51 }
 0x6d4   : > { %v1315_v53 = vrot.slane %v1314_v52, 2 }
 0x6d6   : > { %vm1316_vm4 = vcmp.lt.s32.totalorder %v1314_v52, %v1315_v53 }
 0x6d7   : > { %v1317_v54 = vsel %vm1316_vm4, %v1314_v52, %v1315_v53 }
 0x6d8   : > { %v1318_v55 = vrot.slane %v1317_v54, 1 }
 0x6da   : > { %vm1319_vm5 = vcmp.lt.s32.totalorder %v1317_v54, %v1318_v55 }
 0x6db   : > { %v1320_v56 = vsel %vm1319_vm5, %v1317_v54, %v1318_v55 }
 0x6dc   : > { %2725 = vpush %v1320_v56 }
 0x70d   : > { %s4996_s3 = spop %2725 }
 0x70e   : > { %v1329_v57 = vstv %s4996_s3 }
 0x70f   : > { %vm1330_vm6 = vcmp.eq.s32.totalorder %v4990_v36, %v1329_v57  ;;  %vm1331_vm7 = vcmp.eq.s32.totalorder %v4983_v33, %v1329_v57 }
 0x710   : > { %v1332_v58 = vsel %vm1330_vm6, -inf, %v1290_v34  ;;  %v1333_v59 = vsel %vm1331_vm7, -inf, %v1291_v35 }
 0x711   : > { %1335 = vst [vmem:[%s4985_s10 + $0x8] sm:$0xff] %v1333_v59  ;;  %v1338_v60 = vmax.f32 %v1332_v58, %v1333_v59  ;;  %1334 = vst [vmem:[%s4985_s10] sm:$0xff] %v1332_v58 }
 0x713   : > { %1339 = vmax.xlane.f32.xlu1 %v1338_v60 }
 0x7a0   : > { %v1340_v61 = vpop.xlane.xlu1 %1339 }
 0x7a1   : > { %v1341_v62 = vrot.slane %v1340_v61, 4 }
 0x7a3   : > { %v1342_v63 = vmax.f32 %v1340_v61, %v1341_v62 }
 0x7a5   : > { %v1343_v0 = vrot.slane %v1342_v63, 2 }
 0x7a7   : > { %v1344_v1 = vmax.f32 %v1342_v63, %v1343_v0 }
 0x7a9   : > { %v1345_v2 = vrot.slane %v1344_v1, 1 }
 0x7ab   : > { %v1346_v3 = vmax.f32 %v1344_v1, %v1345_v2 }
 0x7ad   : > { %2727 = vpush %v1346_v3 }
 0x7de   : > { %s2728_s19 = spop %2727 }
 0x7df   : > { %v1348_v6 = vstv %s2728_s19 }
 0x7e0   : > { %v5006_v7 = vsel %vm1337_vm8, %v1348_v6, %v4969_v12 }
 0x7e1   : > { %v1350_v8 = vsel %vm1264_vm12, %v5006_v7, -inf }
 0x7e2   : > { %1351 = vmax.xlane.f32.xlu0 %v1350_v8 }
 0x86f   : > { %v1352_v9 = vpop.xlane.xlu0 %1351 }
 0x870   : > { %2729 = vpush %v1352_v9 }
 0x8a1   : > { %s2730_s20 = spop %2729 }
 0x8a2   : > { %v5010_v10 = vstv %s2730_s20 }
 0x8a3   : > { %vm1355_vm9 = vcmp.eq.f32.partialorder %v5006_v7, %v5010_v10 }
 0x8a4   : > { %v1356_v11 = vsel %vm1355_vm9, %v4963_v4, 4 }
 0x8a5   : > { %v1357_v13 = vsel %vm1264_vm12, %v1356_v11, 2147483647 }
 0x8a6   : > { %v1359_v14 = vshra.s32 %v1357_v13, 16  ;;  %v1358_v12 = vand.u32 65535, %v1357_v13 }
 0x8a8   : > { %v1361_v16 = vcvt.s32.f32 %v1359_v14  ;;  %v1360_v18 = vcvt.s32.f32 %v1358_v12 }
 0x8aa   : > { %1362 = vmin.xlane.f32.xlu1 %v1361_v16 }
 0x937   : > { %v1363_v17 = vpop.xlane.xlu1 %1362 }
 0x938   : > { %vm1364_vm10 = vcmp.eq.f32.partialorder %v1361_v16, %v1363_v17  ;;  %v1369_v20 = vcvt.f32.s32 %v1363_v17 }
 0x939   : > { %v1365_v19 = vsel %vm1364_vm10, %v1360_v18, inf }
 0x93a   : > { %1366 = vmin.xlane.f32.xlu0 %v1365_v19  ;;  %v1370_v22 = vshll.u32 %v1369_v20, 16 }
 0x9c7   : > { %v1367_v21 = vpop.xlane.xlu0 %1366 }
 0x9c8   : > { %v1368_v23 = vcvt.f32.s32 %v1367_v21 }
 0x9ca   : > { %v1371_v24 = vadd.s32 %v1370_v22, %v1368_v23 }
 0x9cc   : > { %2731 = vpush %v1371_v24 }
 0x9fd   : > { %s5016_s22 = spop %2731 }
 0x9fe   : > { %s2537_s2 = sshll.u32 %s5016_s22, 4  ;;  %v1421_v60 = vstv %s5016_s22 }
 0x9ff   : > { %s5019_s18 = scalar_lea.vmem [#allocation2], %s2537_s2  ;;  %vm1422_vm5 = vcmp.eq.s32.totalorder %v4963_v4, %v1421_v60 }
 0xa00   : > { %v1375_v25 = vld [vmem:[%s5019_s18] sm:$0xff]  ;;  %v1376_v26 = vld [vmem:[%s5019_s18 + $0x8] sm:$0xff] }
 0xa01   : > { %vm1377_vm11 = vcmp.eq.f32.partialorder %v1375_v25, %v5010_v10  ;;  %vm1378_vm13 = vcmp.eq.f32.partialorder %v1376_v26, %v5010_v10 }
 0xa02   : > { %v1379_v27 = vsel %vm1377_vm11, %v4990_v36, 2048  ;;  %v1380_v28 = vsel %vm1378_vm13, %v4983_v33, 2048 }
 0xa03   : > { %vm1381_vm14 = vcmp.lt.s32.totalorder %v1379_v27, %v1380_v28 }
 0xa04   : > { %v1382_v29 = vsel %vm1381_vm14, %v1379_v27, %v1380_v28 }
 0xa05   : > { %v1384_v30 = vshra.s32 %v1382_v29, 16  ;;  %v1383_v32 = vand.u32 65535, %v1382_v29 }
 0xa07   : > { %v1386_v31 = vcvt.s32.f32 %v1384_v30  ;;  %v1385_v35 = vcvt.s32.f32 %v1383_v32 }
 0xa09   : > { %1387 = vmin.xlane.f32.xlu1 %v1386_v31 }
 0xa96   : > { %v1388_v34 = vpop.xlane.xlu1 %1387 }
 0xa97   : > { %vm1389_vm15 = vcmp.eq.f32.partialorder %v1386_v31, %v1388_v34  ;;  %v1394_v38 = vcvt.f32.s32 %v1388_v34 }
 0xa98   : > { %v1390_v37 = vsel %vm1389_vm15, %v1385_v35, inf }
 0xa99   : > { %1391 = vmin.xlane.f32.xlu0 %v1390_v37  ;;  %v1395_v43 = vshll.u32 %v1394_v38, 16 }
 0xb26   : > { %v1392_v42 = vpop.xlane.xlu0 %1391 }
 0xb27   : > { %v1393_v44 = vcvt.f32.s32 %v1392_v42 }
 0xb29   : > { %v1396_v45 = vadd.s32 %v1395_v43, %v1393_v44 }
 0xb2b   : > { %v1397_v46 = vrot.slane %v1396_v45, 4 }
 0xb2d   : > { %vm1398_vm0 = vcmp.lt.s32.totalorder %v1396_v45, %v1397_v46 }
 0xb2e   : > { %v1399_v39 = vsel %vm1398_vm0, %v1396_v45, %v1397_v46 }
 0xb2f   : > { %v1400_v40 = vrot.slane %v1399_v39, 2 }
 0xb31   : > { %vm1401_vm1 = vcmp.lt.s32.totalorder %v1399_v39, %v1400_v40 }
 0xb32   : > { %v1402_v41 = vsel %vm1401_vm1, %v1399_v39, %v1400_v40 }
 0xb33   : > { %v1403_v47 = vrot.slane %v1402_v41, 1 }
 0xb35   : > { %vm1404_vm2 = vcmp.lt.s32.totalorder %v1402_v41, %v1403_v47 }
 0xb36   : > { %v1405_v48 = vsel %vm1404_vm2, %v1402_v41, %v1403_v47 }
 0xb37   : > { %2733 = vpush %v1405_v48 }
 0xb68   : > { %s5027_s7 = spop %2733 }
 0xb69   : > { %v1414_v49 = vstv %s5027_s7 }
 0xb6a   : > { %vm1415_vm3 = vcmp.eq.s32.totalorder %v4990_v36, %v1414_v49  ;;  %vm1416_vm4 = vcmp.eq.s32.totalorder %v4983_v33, %v1414_v49 }
 0xb6b   : > { %v1417_v50 = vsel %vm1415_vm3, -inf, %v1375_v25  ;;  %v1418_v51 = vsel %vm1416_vm4, -inf, %v1376_v26 }
 0xb6c   : > { %v1423_v52 = vmax.f32 %v1417_v50, %v1418_v51  ;;  %1419 = vst [vmem:[%s5019_s18] sm:$0xff] %v1417_v50  ;;  %1420 = vst [vmem:[%s5019_s18 + $0x8] sm:$0xff] %v1418_v51 }
 0xb6e   : > { %1424 = vmax.xlane.f32.xlu1 %v1423_v52 }
 0xbfb   : > { %v1425_v53 = vpop.xlane.xlu1 %1424 }
 0xbfc   : > { %v1426_v54 = vrot.slane %v1425_v53, 4 }
 0xbfe   : > { %v1427_v55 = vmax.f32 %v1425_v53, %v1426_v54 }
 0xc00   : > { %v1428_v56 = vrot.slane %v1427_v55, 2 }
 0xc02   : > { %v1429_v57 = vmax.f32 %v1427_v55, %v1428_v56 }
 0xc04   : > { %v1430_v58 = vrot.slane %v1429_v57, 1 }
 0xc06   : > { %v1431_v59 = vmax.f32 %v1429_v57, %v1430_v58 }
 0xc08   : > { %2735 = vpush %v1431_v59 }
 0xc39   : > { %s2736_s17 = spop %2735 }
 0xc3a   : > { %v1433_v61 = vstv %s2736_s17 }
 0xc3b   : > { %v5037_v62 = vsel %vm1422_vm5, %v1433_v61, %v5006_v7 }
 0xc3c   : > { %v1435_v63 = vsel %vm1264_vm12, %v5037_v62, -inf }
 0xc3d   : > { %1436 = vmax.xlane.f32.xlu0 %v1435_v63 }
 0xcca   : > { %v1437_v0 = vpop.xlane.xlu0 %1436 }
 0xccb   : > { %2737 = vpush %v1437_v0 }
 0xcfc   : > { %s2738_s13 = spop %2737 }
 0xcfd   : > { %v5041_v1 = vstv %s2738_s13 }
 0xcfe   : > { %vm1440_vm6 = vcmp.eq.f32.partialorder %v5037_v62, %v5041_v1 }
 0xcff   : > { %v1441_v2 = vsel %vm1440_vm6, %v4963_v4, 4 }
 0xd00   : > { %v1442_v3 = vsel %vm1264_vm12, %v1441_v2, 2147483647 }
 0xd01   : > { %v1444_v5 = vshra.s32 %v1442_v3, 16  ;;  %v1443_v7 = vand.u32 65535, %v1442_v3 }
 0xd03   : > { %v1446_v6 = vcvt.s32.f32 %v1444_v5  ;;  %v1445_v9 = vcvt.s32.f32 %v1443_v7 }
 0xd05   : > { %1447 = vmin.xlane.f32.xlu1 %v1446_v6 }
 0xd92   : > { %v1448_v8 = vpop.xlane.xlu1 %1447 }
 0xd93   : > { %vm1449_vm7 = vcmp.eq.f32.partialorder %v1446_v6, %v1448_v8  ;;  %v1454_v13 = vcvt.f32.s32 %v1448_v8 }
 0xd94   : > { %v1450_v11 = vsel %vm1449_vm7, %v1445_v9, inf }
 0xd95   : > { %1451 = vmin.xlane.f32.xlu0 %v1450_v11  ;;  %v1455_v16 = vshll.u32 %v1454_v13, 16 }
 0xe22   : > { %v1452_v14 = vpop.xlane.xlu0 %1451 }
 0xe23   : > { %v1453_v12 = vcvt.f32.s32 %v1452_v14 }
 0xe25   : > { %v1456_v17 = vadd.s32 %v1455_v16, %v1453_v12 }
 0xe27   : > { %2739 = vpush %v1456_v17 }
 0xe58   : > { %s5047_s9 = spop %2739 }
 0xe59   : > { %s2539_s30 = sshll.u32 %s5047_s9, 4  ;;  %v1506_v53 = vstv %s5047_s9  ;;  %s2540_s4 = sshll.u32 %s5047_s9, 11 }
 0xe5a   : > { %s5050_s12 = scalar_lea.vmem [#allocation2], %s2539_s30  ;;  %vm1507_vm2 = vcmp.eq.s32.totalorder %v4963_v4, %v1506_v53 }
 0xe5b   : > { %v1460_v18 = vld [vmem:[%s5050_s12] sm:$0xff]  ;;  %v1461_v19 = vld [vmem:[%s5050_s12 + $0x8] sm:$0xff] }
 0xe5c   : > { %vm1462_vm8 = vcmp.eq.f32.partialorder %v1460_v18, %v5041_v1  ;;  %vm1463_vm9 = vcmp.eq.f32.partialorder %v1461_v19, %v5041_v1 }
 0xe5d   : > { %v1464_v20 = vsel %vm1462_vm8, %v4990_v36, 2048  ;;  %v1465_v21 = vsel %vm1463_vm9, %v4983_v33, 2048 }
 0xe5e   : > { %vm1466_vm10 = vcmp.lt.s32.totalorder %v1464_v20, %v1465_v21 }
 0xe5f   : > { %v1467_v22 = vsel %vm1466_vm10, %v1464_v20, %v1465_v21 }
 0xe60   : > { %v1469_v23 = vshra.s32 %v1467_v22, 16  ;;  %v1468_v25 = vand.u32 65535, %v1467_v22 }
 0xe62   : > { %v1471_v24 = vcvt.s32.f32 %v1469_v23  ;;  %v1470_v27 = vcvt.s32.f32 %v1468_v25 }
 0xe64   : > { %1472 = vmin.xlane.f32.xlu1 %v1471_v24 }
 0xef1   : > { %v1473_v26 = vpop.xlane.xlu1 %1472 }
 0xef2   : > { %vm1474_vm11 = vcmp.eq.f32.partialorder %v1471_v24, %v1473_v26  ;;  %v1479_v29 = vcvt.f32.s32 %v1473_v26 }
 0xef3   : > { %v1475_v28 = vsel %vm1474_vm11, %v1470_v27, inf }
 0xef4   : > { %1476 = vmin.xlane.f32.xlu0 %v1475_v28  ;;  %v1480_v31 = vshll.u32 %v1479_v29, 16 }
 0xf81   : > { %v1477_v30 = vpop.xlane.xlu0 %1476 }
 0xf82   : > { %v1478_v32 = vcvt.f32.s32 %v1477_v30 }
 0xf84   : > { %v1481_v34 = vadd.s32 %v1480_v31, %v1478_v32 }
 0xf86   : > { %v1482_v35 = vrot.slane %v1481_v34, 4 }
 0xf88   : > { %vm1483_vm13 = vcmp.lt.s32.totalorder %v1481_v34, %v1482_v35 }
 0xf89   : > { %v1484_v37 = vsel %vm1483_vm13, %v1481_v34, %v1482_v35 }
 0xf8a   : > { %v1485_v38 = vrot.slane %v1484_v37, 2 }
 0xf8c   : > { %vm1486_vm14 = vcmp.lt.s32.totalorder %v1484_v37, %v1485_v38 }
 0xf8d   : > { %v1487_v42 = vsel %vm1486_vm14, %v1484_v37, %v1485_v38 }
 0xf8e   : > { %v1488_v43 = vrot.slane %v1487_v42, 1 }
 0xf90   : > { %vm1489_vm15 = vcmp.lt.s32.totalorder %v1487_v42, %v1488_v43 }
 0xf91   : > { %v1490_v44 = vsel %vm1489_vm15, %v1487_v42, %v1488_v43 }
 0xf92   : > { %2741 = vpush %v1490_v44 }
 0xfc3   : > { %s5058_s8 = spop %2741 }
 0xfc4   : > { %v1499_v45 = vstv %s5058_s8 }
 0xfc5   : > { %vm1500_vm0 = vcmp.eq.s32.totalorder %v4990_v36, %v1499_v45  ;;  %vm1501_vm1 = vcmp.eq.s32.totalorder %v4983_v33, %v1499_v45 }
 0xfc6   : > { %v1502_v46 = vsel %vm1500_vm0, -inf, %v1460_v18  ;;  %v1503_v39 = vsel %vm1501_vm1, -inf, %v1461_v19 }
 0xfc7   : > { %v1508_v40 = vmax.f32 %v1502_v46, %v1503_v39  ;;  %1504 = vst [vmem:[%s5050_s12] sm:$0xff] %v1502_v46  ;;  %1505 = vst [vmem:[%s5050_s12 + $0x8] sm:$0xff] %v1503_v39 }
 0xfc9   : > { %1509 = vmax.xlane.f32.xlu1 %v1508_v40 }
0x1056   : > { %v1510_v41 = vpop.xlane.xlu1 %1509 }
0x1057   : > { %v1511_v47 = vrot.slane %v1510_v41, 4 }
0x1059   : > { %v1512_v48 = vmax.f32 %v1510_v41, %v1511_v47 }
0x105b   : > { %v1513_v49 = vrot.slane %v1512_v48, 2 }
0x105d   : > { %v1514_v50 = vmax.f32 %v1512_v48, %v1513_v49 }
0x105f   : > { %v1515_v51 = vrot.slane %v1514_v50, 1 }
0x1061   : > { %v1516_v52 = vmax.f32 %v1514_v50, %v1515_v51 }
0x1063   : > { %2743 = vpush %v1516_v52 }
0x1094   : > { %s2744_s29 = spop %2743 }
0x1095   : > { %v1518_v54 = vstv %s2744_s29 }
0x1096   : > { %v5068_v55 = vsel %vm1507_vm2, %v1518_v54, %v5037_v62 }
0x1097   : > { %v1520_v56 = vsel %vm1264_vm12, %v5068_v55, -inf }
0x1098   : > { %1521 = vmax.xlane.f32.xlu0 %v1520_v56 }
0x1125   : > { %v1522_v57 = vpop.xlane.xlu0 %1521 }
0x1126   : > { %2745 = vpush %v1522_v57 }
0x1157   : > { %s2746_s26 = spop %2745 }
0x1158   : > { %v5072_v58 = vstv %s2746_s26 }
0x1159   : > { %vm1525_vm3 = vcmp.eq.f32.partialorder %v5068_v55, %v5072_v58 }
0x115a   : > { %v1526_v59 = vsel %vm1525_vm3, %v4963_v4, 4 }
0x115b   : > { %v1527_v60 = vsel %vm1264_vm12, %v1526_v59, 2147483647 }
0x115c   : > { %v1529_v61 = vshra.s32 %v1527_v60, 16  ;;  %v1528_v62 = vand.u32 65535, %v1527_v60 }
0x115e   : > { %v1531_v63 = vcvt.s32.f32 %v1529_v61  ;;  %v1530_v2 = vcvt.s32.f32 %v1528_v62 }
0x1160   : > { %1532 = vmin.xlane.f32.xlu1 %v1531_v63 }
0x11ed   : > { %v1533_v0 = vpop.xlane.xlu1 %1532 }
0x11ee   : > { %vm1534_vm4 = vcmp.eq.f32.partialorder %v1531_v63, %v1533_v0  ;;  %v1539_v5 = vcvt.f32.s32 %v1533_v0 }
0x11ef   : > { %v1535_v3 = vsel %vm1534_vm4, %v1530_v2, inf }
0x11f0   : > { %1536 = vmin.xlane.f32.xlu0 %v1535_v3  ;;  %v1540_v7 = vshll.u32 %v1539_v5, 16 }
0x127d   : > { %v1537_v6 = vpop.xlane.xlu0 %1536 }
0x127e   : > { %v1538_v8 = vcvt.f32.s32 %v1537_v6 }
0x1280   : > { %v1541_v9 = vadd.s32 %v1540_v7, %v1538_v8 }
0x1282   : > { %2747 = vpush %v1541_v9 }
0x12b3   : > { %s5078_s28 = spop %2747 }
0x12b4   : > { %s2541_s21 = sshll.u32 %s5078_s28, 4  ;;  %v1591_v47 = vstv %s5078_s28  ;;  %s2542_s24 = sshll.u32 %s5078_s28, 11 }
0x12b5   : > { %s5081_s16 = scalar_lea.vmem [#allocation2], %s2541_s21  ;;  %vm1592_vm15 = vcmp.eq.s32.totalorder %v4963_v4, %v1591_v47 }
0x12b6   : > { %v1545_v11 = vld [vmem:[%s5081_s16] sm:$0xff]  ;;  %v1546_v13 = vld [vmem:[%s5081_s16 + $0x8] sm:$0xff] }
0x12b7   : > { %vm1547_vm5 = vcmp.eq.f32.partialorder %v1545_v11, %v5072_v58  ;;  %vm1548_vm6 = vcmp.eq.f32.partialorder %v1546_v13, %v5072_v58 }
0x12b8   : > { %v1549_v14 = vsel %vm1547_vm5, %v4990_v36, 2048  ;;  %v1550_v16 = vsel %vm1548_vm6, %v4983_v33, 2048 }
0x12b9   : > { %vm1551_vm7 = vcmp.lt.s32.totalorder %v1549_v14, %v1550_v16 }
0x12ba   : > { %v1552_v12 = vsel %vm1551_vm7, %v1549_v14, %v1550_v16 }
0x12bb   : > { %v1554_v17 = vshra.s32 %v1552_v12, 16  ;;  %v1553_v19 = vand.u32 65535, %v1552_v12 }
0x12bd   : > { %v1556_v18 = vcvt.s32.f32 %v1554_v17  ;;  %v1555_v21 = vcvt.s32.f32 %v1553_v19 }
0x12bf   : > { %1557 = vmin.xlane.f32.xlu1 %v1556_v18 }
0x134c   : > { %v1558_v20 = vpop.xlane.xlu1 %1557 }
0x134d   : > { %vm1559_vm8 = vcmp.eq.f32.partialorder %v1556_v18, %v1558_v20  ;;  %v1564_v23 = vcvt.f32.s32 %v1558_v20 }
0x134e   : > { %v1560_v22 = vsel %vm1559_vm8, %v1555_v21, inf }
0x134f   : > { %1561 = vmin.xlane.f32.xlu0 %v1560_v22  ;;  %v1565_v25 = vshll.u32 %v1564_v23, 16 }
0x13dc   : > { %v1562_v24 = vpop.xlane.xlu0 %1561 }
0x13dd   : > { %v1563_v26 = vcvt.f32.s32 %v1562_v24 }
0x13df   : > { %v1566_v27 = vadd.s32 %v1565_v25, %v1563_v26 }
0x13e1   : > { %v1567_v28 = vrot.slane %v1566_v27, 4 }
0x13e3   : > { %vm1568_vm9 = vcmp.lt.s32.totalorder %v1566_v27, %v1567_v28 }
0x13e4   : > { %v1569_v29 = vsel %vm1568_vm9, %v1566_v27, %v1567_v28 }
0x13e5   : > { %v1570_v30 = vrot.slane %v1569_v29, 2 }
0x13e7   : > { %vm1571_vm10 = vcmp.lt.s32.totalorder %v1569_v29, %v1570_v30 }
0x13e8   : > { %v1572_v31 = vsel %vm1571_vm10, %v1569_v29, %v1570_v30 }
0x13e9   : > { %v1573_v32 = vrot.slane %v1572_v31, 1 }
0x13eb   : > { %vm1574_vm11 = vcmp.lt.s32.totalorder %v1572_v31, %v1573_v32 }
0x13ec   : > { %v1575_v34 = vsel %vm1574_vm11, %v1572_v31, %v1573_v32 }
0x13ed   : > { %2749 = vpush %v1575_v34 }
0x141e   : > { %s5089_s27 = spop %2749 }
0x141f   : > { %v1584_v35 = vstv %s5089_s27 }
0x1420   : > { %vm1585_vm13 = vcmp.eq.s32.totalorder %v4990_v36, %v1584_v35  ;;  %vm1586_vm14 = vcmp.eq.s32.totalorder %v4983_v33, %v1584_v35 }
0x1421   : > { %v1587_v37 = vsel %vm1585_vm13, -inf, %v1545_v11  ;;  %v1588_v38 = vsel %vm1586_vm14, -inf, %v1546_v13 }
0x1422   : > { %v1593_v42 = vmax.f32 %v1587_v37, %v1588_v38  ;;  %1589 = vst [vmem:[%s5081_s16] sm:$0xff] %v1587_v37  ;;  %1590 = vst [vmem:[%s5081_s16 + $0x8] sm:$0xff] %v1588_v38 }
0x1424   : > { %1594 = vmax.xlane.f32.xlu1 %v1593_v42 }
0x14b1   : > { %v1595_v43 = vpop.xlane.xlu1 %1594 }
0x14b2   : > { %v1596_v44 = vrot.slane %v1595_v43, 4 }
0x14b4   : > { %v1597_v45 = vmax.f32 %v1595_v43, %v1596_v44 }
0x14b6   : > { %v1598_v46 = vrot.slane %v1597_v45, 2 }
0x14b8   : > { %v1599_v39 = vmax.f32 %v1597_v45, %v1598_v46 }
0x14ba   : > { %v1600_v40 = vrot.slane %v1599_v39, 1 }
0x14bc   : > { %v1601_v41 = vmax.f32 %v1599_v39, %v1600_v40 }
0x14be   : > { %2751 = vpush %v1601_v41 }
0x14ef   : > { %s2752_s0 = spop %2751 }
0x14f0   : > { %v1603_v48 = vstv %s2752_s0 }
0x14f1   : > { %v5099_v49 = vsel %vm1592_vm15, %v1603_v48, %v5068_v55 }
0x14f2   : > { %v1605_v50 = vsel %vm1264_vm12, %v5099_v49, -inf }
0x14f3   : > { %1606 = vmax.xlane.f32.xlu0 %v1605_v50 }
0x1580   : > { %v1607_v51 = vpop.xlane.xlu0 %1606 }
0x1581   : > { %2753 = vpush %v1607_v51 }
0x15b2   : > { %s2754_s6 = spop %2753 }
0x15b3   : > { %v5103_v52 = vstv %s2754_s6 }
0x15b4   : > { %vm1610_vm0 = vcmp.eq.f32.partialorder %v5099_v49, %v5103_v52 }
0x15b5   : > { %v1611_v53 = vsel %vm1610_vm0, %v4963_v4, 4 }
0x15b6   : > { %v1612_v54 = vsel %vm1264_vm12, %v1611_v53, 2147483647 }
0x15b7   : > { %v1614_v56 = vshra.s32 %v1612_v54, 16  ;;  %v1613_v55 = vand.u32 65535, %v1612_v54 }
0x15b9   : > { %v1616_v57 = vcvt.s32.f32 %v1614_v56  ;;  %v1615_v60 = vcvt.s32.f32 %v1613_v55 }
0x15bb   : > { %1617 = vmin.xlane.f32.xlu1 %v1616_v57 }
0x1648   : > { %v1618_v59 = vpop.xlane.xlu1 %1617 }
0x1649   : > { %vm1619_vm1 = vcmp.eq.f32.partialorder %v1616_v57, %v1618_v59  ;;  %v1624_v63 = vcvt.f32.s32 %v1618_v59 }
0x164a   : > { %v1620_v61 = vsel %vm1619_vm1, %v1615_v60, inf }
0x164b   : > { %1621 = vmin.xlane.f32.xlu0 %v1620_v61  ;;  %v1625_v0 = vshll.u32 %v1624_v63, 16 }
0x16d8   : > { %v1622_v62 = vpop.xlane.xlu0 %1621 }
0x16d9   : > { %v1623_v2 = vcvt.f32.s32 %v1622_v62 }
0x16db   : > { %v1626_v3 = vadd.s32 %v1625_v0, %v1623_v2 }
0x16dd   : > { %2755 = vpush %v1626_v3 }
0x170e   : > { %s5109_s10 = spop %2755 }
0x170f   : > { %s2543_s19 = sshll.u32 %s5109_s10, 4  ;;  %v1676_v45 = vstv %s5109_s10  ;;  %s2544_s14 = sshll.u32 %s5109_s10, 11 }
0x1710   : > { %s5112_s20 = scalar_lea.vmem [#allocation2], %s2543_s19  ;;  %vm1677_vm11 = vcmp.eq.s32.totalorder %v4963_v4, %v1676_v45 }
0x1711   : > { %v1630_v5 = vld [vmem:[%s5112_s20] sm:$0xff]  ;;  %v1631_v6 = vld [vmem:[%s5112_s20 + $0x8] sm:$0xff] }
0x1712   : > { %vm1632_vm2 = vcmp.eq.f32.partialorder %v1630_v5, %v5103_v52  ;;  %vm1633_vm3 = vcmp.eq.f32.partialorder %v1631_v6, %v5103_v52 }
0x1713   : > { %v1634_v7 = vsel %vm1632_vm2, %v4990_v36, 2048  ;;  %v1635_v8 = vsel %vm1633_vm3, %v4983_v33, 2048 }
0x1714   : > { %vm1636_vm4 = vcmp.lt.s32.totalorder %v1634_v7, %v1635_v8 }
0x1715   : > { %v1637_v9 = vsel %vm1636_vm4, %v1634_v7, %v1635_v8 }
0x1716   : > { %v1639_v11 = vshra.s32 %v1637_v9, 16  ;;  %v1638_v14 = vand.u32 65535, %v1637_v9 }
0x1718   : > { %v1641_v13 = vcvt.s32.f32 %v1639_v11  ;;  %v1640_v12 = vcvt.s32.f32 %v1638_v14 }
0x171a   : > { %1642 = vmin.xlane.f32.xlu1 %v1641_v13 }
0x17a7   : > { %v1643_v16 = vpop.xlane.xlu1 %1642 }
0x17a8   : > { %vm1644_vm5 = vcmp.eq.f32.partialorder %v1641_v13, %v1643_v16  ;;  %v1649_v18 = vcvt.f32.s32 %v1643_v16 }
0x17a9   : > { %v1645_v17 = vsel %vm1644_vm5, %v1640_v12, inf }
0x17aa   : > { %1646 = vmin.xlane.f32.xlu0 %v1645_v17  ;;  %v1650_v20 = vshll.u32 %v1649_v18, 16 }
0x1837   : > { %v1647_v19 = vpop.xlane.xlu0 %1646 }
0x1838   : > { %v1648_v21 = vcvt.f32.s32 %v1647_v19 }
0x183a   : > { %v1651_v22 = vadd.s32 %v1650_v20, %v1648_v21 }
0x183c   : > { %v1652_v23 = vrot.slane %v1651_v22, 4 }
0x183e   : > { %vm1653_vm6 = vcmp.lt.s32.totalorder %v1651_v22, %v1652_v23 }
0x183f   : > { %v1654_v24 = vsel %vm1653_vm6, %v1651_v22, %v1652_v23 }
0x1840   : > { %v1655_v25 = vrot.slane %v1654_v24, 2 }
0x1842   : > { %vm1656_vm7 = vcmp.lt.s32.totalorder %v1654_v24, %v1655_v25 }
0x1843   : > { %v1657_v26 = vsel %vm1656_vm7, %v1654_v24, %v1655_v25 }
0x1844   : > { %v1658_v27 = vrot.slane %v1657_v26, 1 }
0x1846   : > { %vm1659_vm8 = vcmp.lt.s32.totalorder %v1657_v26, %v1658_v27 }
0x1847   : > { %v1660_v28 = vsel %vm1659_vm8, %v1657_v26, %v1658_v27 }
0x1848   : > { %2757 = vpush %v1660_v28 }
0x1879   : > { %s5120_s2 = spop %2757 }
0x187a   : > { %v1669_v29 = vstv %s5120_s2 }
0x187b   : > { %vm1670_vm9 = vcmp.eq.s32.totalorder %v4990_v36, %v1669_v29  ;;  %vm1671_vm10 = vcmp.eq.s32.totalorder %v4983_v33, %v1669_v29 }
0x187c   : > { %v1672_v30 = vsel %vm1670_vm9, -inf, %v1630_v5  ;;  %v1673_v31 = vsel %vm1671_vm10, -inf, %v1631_v6 }
0x187d   : > { %v1678_v32 = vmax.f32 %v1672_v30, %v1673_v31  ;;  %1674 = vst [vmem:[%s5112_s20] sm:$0xff] %v1672_v30  ;;  %1675 = vst [vmem:[%s5112_s20 + $0x8] sm:$0xff] %v1673_v31 }
0x187f   : > { %1679 = vmax.xlane.f32.xlu1 %v1678_v32 }
0x190c   : > { %v1680_v34 = vpop.xlane.xlu1 %1679 }
0x190d   : > { %v1681_v35 = vrot.slane %v1680_v34, 4 }
0x190f   : > { %v1682_v37 = vmax.f32 %v1680_v34, %v1681_v35 }
0x1911   : > { %v1683_v38 = vrot.slane %v1682_v37, 2 }
0x1913   : > { %v1684_v42 = vmax.f32 %v1682_v37, %v1683_v38 }
0x1915   : > { %v1685_v43 = vrot.slane %v1684_v42, 1 }
0x1917   : > { %v1686_v44 = vmax.f32 %v1684_v42, %v1685_v43 }
0x1919   : > { %2759 = vpush %v1686_v44 }
0x194a   : > { %s2760_s18 = spop %2759 }
0x194b   : > { %v1688_v46 = vstv %s2760_s18 }
0x194c   : > { %v5130_v39 = vsel %vm1677_vm11, %v1688_v46, %v5099_v49 }
0x194d   : > { %v1690_v40 = vsel %vm1264_vm12, %v5130_v39, -inf }
0x194e   : > { %1691 = vmax.xlane.f32.xlu0 %v1690_v40 }
0x19db   : > { %v1692_v41 = vpop.xlane.xlu0 %1691 }
0x19dc   : > { %2761 = vpush %v1692_v41 }
0x1a0d   : > { %s2762_s17 = spop %2761 }
0x1a0e   : > { %v5134_v47 = vstv %s2762_s17 }
0x1a0f   : > { %vm1695_vm13 = vcmp.eq.f32.partialorder %v5130_v39, %v5134_v47 }
0x1a10   : > { %v1696_v48 = vsel %vm1695_vm13, %v4963_v4, 4 }
0x1a11   : > { %v1697_v50 = vsel %vm1264_vm12, %v1696_v48, 2147483647 }
0x1a12   : > { %v1699_v51 = vshra.s32 %v1697_v50, 16  ;;  %v1698_v49 = vand.u32 65535, %v1697_v50 }
0x1a14   : > { %v1701_v53 = vcvt.s32.f32 %v1699_v51  ;;  %v1700_v56 = vcvt.s32.f32 %v1698_v49 }
0x1a16   : > { %1702 = vmin.xlane.f32.xlu1 %v1701_v53 }
0x1aa3   : > { %v1703_v54 = vpop.xlane.xlu1 %1702 }
0x1aa4   : > { %vm1704_vm14 = vcmp.eq.f32.partialorder %v1701_v53, %v1703_v54  ;;  %v1709_v55 = vcvt.f32.s32 %v1703_v54 }
0x1aa5   : > { %v1705_v57 = vsel %vm1704_vm14, %v1700_v56, inf }
0x1aa6   : > { %1706 = vmin.xlane.f32.xlu0 %v1705_v57  ;;  %v1710_v60 = vshll.u32 %v1709_v55, 16 }
0x1b33   : > { %v1707_v59 = vpop.xlane.xlu0 %1706 }
0x1b34   : > { %v1708_v61 = vcvt.f32.s32 %v1707_v59 }
0x1b36   : > { %v1711_v63 = vadd.s32 %v1710_v60, %v1708_v61 }
0x1b38   : > { %2763 = vpush %v1711_v63 }
0x1b69   : > { %s5140_s13 = spop %2763 }
0x1b6a   : > { %s2545_s30 = sshll.u32 %s5140_s13, 4  ;;  %v1761_v38 = vstv %s5140_s13 }
0x1b6b   : > { %s5143_s12 = scalar_lea.vmem [#allocation2], %s2545_s30  ;;  %vm1762_vm8 = vcmp.eq.s32.totalorder %v4963_v4, %v1761_v38 }
0x1b6c   : > { %v1715_v62 = vld [vmem:[%s5143_s12] sm:$0xff]  ;;  %v1716_v0 = vld [vmem:[%s5143_s12 + $0x8] sm:$0xff] }
0x1b6d   : > { %vm1717_vm15 = vcmp.eq.f32.partialorder %v1715_v62, %v5134_v47  ;;  %vm1718_vm0 = vcmp.eq.f32.partialorder %v1716_v0, %v5134_v47 }
0x1b6e   : > { %v1719_v2 = vsel %vm1717_vm15, %v4990_v36, 2048  ;;  %v1720_v3 = vsel %vm1718_vm0, %v4983_v33, 2048 }
0x1b6f   : > { %vm1721_vm1 = vcmp.lt.s32.totalorder %v1719_v2, %v1720_v3 }
0x1b70   : > { %v1722_v5 = vsel %vm1721_vm1, %v1719_v2, %v1720_v3 }
0x1b71   : > { %v1724_v6 = vshra.s32 %v1722_v5, 16  ;;  %v1723_v8 = vand.u32 65535, %v1722_v5 }
0x1b73   : > { %v1726_v7 = vcvt.s32.f32 %v1724_v6  ;;  %v1725_v11 = vcvt.s32.f32 %v1723_v8 }
0x1b75   : > { %1727 = vmin.xlane.f32.xlu1 %v1726_v7 }
0x1c02   : > { %v1728_v9 = vpop.xlane.xlu1 %1727 }
0x1c03   : > { %vm1729_vm2 = vcmp.eq.f32.partialorder %v1726_v7, %v1728_v9  ;;  %v1734_v14 = vcvt.f32.s32 %v1728_v9 }
0x1c04   : > { %v1730_v13 = vsel %vm1729_vm2, %v1725_v11, inf }
0x1c05   : > { %1731 = vmin.xlane.f32.xlu0 %v1730_v13  ;;  %v1735_v12 = vshll.u32 %v1734_v14, 16 }
0x1c92   : > { %v1732_v16 = vpop.xlane.xlu0 %1731 }
0x1c93   : > { %v1733_v17 = vcvt.f32.s32 %v1732_v16 }
0x1c95   : > { %v1736_v18 = vadd.s32 %v1735_v12, %v1733_v17 }
0x1c97   : > { %v1737_v19 = vrot.slane %v1736_v18, 4 }
0x1c99   : > { %vm1738_vm3 = vcmp.lt.s32.totalorder %v1736_v18, %v1737_v19 }
0x1c9a   : > { %v1739_v20 = vsel %vm1738_vm3, %v1736_v18, %v1737_v19 }
0x1c9b   : > { %v1740_v21 = vrot.slane %v1739_v20, 2 }
0x1c9d   : > { %vm1741_vm4 = vcmp.lt.s32.totalorder %v1739_v20, %v1740_v21 }
0x1c9e   : > { %v1742_v22 = vsel %vm1741_vm4, %v1739_v20, %v1740_v21 }
0x1c9f   : > { %v1743_v23 = vrot.slane %v1742_v22, 1 }
0x1ca1   : > { %vm1744_vm5 = vcmp.lt.s32.totalorder %v1742_v22, %v1743_v23 }
0x1ca2   : > { %v1745_v24 = vsel %vm1744_vm5, %v1742_v22, %v1743_v23 }
0x1ca3   : > { %2765 = vpush %v1745_v24 }
0x1cd4   : > { %s5151_s29 = spop %2765 }
0x1cd5   : > { %v1754_v25 = vstv %s5151_s29 }
0x1cd6   : > { %vm1755_vm6 = vcmp.eq.s32.totalorder %v4990_v36, %v1754_v25  ;;  %vm1756_vm7 = vcmp.eq.s32.totalorder %v4983_v33, %v1754_v25 }
0x1cd7   : > { %v1757_v26 = vsel %vm1755_vm6, -inf, %v1715_v62  ;;  %v1758_v27 = vsel %vm1756_vm7, -inf, %v1716_v0 }
0x1cd8   : > { %v1763_v28 = vmax.f32 %v1757_v26, %v1758_v27  ;;  %1759 = vst [vmem:[%s5143_s12] sm:$0xff] %v1757_v26  ;;  %1760 = vst [vmem:[%s5143_s12 + $0x8] sm:$0xff] %v1758_v27 }
0x1cda   : > { %1764 = vmax.xlane.f32.xlu1 %v1763_v28 }
0x1d67   : > { %v1765_v29 = vpop.xlane.xlu1 %1764 }
0x1d68   : > { %v1766_v30 = vrot.slane %v1765_v29, 4 }
0x1d6a   : > { %v1767_v31 = vmax.f32 %v1765_v29, %v1766_v30 }
0x1d6c   : > { %v1768_v32 = vrot.slane %v1767_v31, 2 }
0x1d6e   : > { %v1769_v34 = vmax.f32 %v1767_v31, %v1768_v32 }
0x1d70   : > { %v1770_v35 = vrot.slane %v1769_v34, 1 }
0x1d72   : > { %v1771_v37 = vmax.f32 %v1769_v34, %v1770_v35 }
0x1d74   : > { %2767 = vpush %v1771_v37 }
0x1da5   : > { %s2768_s26 = spop %2767 }
0x1da6   : > { %v1773_v42 = vstv %s2768_s26 }
0x1da7   : > { %v5161_v43 = vsel %vm1762_vm8, %v1773_v42, %v5130_v39 }
0x1da8   : > { %v1775_v44 = vsel %vm1264_vm12, %v5161_v43, -inf }
0x1da9   : > { %1776 = vmax.xlane.f32.xlu0 %v1775_v44 }
0x1e36   : > { %v1777_v45 = vpop.xlane.xlu0 %1776 }
0x1e37   : > { %2769 = vpush %v1777_v45 }
0x1e68   : > { %s2770_s21 = spop %2769 }
0x1e69   : > { %v5165_v46 = vstv %s2770_s21 }
0x1e6a   : > { %vm1780_vm9 = vcmp.eq.f32.partialorder %v5161_v43, %v5165_v46 }
0x1e6b   : > { %v1781_v40 = vsel %vm1780_vm9, %v4963_v4, 4 }
0x1e6c   : > { %v1782_v41 = vsel %vm1264_vm12, %v1781_v40, 2147483647 }
0x1e6d   : > { %v1784_v48 = vshra.s32 %v1782_v41, 16  ;;  %v1783_v39 = vand.u32 65535, %v1782_v41 }
0x1e6f   : > { %v1786_v50 = vcvt.s32.f32 %v1784_v48  ;;  %v1785_v53 = vcvt.s32.f32 %v1783_v39 }
0x1e71   : > { %1787 = vmin.xlane.f32.xlu1 %v1786_v50 }
0x1efe   : > { %v1788_v51 = vpop.xlane.xlu1 %1787 }
0x1eff   : > { %vm1789_vm10 = vcmp.eq.f32.partialorder %v1786_v50, %v1788_v51  ;;  %v1794_v54 = vcvt.f32.s32 %v1788_v51 }
0x1f00   : > { %v1790_v49 = vsel %vm1789_vm10, %v1785_v53, inf }
0x1f01   : > { %1791 = vmin.xlane.f32.xlu0 %v1790_v49  ;;  %v1795_v57 = vshll.u32 %v1794_v54, 16 }
0x1f8e   : > { %v1792_v56 = vpop.xlane.xlu0 %1791 }
0x1f8f   : > { %v1793_v55 = vcvt.f32.s32 %v1792_v56 }
0x1f91   : > { %v1796_v59 = vadd.s32 %v1795_v57, %v1793_v55 }
0x1f93   : > { %2771 = vpush %v1796_v59 }
0x1fc4   : > { %s5171_s16 = spop %2771 }
0x1fc5   : > { %s2547_s0 = sshll.u32 %s5171_s16, 4  ;;  %v1846_v34 = vstv %s5171_s16 }
0x1fc6   : > { %s5174_s6 = scalar_lea.vmem [#allocation2], %s2547_s0  ;;  %vm1847_vm5 = vcmp.eq.s32.totalorder %v4963_v4, %v1846_v34 }
0x1fc7   : > { %v1800_v60 = vld [vmem:[%s5174_s6] sm:$0xff]  ;;  %v1801_v61 = vld [vmem:[%s5174_s6 + $0x8] sm:$0xff] }
0x1fc8   : > { %vm1802_vm11 = vcmp.eq.f32.partialorder %v1800_v60, %v5165_v46  ;;  %vm1803_vm13 = vcmp.eq.f32.partialorder %v1801_v61, %v5165_v46 }
0x1fc9   : > { %v1804_v63 = vsel %vm1802_vm11, %v4990_v36, 2048  ;;  %v1805_v62 = vsel %vm1803_vm13, %v4983_v33, 2048 }
0x1fca   : > { %vm1806_vm14 = vcmp.lt.s32.totalorder %v1804_v63, %v1805_v62 }
0x1fcb   : > { %v1807_v0 = vsel %vm1806_vm14, %v1804_v63, %v1805_v62 }
0x1fcc   : > { %v1809_v2 = vshra.s32 %v1807_v0, 16  ;;  %v1808_v5 = vand.u32 65535, %v1807_v0 }
0x1fce   : > { %v1811_v3 = vcvt.s32.f32 %v1809_v2  ;;  %v1810_v7 = vcvt.s32.f32 %v1808_v5 }
0x1fd0   : > { %1812 = vmin.xlane.f32.xlu1 %v1811_v3 }
0x205d   : > { %v1813_v6 = vpop.xlane.xlu1 %1812 }
0x205e   : > { %vm1814_vm15 = vcmp.eq.f32.partialorder %v1811_v3, %v1813_v6  ;;  %v1819_v9 = vcvt.f32.s32 %v1813_v6 }
0x205f   : > { %v1815_v8 = vsel %vm1814_vm15, %v1810_v7, inf }
0x2060   : > { %1816 = vmin.xlane.f32.xlu0 %v1815_v8  ;;  %v1820_v13 = vshll.u32 %v1819_v9, 16 }
0x20ed   : > { %v1817_v11 = vpop.xlane.xlu0 %1816 }
0x20ee   : > { %v1818_v14 = vcvt.f32.s32 %v1817_v11 }
0x20f0   : > { %v1821_v16 = vadd.s32 %v1820_v13, %v1818_v14 }
0x20f2   : > { %v1822_v12 = vrot.slane %v1821_v16, 4 }
0x20f4   : > { %vm1823_vm0 = vcmp.lt.s32.totalorder %v1821_v16, %v1822_v12 }
0x20f5   : > { %v1824_v17 = vsel %vm1823_vm0, %v1821_v16, %v1822_v12 }
0x20f6   : > { %v1825_v18 = vrot.slane %v1824_v17, 2 }
0x20f8   : > { %vm1826_vm1 = vcmp.lt.s32.totalorder %v1824_v17, %v1825_v18 }
0x20f9   : > { %v1827_v19 = vsel %vm1826_vm1, %v1824_v17, %v1825_v18 }
0x20fa   : > { %v1828_v20 = vrot.slane %v1827_v19, 1 }
0x20fc   : > { %vm1829_vm2 = vcmp.lt.s32.totalorder %v1827_v19, %v1828_v20 }
0x20fd   : > { %v1830_v21 = vsel %vm1829_vm2, %v1827_v19, %v1828_v20 }
0x20fe   : > { %2773 = vpush %v1830_v21 }
0x212f   : > { %s5182_s19 = spop %2773 }
0x2130   : > { %v1839_v22 = vstv %s5182_s19 }
0x2131   : > { %vm1840_vm3 = vcmp.eq.s32.totalorder %v4990_v36, %v1839_v22  ;;  %vm1841_vm4 = vcmp.eq.s32.totalorder %v4983_v33, %v1839_v22 }
0x2132   : > { %v1842_v23 = vsel %vm1840_vm3, -inf, %v1800_v60  ;;  %v1843_v24 = vsel %vm1841_vm4, -inf, %v1801_v61 }
0x2133   : > { %v1848_v25 = vmax.f32 %v1842_v23, %v1843_v24  ;;  %1844 = vst [vmem:[%s5174_s6] sm:$0xff] %v1842_v23  ;;  %1845 = vst [vmem:[%s5174_s6 + $0x8] sm:$0xff] %v1843_v24 }
0x2135   : > { %1849 = vmax.xlane.f32.xlu1 %v1848_v25 }
0x21c2   : > { %v1850_v26 = vpop.xlane.xlu1 %1849 }
0x21c3   : > { %v1851_v27 = vrot.slane %v1850_v26, 4 }
0x21c5   : > { %v1852_v28 = vmax.f32 %v1850_v26, %v1851_v27 }
0x21c7   : > { %v1853_v29 = vrot.slane %v1852_v28, 2 }
0x21c9   : > { %v1854_v30 = vmax.f32 %v1852_v28, %v1853_v29 }
0x21cb   : > { %v1855_v31 = vrot.slane %v1854_v30, 1 }
0x21cd   : > { %v1856_v32 = vmax.f32 %v1854_v30, %v1855_v31 }
0x21cf   : > { %2775 = vpush %v1856_v32 }
0x2200   : > { %s2776_s20 = spop %2775 }
0x2201   : > { %v1858_v35 = vstv %s2776_s20 }
0x2202   : > { %v5192_v37 = vsel %vm1847_vm5, %v1858_v35, %v5161_v43 }
0x2203   : > { %v1860_v38 = vsel %vm1264_vm12, %v5192_v37, -inf }
0x2204   : > { %1861 = vmax.xlane.f32.xlu0 %v1860_v38 }
0x2291   : > { %v1862_v42 = vpop.xlane.xlu0 %1861 }
0x2292   : > { %2777 = vpush %v1862_v42 }
0x22c3   : > { %s2778_s18 = spop %2777 }
0x22c4   : > { %v5196_v44 = vstv %s2778_s18 }
0x22c5   : > { %vm1865_vm6 = vcmp.eq.f32.partialorder %v5192_v37, %v5196_v44 }
0x22c6   : > { %v1866_v45 = vsel %vm1865_vm6, %v4963_v4, 4 }
0x22c7   : > { %v1867_v40 = vsel %vm1264_vm12, %v1866_v45, 2147483647 }
0x22c8   : > { %v1869_v41 = vshra.s32 %v1867_v40, 16  ;;  %v1868_v43 = vand.u32 65535, %v1867_v40 }
0x22ca   : > { %v1871_v48 = vcvt.s32.f32 %v1869_v41  ;;  %v1870_v39 = vcvt.s32.f32 %v1868_v43 }
0x22cc   : > { %1872 = vmin.xlane.f32.xlu1 %v1871_v48 }
0x2359   : > { %v1873_v50 = vpop.xlane.xlu1 %1872 }
0x235a   : > { %vm1874_vm7 = vcmp.eq.f32.partialorder %v1871_v48, %v1873_v50  ;;  %v1879_v53 = vcvt.f32.s32 %v1873_v50 }
0x235b   : > { %v1875_v51 = vsel %vm1874_vm7, %v1870_v39, inf }
0x235c   : > { %1876 = vmin.xlane.f32.xlu0 %v1875_v51  ;;  %v1880_v54 = vshll.u32 %v1879_v53, 16 }
0x23e9   : > { %v1877_v49 = vpop.xlane.xlu0 %1876 }
0x23ea   : > { %v1878_v56 = vcvt.f32.s32 %v1877_v49 }
0x23ec   : > { %v1881_v57 = vadd.s32 %v1880_v54, %v1878_v56 }
0x23ee   : > { %2779 = vpush %v1881_v57 }
0x241f   : > { %s5202_s17 = spop %2779 }
0x2420   : > { %s2549_s30 = sshll.u32 %s5202_s17, 4  ;;  %v1931_v31 = vstv %s5202_s17  ;;  %s2550_s28 = sshll.u32 %s5202_s17, 11 }
0x2421   : > { %s5205_s12 = scalar_lea.vmem [#allocation2], %s2549_s30  ;;  %vm1932_vm2 = vcmp.eq.s32.totalorder %v4963_v4, %v1931_v31 }
0x2422   : > { %v1885_v55 = vld [vmem:[%s5205_s12] sm:$0xff]  ;;  %v1886_v59 = vld [vmem:[%s5205_s12 + $0x8] sm:$0xff] }
0x2423   : > { %vm1887_vm8 = vcmp.eq.f32.partialorder %v1885_v55, %v5196_v44  ;;  %vm1888_vm9 = vcmp.eq.f32.partialorder %v1886_v59, %v5196_v44 }
0x2424   : > { %v1889_v60 = vsel %vm1887_vm8, %v4990_v36, 2048  ;;  %v1890_v61 = vsel %vm1888_vm9, %v4983_v33, 2048 }
0x2425   : > { %vm1891_vm10 = vcmp.lt.s32.totalorder %v1889_v60, %v1890_v61 }
0x2426   : > { %v1892_v63 = vsel %vm1891_vm10, %v1889_v60, %v1890_v61 }
0x2427   : > { %v1894_v62 = vshra.s32 %v1892_v63, 16  ;;  %v1893_v2 = vand.u32 65535, %v1892_v63 }
0x2429   : > { %v1896_v0 = vcvt.s32.f32 %v1894_v62  ;;  %v1895_v5 = vcvt.s32.f32 %v1893_v2 }
0x242b   : > { %1897 = vmin.xlane.f32.xlu1 %v1896_v0 }
0x24b8   : > { %v1898_v3 = vpop.xlane.xlu1 %1897 }
0x24b9   : > { %vm1899_vm11 = vcmp.eq.f32.partialorder %v1896_v0, %v1898_v3  ;;  %v1904_v7 = vcvt.f32.s32 %v1898_v3 }
0x24ba   : > { %v1900_v6 = vsel %vm1899_vm11, %v1895_v5, inf }
0x24bb   : > { %1901 = vmin.xlane.f32.xlu0 %v1900_v6  ;;  %v1905_v9 = vshll.u32 %v1904_v7, 16 }
0x2548   : > { %v1902_v8 = vpop.xlane.xlu0 %1901 }
0x2549   : > { %v1903_v11 = vcvt.f32.s32 %v1902_v8 }
0x254b   : > { %v1906_v13 = vadd.s32 %v1905_v9, %v1903_v11 }
0x254d   : > { %v1907_v14 = vrot.slane %v1906_v13, 4 }
0x254f   : > { %vm1908_vm13 = vcmp.lt.s32.totalorder %v1906_v13, %v1907_v14 }
0x2550   : > { %v1909_v16 = vsel %vm1908_vm13, %v1906_v13, %v1907_v14 }
0x2551   : > { %v1910_v12 = vrot.slane %v1909_v16, 2 }
0x2553   : > { %vm1911_vm14 = vcmp.lt.s32.totalorder %v1909_v16, %v1910_v12 }
0x2554   : > { %v1912_v17 = vsel %vm1911_vm14, %v1909_v16, %v1910_v12 }
0x2555   : > { %v1913_v18 = vrot.slane %v1912_v17, 1 }
0x2557   : > { %vm1914_vm15 = vcmp.lt.s32.totalorder %v1912_v17, %v1913_v18 }
0x2558   : > { %v1915_v19 = vsel %vm1914_vm15, %v1912_v17, %v1913_v18 }
0x2559   : > { %2781 = vpush %v1915_v19 }
0x258a   : > { %s5213_s26 = spop %2781 }
0x258b   : > { %v1924_v20 = vstv %s5213_s26 }
0x258c   : > { %vm1925_vm0 = vcmp.eq.s32.totalorder %v4990_v36, %v1924_v20  ;;  %vm1926_vm1 = vcmp.eq.s32.totalorder %v4983_v33, %v1924_v20 }
0x258d   : > { %v1927_v21 = vsel %vm1925_vm0, -inf, %v1885_v55  ;;  %v1928_v22 = vsel %vm1926_vm1, -inf, %v1886_v59  ;;  %vm1325_vm0 = vcmp.eq.s32.totalorder %v4990_v36, 0  ;;  %vm1410_vm1 = vcmp.eq.s32.totalorder %v4990_v36, 1 }
0x258e   : > { %v1933_v23 = vmax.f32 %v1927_v21, %v1928_v22  ;;  %1929 = vst [vmem:[%s5205_s12] sm:$0xff] %v1927_v21  ;;  %1930 = vst [vmem:[%s5205_s12 + $0x8] sm:$0xff] %v1928_v22 }
0x2590   : > { %1934 = vmax.xlane.f32.xlu1 %v1933_v23 }
0x261d   : > { %v1935_v24 = vpop.xlane.xlu1 %1934 }
0x261e   : > { %v1936_v25 = vrot.slane %v1935_v24, 4 }
0x2620   : > { %v1937_v26 = vmax.f32 %v1935_v24, %v1936_v25 }
0x2622   : > { %v1938_v27 = vrot.slane %v1937_v26, 2 }
0x2624   : > { %v1939_v28 = vmax.f32 %v1937_v26, %v1938_v27 }
0x2626   : > { %v1940_v29 = vrot.slane %v1939_v28, 1 }
0x2628   : > { %v1941_v30 = vmax.f32 %v1939_v28, %v1940_v29 }
0x262a   : > { %2783 = vpush %v1941_v30 }
0x265b   : > { %s2784_s21 = spop %2783 }
0x265c   : > { %v1943_v32 = vstv %s2784_s21 }
0x265d   : > { %v5223_v34 = vsel %vm1932_vm2, %v1943_v32, %v5192_v37  ;;  %vm1495_vm2 = vcmp.eq.s32.totalorder %v4990_v36, 2 }
0x265e   : > { %v1945_v35 = vsel %vm1264_vm12, %v5223_v34, -inf }
0x265f   : > { %1946 = vmax.xlane.f32.xlu0 %v1945_v35 }
0x26ec   : > { %v1947_v38 = vpop.xlane.xlu0 %1946 }
0x26ed   : > { %2785 = vpush %v1947_v38 }
0x271e   : > { %s2786_s0 = spop %2785 }
0x271f   : > { %v5227_v42 = vstv %s2786_s0 }
0x2720   : > { %vm1950_vm3 = vcmp.eq.f32.partialorder %v5223_v34, %v5227_v42 }
0x2721   : > { %v1951_v45 = vsel %vm1950_vm3, %v4963_v4, 4  ;;  %vm1580_vm3 = vcmp.eq.s32.totalorder %v4990_v36, 3 }
0x2722   : > { %v1952_v40 = vsel %vm1264_vm12, %v1951_v45, 2147483647  ;;  %v1326_v45 = vsel %vm1325_vm0, %v4973_v15, -inf }
0x2723   : > { %v1954_v41 = vshra.s32 %v1952_v40, 16  ;;  %v1953_v37 = vand.u32 65535, %v1952_v40 }
0x2725   : > { %v1956_v48 = vcvt.s32.f32 %v1954_v41  ;;  %v1955_v50 = vcvt.s32.f32 %v1953_v37 }
0x2727   : > { %1957 = vmin.xlane.f32.xlu1 %v1956_v48 }
0x27b4   : > { %v1958_v43 = vpop.xlane.xlu1 %1957 }
0x27b5   : > { %vm1959_vm4 = vcmp.eq.f32.partialorder %v1956_v48, %v1958_v43  ;;  %v1964_v51 = vcvt.f32.s32 %v1958_v43 }
0x27b6   : > { %v1960_v39 = vsel %vm1959_vm4, %v1955_v50, inf  ;;  %vm1665_vm4 = vcmp.eq.s32.totalorder %v4990_v36, 4 }
0x27b7   : > { %1961 = vmin.xlane.f32.xlu0 %v1960_v39  ;;  %v1965_v49 = vshll.u32 %v1964_v51, 16 }
0x2844   : > { %v1962_v53 = vpop.xlane.xlu0 %1961 }
0x2845   : > { %v1963_v54 = vcvt.f32.s32 %v1962_v53 }
0x2847   : > { %v1966_v56 = vadd.s32 %v1965_v49, %v1963_v54 }
0x2849   : > { %2787 = vpush %v1966_v56 }
0x287a   : > { %s5233_s6 = spop %2787 }
0x287b   : > { %s2551_s20 = sshll.u32 %s5233_s6, 4  ;;  %v2016_v30 = vstv %s5233_s6 }
0x287c   : > { %s5236_s18 = scalar_lea.vmem [#allocation2], %s2551_s20  ;;  %vm2017_vm15 = vcmp.eq.s32.totalorder %v4963_v4, %v2016_v30 }
0x287d   : > { %v1970_v57 = vld [vmem:[%s5236_s18] sm:$0xff]  ;;  %v1971_v55 = vld [vmem:[%s5236_s18 + $0x8] sm:$0xff] }
0x287e   : > { %vm1972_vm5 = vcmp.eq.f32.partialorder %v1970_v57, %v5227_v42  ;;  %vm1973_vm6 = vcmp.eq.f32.partialorder %v1971_v55, %v5227_v42 }
0x287f   : > { %v1974_v59 = vsel %vm1972_vm5, %v4990_v36, 2048  ;;  %v1975_v60 = vsel %vm1973_vm6, %v4983_v33, 2048  ;;  %vm1750_vm5 = vcmp.eq.s32.totalorder %v4990_v36, 5  ;;  %vm1835_vm6 = vcmp.eq.s32.totalorder %v4990_v36, 6 }
0x2880   : > { %vm1976_vm7 = vcmp.lt.s32.totalorder %v1974_v59, %v1975_v60 }
0x2881   : > { %v1977_v61 = vsel %vm1976_vm7, %v1974_v59, %v1975_v60  ;;  %vm1920_vm7 = vcmp.eq.s32.totalorder %v4990_v36, 7 }
0x2882   : > { %v1979_v63 = vshra.s32 %v1977_v61, 16  ;;  %v1978_v0 = vand.u32 65535, %v1977_v61 }
0x2884   : > { %v1981_v62 = vcvt.s32.f32 %v1979_v63  ;;  %v1980_v3 = vcvt.s32.f32 %v1978_v0 }
0x2886   : > { %1982 = vmin.xlane.f32.xlu1 %v1981_v62 }
0x2913   : > { %v1983_v2 = vpop.xlane.xlu1 %1982 }
0x2914   : > { %vm1984_vm8 = vcmp.eq.f32.partialorder %v1981_v62, %v1983_v2  ;;  %v1989_v6 = vcvt.f32.s32 %v1983_v2 }
0x2915   : > { %v1985_v5 = vsel %vm1984_vm8, %v1980_v3, inf  ;;  %vm2005_vm8 = vcmp.eq.s32.totalorder %v4990_v36, 8 }
0x2916   : > { %1986 = vmin.xlane.f32.xlu0 %v1985_v5  ;;  %v1990_v8 = vshll.u32 %v1989_v6, 16 }
0x29a3   : > { %v1987_v7 = vpop.xlane.xlu0 %1986 }
0x29a4   : > { %v1988_v9 = vcvt.f32.s32 %v1987_v7 }
0x29a6   : > { %v1991_v11 = vadd.s32 %v1990_v8, %v1988_v9 }
0x29a8   : > { %v1992_v13 = vrot.slane %v1991_v11, 4 }
0x29aa   : > { %vm1993_vm9 = vcmp.lt.s32.totalorder %v1991_v11, %v1992_v13 }
0x29ab   : > { %v1994_v14 = vsel %vm1993_vm9, %v1991_v11, %v1992_v13  ;;  %vm2090_vm9 = vcmp.eq.s32.totalorder %v4990_v36, 9 }
0x29ac   : > { %v1995_v16 = vrot.slane %v1994_v14, 2 }
0x29ae   : > { %vm1996_vm10 = vcmp.lt.s32.totalorder %v1994_v14, %v1995_v16 }
0x29af   : > { %v1997_v12 = vsel %vm1996_vm10, %v1994_v14, %v1995_v16 }
0x29b0   : > { %v1998_v17 = vrot.slane %v1997_v12, 1 }
0x29b2   : > { %vm1999_vm11 = vcmp.lt.s32.totalorder %v1997_v12, %v1998_v17 }
0x29b3   : > { %v2000_v18 = vsel %vm1999_vm11, %v1997_v12, %v1998_v17 }
0x29b4   : > { %2789 = vpush %v2000_v18 }
0x29e5   : > { %s5244_s30 = spop %2789 }
0x29e6   : > { %5871 = sst [smem:[#allocation99_spill]] %s5244_s30  ;;  %v2009_v19 = vstv %s5244_s30 }
0x29e7   : > { %vm2010_vm13 = vcmp.eq.s32.totalorder %v4990_v36, %v2009_v19  ;;  %vm2011_vm14 = vcmp.eq.s32.totalorder %v4983_v33, %v2009_v19 }
0x29e8   : > { %v2012_v20 = vsel %vm2010_vm13, -inf, %v1970_v57  ;;  %v2013_v21 = vsel %vm2011_vm14, -inf, %v1971_v55 }
0x29e9   : > { %v2018_v22 = vmax.f32 %v2012_v20, %v2013_v21  ;;  %2014 = vst [vmem:[%s5236_s18] sm:$0xff] %v2012_v20  ;;  %2015 = vst [vmem:[%s5236_s18 + $0x8] sm:$0xff] %v2013_v21 }
0x29eb   : > { %2019 = vmax.xlane.f32.xlu1 %v2018_v22 }
0x2a78   : > { %v2020_v23 = vpop.xlane.xlu1 %2019 }
0x2a79   : > { %v2021_v24 = vrot.slane %v2020_v23, 4 }
0x2a7b   : > { %v2022_v25 = vmax.f32 %v2020_v23, %v2021_v24 }
0x2a7d   : > { %v2023_v26 = vrot.slane %v2022_v25, 2 }
0x2a7f   : > { %v2024_v27 = vmax.f32 %v2022_v25, %v2023_v26 }
0x2a81   : > { %v2025_v28 = vrot.slane %v2024_v27, 1 }
0x2a83   : > { %v2026_v29 = vmax.f32 %v2024_v27, %v2025_v28 }
0x2a85   : > { %2791 = vpush %v2026_v29 }
0x2ab6   : > { %s2792_s12 = spop %2791 }
0x2ab7   : > { %v2028_v31 = vstv %s2792_s12  ;;  %s2536_s12 = sshll.u32 %s4979_s1, 11  ;;  %s2546_s1 = sshll.u32 %s5140_s13, 11 }
0x2ab8   : > { %v2029_v32 = vsel %vm2017_vm15, %v2028_v31, %v5223_v34  ;;  %v1411_v34 = vsel %vm1410_vm1, %v5010_v10, %v1326_v45  ;;  %s5877_s13 = sld [smem:[#allocation98_spill]] }
0x2ab9   : > { %v2030_v35 = vsel %vm1264_vm12, %v2029_v32, -inf  ;;  %v1496_v40 = vsel %vm1495_vm2, %v5041_v1, %v1411_v34 }
0x2aba   : > { %2031 = vmax.xlane.f32.xlu0 %v2030_v35  ;;  %v1581_v41 = vsel %vm1580_vm3, %v5072_v58, %v1496_v40 }
0x2abb   : > { %v1666_v15 = vsel %vm1665_vm4, %v5103_v52, %v1581_v41 }
0x2abc   : > { %v1751_v10 = vsel %vm1750_vm5, %v5134_v47, %v1666_v15 }
0x2abd   : > { %v1836_v1 = vsel %vm1835_vm6, %v5165_v46, %v1751_v10 }
0x2abe   : > { %v1921_v58 = vsel %vm1920_vm7, %v5196_v44, %v1836_v1 }
0x2abf   : > { %v2006_v52 = vsel %vm2005_vm8, %v5227_v42, %v1921_v58 }
0x2b47   : > { %v2032_v38 = vpop.xlane.xlu0 %2031 }
0x2b48   : > { %2793 = vpush %v2032_v38 }
0x2b79   : > { %s2794_s21 = spop %2793 }
0x2b7a   : > { %v2034_v48 = vstv %s2794_s21  ;;  %s2538_s21 = sshll.u32 %s5016_s22, 11  ;;  %s1663_s22 = sadd.s32 %s2544_s14, %s4960_s15 }
0x2b7b   : > { %vm2035_vm10 = vcmp.eq.f32.partialorder %v2029_v32, %v2034_v48  ;;  %v2091_v47 = vsel %vm2090_vm9, %v2034_v48, %v2006_v52  ;;  %s1408_s11 = sadd.s32 %s2538_s21, %s4960_s15  ;;  %s1664_s9 = sadd.s32 %s5120_s2, %s1663_s22 }
0x2b7c   : > { %2101 = vst [vmem:[%s4950_s5] sm:$0xff] %v2091_v47  ;;  %v2036_v37 = vsel %vm2035_vm10, %v4963_v4, 4  ;;  %s1409_s23 = sadd.s32 %s5027_s7, %s1408_s11  ;;  %s1493_s5 = sadd.s32 %s2540_s4, %s4960_s15  ;;  %v1667_v25 = vstv %s1664_s9 }
0x2b7d   : > { %v2037_v46 = vsel %vm1264_vm12, %v2036_v37, 2147483647  ;;  %v1412_v20 = vstv %s1409_s23  ;;  %s1748_s11 = sadd.s32 %s2546_s1, %s4960_s15  ;;  %s2552_s7 = sshll.u32 %s5233_s6, 11 }
0x2b7e   : > { %v2039_v43 = vshra.s32 %v2037_v46, 16  ;;  %v2038_v39 = vand.u32 65535, %v2037_v46  ;;  %s1749_s10 = sadd.s32 %s5151_s29, %s1748_s11  ;;  %s1918_s14 = sadd.s32 %s2550_s28, %s4960_s15 }
0x2b7f   : > { %s2003_s23 = sadd.s32 %s2552_s7, %s4960_s15  ;;  %v1752_v27 = vstv %s1749_s10 }
0x2b80   : > { %v2041_v50 = vcvt.s32.f32 %v2039_v43  ;;  %v2040_v51 = vcvt.s32.f32 %v2038_v39 }
0x2b82   : > { %2042 = vmin.xlane.f32.xlu1 %v2041_v50 }
0x2c0f   : > { %v2043_v44 = vpop.xlane.xlu1 %2042 }
0x2c10   : > { %vm2044_vm11 = vcmp.eq.f32.partialorder %v2041_v50, %v2043_v44  ;;  %v2049_v42 = vcvt.f32.s32 %v2043_v44 }
0x2c11   : > { %v2045_v53 = vsel %vm2044_vm11, %v2040_v51, inf }
0x2c12   : > { %2046 = vmin.xlane.f32.xlu0 %v2045_v53  ;;  %v2050_v54 = vshll.u32 %v2049_v42, 16 }
0x2c9f   : > { %v2047_v49 = vpop.xlane.xlu0 %2046 }
0x2ca0   : > { %v2048_v56 = vcvt.f32.s32 %v2047_v49 }
0x2ca2   : > { %v2051_v57 = vadd.s32 %v2050_v54, %v2048_v56 }
0x2ca4   : > { %2795 = vpush %v2051_v57 }
0x2cd5   : > { %s5297_s0 = spop %2795 }
0x2cd6   : > { %5872 = sst [smem:[#allocation100_spill]] %s5297_s0  ;;  %s2553_s20 = sshll.u32 %s5297_s0, 4 }
0x2cd7   : > { %s5300_s18 = scalar_lea.vmem [#allocation2], %s2553_s20  ;;  %s1323_s20 = sadd.s32 %s2536_s12, %s4960_s15 }
0x2cd8   : > { %5873 = sst [smem:[#allocation101_spill]] %s5300_s18  ;;  %v5303_v4 = vld [vmem:[%s5300_s18] sm:$0xff]  ;;  %v5306_v55 = vld [vmem:[%s5300_s18 + $0x8] sm:$0xff]  ;;  %s1324_s25 = sadd.s32 %s4996_s3, %s1323_s20 }
0x2cd9   : > { %vm2057_vm12 = vcmp.eq.f32.partialorder %v5303_v4, %v2034_v48  ;;  %vm2058_vm13 = vcmp.eq.f32.partialorder %v5306_v55, %v2034_v48  ;;  %s1494_s18 = sadd.s32 %s5058_s8, %s1493_s5  ;;  %s1578_s0 = sadd.s32 %s2542_s24, %s4960_s15  ;;  %v1327_v19 = vstv %s1324_s25 }
0x2cda   : > { %v2059_v59 = vsel %vm2057_vm12, %v4990_v36, 2048  ;;  %v2060_v60 = vsel %vm2058_vm13, %v4983_v33, 2048  ;;  %s1579_s30 = sadd.s32 %s5089_s27, %s1578_s0  ;;  %s2548_s12 = sshll.u32 %s5171_s16, 11  ;;  %v1497_v21 = vstv %s1494_s18  ;;  %v1328_v22 = vsel %vm1325_vm0, %v1327_v19, 0 }
0x2cdb   : > { %vm2061_vm14 = vcmp.lt.s32.totalorder %v2059_v59, %v2060_v60  ;;  %s5874_s3 = sld [smem:[#allocation99_spill]]  ;;  %s5875_s4 = sld [smem:[#allocation100_spill]]  ;;  %v1582_v23 = vstv %s1579_s30  ;;  %v1413_v24 = vsel %vm1410_vm1, %v1412_v20, %v1328_v22 }
0x2cdc   : > { %v2062_v61 = vsel %vm2061_vm14, %v2059_v59, %v2060_v60  ;;  %s1833_s5 = sadd.s32 %s2548_s12, %s4960_s15  ;;  %s1919_s25 = sadd.s32 %s5213_s26, %s1918_s14  ;;  %v1498_v26 = vsel %vm1495_vm2, %v1497_v21, %v1413_v24 }
0x2cdd   : > { %v2064_v63 = vshra.s32 %v2062_v61, 16  ;;  %v2063_v0 = vand.u32 65535, %v2062_v61  ;;  %s1834_s24 = sadd.s32 %s5182_s19, %s1833_s5  ;;  %v1583_v28 = vsel %vm1580_vm3, %v1582_v23, %v1498_v26  ;;  %v1922_v31 = vstv %s1919_s25  ;;  %s5876_s2 = sld [smem:[#allocation101_spill]] }
0x2cde   : > { %v1837_v29 = vstv %s1834_s24  ;;  %v1668_v30 = vsel %vm1665_vm4, %v1667_v25, %v1583_v28 }
0x2cdf   : > { %v2066_v62 = vcvt.s32.f32 %v2064_v63  ;;  %v2065_v3 = vcvt.s32.f32 %v2063_v0  ;;  %v1753_v32 = vsel %vm1750_vm5, %v1752_v27, %v1668_v30 }
0x2ce0   : > { %v1838_v38 = vsel %vm1835_vm6, %v1837_v29, %v1753_v32 }
0x2ce1   : > { %2067 = vmin.xlane.f32.xlu1 %v2066_v62  ;;  %s2004_s8 = sadd.s32 %s5874_s3, %s2003_s23  ;;  %s2554_s27 = sshll.u32 %s5875_s4, 11  ;;  %v1923_v45 = vsel %vm1920_vm7, %v1922_v31, %v1838_v38 }
0x2ce2   : > { %v2007_v35 = vstv %s2004_s8  ;;  %s2088_s16 = sadd.s32 %s2554_s27, %s4960_s15 }
0x2ce3   : > { %v2008_v40 = vsel %vm2005_vm8, %v2007_v35, %v1923_v45 }
0x2d6e   : > { %v2068_v2 = vpop.xlane.xlu1 %2067 }
0x2d6f   : > { %vm2069_vm15 = vcmp.eq.f32.partialorder %v2066_v62, %v2068_v2  ;;  %v2074_v6 = vcvt.f32.s32 %v2068_v2 }
0x2d70   : > { %v2070_v5 = vsel %vm2069_vm15, %v2065_v3, inf }
0x2d71   : > { %2071 = vmin.xlane.f32.xlu0 %v2070_v5  ;;  %v2075_v8 = vshll.u32 %v2074_v6, 16 }
0x2dfe   : > { %v2072_v7 = vpop.xlane.xlu0 %2071 }
0x2dff   : > { %v2073_v9 = vcvt.f32.s32 %v2072_v7 }
0x2e01   : > { %v2076_v11 = vadd.s32 %v2075_v8, %v2073_v9 }
0x2e03   : > { %v2077_v13 = vrot.slane %v2076_v11, 4 }
0x2e05   : > { %vm2078_vm10 = vcmp.lt.s32.totalorder %v2076_v11, %v2077_v13 }
0x2e06   : > { %v2079_v14 = vsel %vm2078_vm10, %v2076_v11, %v2077_v13 }
0x2e07   : > { %v2080_v16 = vrot.slane %v2079_v14, 2 }
0x2e09   : > { %vm2081_vm11 = vcmp.lt.s32.totalorder %v2079_v14, %v2080_v16 }
0x2e0a   : > { %v2082_v12 = vsel %vm2081_vm11, %v2079_v14, %v2080_v16 }
0x2e0b   : > { %v2083_v17 = vrot.slane %v2082_v12, 1 }
0x2e0d   : > { %vm2084_vm12 = vcmp.lt.s32.totalorder %v2082_v12, %v2083_v17 }
0x2e0e   : > { %v2085_v18 = vsel %vm2084_vm12, %v2082_v12, %v2083_v17 }
0x2e0f   : > { %2797 = vpush %v2085_v18 }
0x2e40   : > { %s2798_s29 = spop %2797 }
0x2e41   : > { %s2089_s19 = sadd.s32 %s2798_s29, %s2088_s16  ;;  %v2094_v34 = vstv %s2798_s29 }
0x2e42   : > { %v2092_v41 = vstv %s2089_s19  ;;  %vm2095_vm0 = vcmp.eq.s32.totalorder %v4990_v36, %v2094_v34  ;;  %vm2096_vm1 = vcmp.eq.s32.totalorder %v4983_v33, %v2094_v34 }
0x2e43   : > { %v2093_v15 = vsel %vm2090_vm9, %v2092_v41, %v2008_v40  ;;  %v2097_v10 = vsel %vm2095_vm0, -inf, %v5303_v4  ;;  %v2098_v1 = vsel %vm2096_vm1, -inf, %v5306_v55 }
0x2e44   : > { %2099 = vst [vmem:[%s5876_s2] sm:$0xff] %v2097_v10  ;;  %2100 = vst [vmem:[%s5876_s2 + $0x8] sm:$0xff] %v2098_v1 }
0x2e45   : > { %2102 = vst [vmem:[%s5877_s13] sm:$0xff] %v2093_v15 }
0x2e46 PF: > { %s5878_s15 = sld [smem:[#allocation76_spill]]  ;;  %s5880_s26 = sld [smem:[#allocation96_spill]] }
0x2e47   : > { %s5879_s17 = sld [smem:[#allocation97_spill]]  ;;  %s5881_s6 = sld [smem:[#allocation84_spill]] }
0x2e48   : > { %s5882_s21 = sld [smem:[#allocation111_spill]]  ;;  %s3788_s28 = smov [#allocation21]  }
0x2e49   : > { %s3422_s3 = sshll.u32 %s3788_s28, 4  ;;  %s3423_s3 = int_to_ptr.vmem [resolvable:$false] %s3422_s3 }
0x2e4a   : > { %s3424_s11 = scalar_lea.vmem %s3423_s3, 256 }
0x2e4c   : > { %s2557_s30 = sshll.u32 %s5878_s15, 7  ;;  %s2104_s12 = scalar_lea.sflag [#allocation7], %s5880_s26 }
0x2e4d   : > { %s2122_s22 = sshll.u32 %s5879_s17, 4  ;;  %p5884_p0 = scmp.ne.s32.totalorder %s5881_s6, 0  ;;  %s2123_s22 = int_to_ptr.vmem [resolvable:$true] %s2122_s22 }
0x2e4e   : > { %s5883_s1 = smov %s5882_s21  ;;  %s5374_s20 = scalar_lea.hbm %s5882_s21, %s2557_s30 }
0x2e4f   : > { %s3418_s9 = scalar_lea.vmem %s2123_s22, 128  ;;  %p3425_p9 = scmp.lt.s32.totalorder %s2123_s22, %s3423_s3 }
0x2e50   : > { %p3419_p10 = scmp.ne.s32.totalorder %s2123_s22, %s3418_s9  ;;  %p3426_p13 = scmp.lt.s32.totalorder %s3424_s11, %s3418_s9 }
0x2e52   : > { %p3420_p1 = pnand %p3419_p10, %p5884_p0  ;;  %p3427_p12 = por %p3426_p13, %p3425_p9 }
0x2e54   : > { %p3421_p6 = pneg %p3420_p1 }
0x2e56   : > { %p3428_p8 = pnand %p3427_p12, %p3421_p6 }
0x2e58   : > { %3431 = shalt.err (!%p3428_p8)
}
0x2e59   : > { %s3432_s7 = scalar_lea.hbm %s5374_s20, 128  ;;  %s3436_s5 = scalar_lea.hbm %s5883_s1, 256 }
0x2e5a   : > { %p3433_p2 = scmp.ne.s32.totalorder %s5374_s20, %s3432_s7  ;;  %p3437_p7 = scmp.lt.u32.totalorder %s5374_s20, %s5883_s1 }
0x2e5b   : > { %p3438_p5 = scmp.lt.u32.totalorder %s3436_s5, %s3432_s7  ;;  %p3440_p10 = scmp.lt.u32.totalorder %s3432_s7, %s5374_s20 }
0x2e5c   : > { %p3434_p4 = pnand %p3433_p2, %p5884_p0 }
0x2e5d   : > { %p3439_p11 = por %p3438_p5, %p3437_p7 }
0x2e5e   : > { %p3435_p3 = pneg %p3434_p4 }
0x2e5f   : > { %p3441_p1 = por %p3440_p10, %p3439_p11 }
0x2e61   : > { %p3442_p6 = pnand %p3441_p1, %p3435_p3 }
0x2e63   : > { %3445 = shalt.err (!%p3442_p6)
}
0x2e64   : > { %s5885_s25 = sld [smem:[#allocation98_spill]]  ;;  %s5886_s27 = sld [smem:[#allocation112_spill]] }
0x2e65   : > { %2835 = dma.vmem_to_hbm [thread:$0]  (%p5884_p0), %s2123_s22, 128, %s5374_s20, %s2104_s12  }
0x2e66   : > { %s2109_s29 = scalar_lea.sflag [#allocation23], %s5880_s26  ;;  %s3789_s19 = smov [#allocation22]  }
0x2e67   : > { %s3450_s17 = sshll.u32 %s3789_s19, 4  ;;  %s3451_s17 = int_to_ptr.vmem [resolvable:$false] %s3450_s17 }
0x2e68   : > { %s3452_s0 = scalar_lea.vmem %s3451_s17, 256 }
0x2e6a   : > { %s5887_s11 = smov %s5886_s27  ;;  %s5400_s2 = scalar_lea.hbm %s5886_s27, %s2557_s30 }
0x2e6b   : > { %s2135_s13 = sshll.u32 %s5885_s25, 4  ;;  %s2136_s13 = int_to_ptr.vmem [resolvable:$true] %s2135_s13 }
0x2e6c   : > { %s3446_s16 = scalar_lea.vmem %s2136_s13, 128  ;;  %p3453_p8 = scmp.lt.s32.totalorder %s2136_s13, %s3451_s17 }
0x2e6d   : > { %p3447_p9 = scmp.ne.s32.totalorder %s2136_s13, %s3446_s16  ;;  %p3454_p2 = scmp.lt.s32.totalorder %s3452_s0, %s3446_s16 }
0x2e6f   : > { %p3448_p13 = pnand %p3447_p9, %p5884_p0  ;;  %p3455_p4 = por %p3454_p2, %p3453_p8 }
0x2e71   : > { %p3449_p12 = pneg %p3448_p13 }
0x2e73   : > { %p3456_p3 = pnand %p3455_p4, %p3449_p12 }
0x2e75   : > { %3459 = shalt.err (!%p3456_p3)
}
0x2e76   : > { %s3460_s15 = scalar_lea.hbm %s5400_s2, 128  ;;  %s3464_s18 = scalar_lea.hbm %s5887_s11, 256 }
0x2e77   : > { %p3461_p7 = scmp.ne.s32.totalorder %s5400_s2, %s3460_s15  ;;  %p3465_p10 = scmp.lt.u32.totalorder %s5400_s2, %s5887_s11 }
0x2e78   : > { %p3466_p1 = scmp.lt.u32.totalorder %s3464_s18, %s3460_s15  ;;  %p3468_p9 = scmp.lt.u32.totalorder %s3460_s15, %s5400_s2 }
0x2e79   : > { %p3462_p5 = pnand %p3461_p7, %p5884_p0 }
0x2e7a   : > { %p3467_p6 = por %p3466_p1, %p3465_p10 }
0x2e7b   : > { %p3463_p11 = pneg %p3462_p5 }
0x2e7c   : > { %p3469_p13 = por %p3468_p9, %p3467_p6 }
0x2e7e   : > { %p3470_p12 = pnand %p3469_p13, %p3463_p11 }
0x2e80   : > { %3473 = shalt.err (!%p3470_p12)
}
0x2e81   : > { %2836 = dma.vmem_to_hbm [thread:$0]  (%p5884_p0), %s2136_s13, 128, %s5400_s2, %s2109_s29  }
0x2e82 PF: > { %s5888_s29 = sld [smem:[#allocation79_spill]]  ;;  %s5890_s22 = sld [smem:[#allocation52_spill]] }
0x2e83   : > { %s5891_s12 = sld [smem:[#allocation86_spill]] }
0x2e88   : > { %s5889_s9 = smov %s5888_s29  ;;  %p2894_p8 = scmp.ge.s32.totalorder %s5888_s29, 2 }
0x2e89   : > { %s2147_s28 = sand.u32 1, %s5890_s22   ;;  %p5892_p2 = scmp.ne.s32.totalorder %s5891_s12, 0 }
0x2e8a   : > { %s2148_s3 = scalar_lea.sflag [#allocation7], %s2147_s28 }
0x2e8b   : > { %p2885_p4 = pnand %p2894_p8, %p5892_p2 }
0x2e8d   : > { %3641 = dma.done.wait (!%p2885_p4), %s2148_s3, 128  }
0x2e8e   : > { %3643 = vsyncadd (!%p2885_p4), %s2148_s3, 4294967168  ;;  %s2157_s7 = scalar_lea.sflag [#allocation23], %s2147_s28 }
0x2e8f   : > { %3645 = dma.done.wait (!%p2885_p4), %s2157_s7, 128  }
0x2e90   : > { %3647 = vsyncadd (!%p2885_p4), %s2157_s7, 4294967168  ;;  %s5636_s4 = sadd.s32 1, %s5889_s9   ;;  %s5893_s27 = sld [smem:[#allocation53_spill]] }
0x2e91   : > { %s5894_s0 = sld [smem:[#allocation62_spill]]  ;;  %s5895_s28 = sld [smem:[#allocation83_spill]] }
0x2e92   : > { %s5896_s29 = sld [smem:[#allocation54_spill]]  ;;  %s5897_s30 = sld [smem:[#allocation55_spill]] }
0x2e93   : > { %s5898_s12 = sld [smem:[#allocation95_spill]]  ;;  %s5899_s13 = sld [smem:[#allocation56_spill]] }
0x2e94   : > { %s5900_s14 = sld [smem:[#allocation65_spill]]  ;;  %s5901_s15 = sld [smem:[#allocation94_spill]] }
0x2e95   : > { %s5902_s16 = sld [smem:[#allocation58_spill]]  ;;  %s5903_s17 = sld [smem:[#allocation57_spill]] }
0x2e96   : > { %s5904_s18 = sld [smem:[#allocation90_spill]]  ;;  %s5905_s19 = sld [smem:[#allocation60_spill]] }
0x2e97   : > { %s5906_s20 = sld [smem:[#allocation66_spill]]  ;;  %s5907_s21 = sld [smem:[#allocation93_spill]] }
0x2e98   : > { %p5428_p0 = scmp.ge.s32.totalorder %s5636_s4, 6   ;;  %s5910_s22 = sld [smem:[#allocation61_spill]] }
0x2e99   : > { %s5911_s23 = sld [smem:[#allocation67_spill]]  ;;  %s5912_s24 = sld [smem:[#allocation88_spill]] }
0x2e9a   : > { %s5908_s6 = scalar_select %p5428_p0, 1, 0 }
0x2e9b   : > { %s5913_s25 = sld [smem:[#allocation69_spill]]  ;;  %s5914_s26 = sld [smem:[#allocation70_spill]] }
0x2e9c   : > { %5909 = sst [smem:[#allocation60_spill]] %s5908_s6  ;;  %s5915_s10 = sld [smem:[#allocation59_spill]] }
0x2e9d   : > { %s5916_s5 = sld [smem:[#allocation71_spill]]  ;;  %s5917_s8 = sld [smem:[#allocation72_spill]] }
0x2e9e   : > { %s5918_s2 = sld [smem:[#allocation85_spill]]  ;;  %5919 = sst [smem:[#allocation52_spill]] %s5901_s15 }
0x2e9f   : > { %s5920_s3 = sld [smem:[#allocation73_spill]]  ;;  %5921 = sst [smem:[#allocation53_spill]] %s5902_s16 }
0x2ea0   : > { %s5922_s7 = sld [smem:[#allocation74_spill]]  ;;  %s5923_s4 = sld [smem:[#allocation91_spill]] }
0x2ea1   : > { %s5924_s1 = sld [smem:[#allocation77_spill]]  ;;  %s5925_s11 = sld [smem:[#allocation78_spill]] }
0x2ea2   : > { %s5926_s6 = sld [smem:[#allocation80_spill]]  ;;  %s5927_s9 = sld [smem:[#allocation81_spill]] }
0x2ea3   : > { %s5928_s15 = sld [smem:[#allocation79_spill]]  ;;  %5930 = sst [smem:[#allocation54_spill]] %s5914_s26 }
0x2ea4   : > { %5931 = sst [smem:[#allocation55_spill]] %s5915_s10  ;;  %s5932_s10 = smov %s5916_s5 }
0x2ea5   : > { %5933 = sst [smem:[#allocation56_spill]] %s5917_s8  ;;  %s5934_s8 = smov %s5918_s2 }
0x2ea6   : > { %5935 = sst [smem:[#allocation57_spill]] %s5920_s3  ;;  %s5937_s2 = smov %s5923_s4 }
0x2ea7   : > { %5936 = sst [smem:[#allocation58_spill]] %s5922_s7  ;;  %47 = sbr.rel (!%p5428_p0) target bundleno = 54 (0x36), region = 234 }
0x2ea8   : > { %5938 = sst [smem:[#allocation59_spill]] %s5924_s1  ;;  %s5940_s5 = smov %s5926_s6 }
0x2ea9   : > { %5939 = sst [smem:[#allocation60_spill]] %s5925_s11  ;;  %s5941_s3 = smov %s5927_s9 }
0x2eaa   : > { %s5942_s26 = sadd.s32 1, %s5928_s15  }
0x2eab   : > { %5943 = sst [smem:[#allocation61_spill]] %s5942_s26 }
0x2eae   :  { %2162 = vsyncpa [#allocation6], 1 }
0x2eaf   :  { %2164 = vsyncpa [#allocation6 + $0x1], 1 }
0x2eb0   :  { %2165 = vsyncpa [#allocation11], 1 }
0x2eb1   :  { %2167 = vsyncpa [#allocation11 + $0x1], 1 }
0x2eb2   :  { %2168 = vsyncpa [#allocation14], 1 }
0x2eb3   :  { %2170 = vsyncpa [#allocation14 + $0x1], 1 }
0x2eb4   :  { %2171 = vsyncpa [#allocation17], 1 }
0x2eb5   :  { %2173 = vsyncpa [#allocation17 + $0x1], 1 }
0x2eb6   :  { %2174 = vsyncpa [#allocation20], 1 }
0x2eb7   :  { %2176 = vsyncpa [#allocation20 + $0x1], 1 }
0x2eb8   :  { %2177 = vsyncpa [#allocation7], 1 }
0x2eb9   :  { %2179 = vsyncpa [#allocation7 + $0x1], 1 }
0x2eba   :  { %2180 = vsyncpa [#allocation23], 1 }
0x2ebb   :  { %2182 = vsyncpa [#allocation23 + $0x1], 1 }
0x2ebc   :  { %2183 = vsyncpa [#allocation8], 1 }
0x2ebd   :  { %2185 = vsyncpa [#allocation8 + $0x1], 1 }

</bundles_post_ra>
